<compile_context>
chip_gen: v6e
topology: v6e:2x2x1
jax: 0.10.0
libtpu: 0.0.40
codegen_flags: <defaults>
</compile_context>

<pallas_src>
import functools
import math

import jax
import jax.numpy as jnp
from jax.experimental import pallas as pl
from jax.experimental.pallas import tpu as pltpu


_VMEM_LIMIT = 32 * 1024 * 1024   # leaves headroom on v7x (64 MiB per TensorCore)
_LANE = 128


# ------------------------------ tiling helper --------------------------------

def _pick_tile(dim, preferred, align, min_blocks=1):
    """Largest divisor of `dim` that is <= preferred and a multiple of `align`.
    With min_blocks>1 it also tries to produce at least that many grid blocks
    (megacore / v7x two-core utilisation).  Falls back to the full dim, which is
    always a legal block."""
    if min_blocks > 1:
        preferred = max(1, min(preferred, dim // min_blocks))
    if dim <= preferred:
        return dim
    for t in range(preferred, 0, -1):
        if dim % t == 0 and t % align == 0:
            return t
    return dim


# ------------------------- fused (LN) + matmul kernel -------------------------

def _fused_matmul_kernel(*refs, has_ln, activation, has_residual, eps):
    idx = 0
    x_ref = refs[idx]; idx += 1
    if has_ln:
        g_ref = refs[idx]; idx += 1
        bln_ref = refs[idx]; idx += 1
    w_ref = refs[idx]; idx += 1
    b_ref = refs[idx]; idx += 1
    if has_residual:
        r_ref = refs[idx]; idx += 1
    o_ref = refs[idx]

    x = x_ref[...]
    if has_ln:                       # LayerNorm over the channel (K) dim, f32
        xf = x.astype(jnp.float32)
        mu = jnp.mean(xf, axis=-1, keepdims=True)
        xc = xf - mu
        var = jnp.mean(xc * xc, axis=-1, keepdims=True)
        xn = xc * jax.lax.rsqrt(var + eps) * g_ref[...] + bln_ref[...]
        x = xn.astype(w_ref.dtype)

    acc = jnp.dot(x, w_ref[...], preferred_element_type=jnp.float32)
    acc = acc + b_ref[...]
    if activation == "gelu":         # exact erf-based GELU (torch nn.GELU default)
        acc = 0.5 * acc * (1.0 + jax.lax.erf(acc * (1.0 / math.sqrt(2.0))))
    if has_residual:
        acc = acc + r_ref[...].astype(jnp.float32)
    o_ref[...] = acc.astype(o_ref.dtype)


def fused_linear(x, w, b, *, ln_params=None, activation=None, residual=None,
                 out_dtype=jnp.bfloat16, eps=1e-6):
    """out = [residual +] act( LN?(x) @ w + b ).

    Tiled over M only.  K and N are kept whole (all weights of this module are
    at most hidden x 3*hidden, well inside VMEM), so LayerNorm runs once per M
    tile and the weight matrix is DMA'd exactly once (constant block index)."""
    M, K = x.shape
    N = w.shape[1]
    tm = _pick_tile(M, 512, 16, min_blocks=2)

    inputs = [x]
    in_specs = [pl.BlockSpec((tm, K), lambda i: (i, 0))]
    if ln_params is not None:
        g, bln = ln_params
        inputs += [g.reshape(1, K).astype(jnp.float32),
                   bln.reshape(1, K).astype(jnp.float32)]
        in_specs += [pl.BlockSpec((1, K), lambda i: (0, 0)),
                     pl.BlockSpec((1, K), lambda i: (0, 0))]
    inputs += [w, b.reshape(1, N).astype(jnp.float32)]
    in_specs += [pl.BlockSpec((K, N), lambda i: (0, 0)),
                 pl.BlockSpec((1, N), lambda i: (0, 0))]
    if residual is not None:
        inputs.append(residual)
        in_specs.append(pl.BlockSpec((tm, N), lambda i: (i, 0)))

    kernel = functools.partial(_fused_matmul_kernel,
                               has_ln=ln_params is not None,
                               activation=activation,
                               has_residual=residual is not None,
                               eps=eps)
    return pl.pallas_call(
        kernel,
        out_shape=jax.ShapeDtypeStruct((M, N), out_dtype),
        grid=(M // tm,),
        in_specs=in_specs,
        out_specs=pl.BlockSpec((tm, N), lambda i: (i, 0)),
        compiler_params=pltpu.CompilerParams(
            dimension_semantics=("parallel",),
            vmem_limit_bytes=_VMEM_LIMIT),
    )(*inputs)


# --------------------------- flash-style attention ----------------------------

def _flash_mha_kernel(q_ref, k_ref, v_ref, o_ref, m_ref, l_ref, acc_ref,
                      *, heads_per_group, head_dim, scale):
    ki = pl.program_id(3)

    @pl.when(ki == 0)
    def _():
        m_ref[...] = jnp.full_like(m_ref, -jnp.inf)
        l_ref[...] = jnp.zeros_like(l_ref)
        acc_ref[...] = jnp.zeros_like(acc_ref)

    qb = q_ref[0]        # (tq, 128) bf16 -- heads_per_group heads packed in lanes
    kb = k_ref[0]        # (tk, 128)
    vb = v_ref[0]        # (tk, 128)

    for h in range(heads_per_group):        # small (4-wide) static unroll
        sl = slice(h * head_dim, (h + 1) * head_dim)
        qh = qb[:, sl] * scale              # scale folded into the (tq, dh) q slice
        kh = kb[:, sl]
        vh = vb[:, sl]
        # s = q_h k_h^T   (contract last dims of both; no transpose emitted)
        s = jax.lax.dot_general(qh, kh, (((1,), (1,)), ((), ())),
                                preferred_element_type=jnp.float32)     # (tq, tk)
        m_prev = m_ref[h]                                               # (tq, 128)
        l_prev = l_ref[h]
        s_max = jnp.max(s, axis=-1, keepdims=True)                      # (tq, 1)
        m_new = jnp.maximum(m_prev, s_max)
        alpha = jnp.exp(m_prev - m_new)
        p = jnp.exp(s - m_new[:, 0:1])                                  # (tq, tk)
        l_ref[h] = alpha * l_prev + jnp.sum(p, axis=-1, keepdims=True)
        pv = jax.lax.dot_general(p.astype(vb.dtype), vh,
                                 (((1,), (0,)), ((), ())),
                                 preferred_element_type=jnp.float32)    # (tq, dh)
        acc_ref[h] = alpha[:, :head_dim] * acc_ref[h] + pv
        m_ref[h] = m_new

    @pl.when(ki == pl.num_programs(3) - 1)
    def _():
        outs = [acc_ref[h] / l_ref[h][:, :head_dim]
                for h in range(heads_per_group)]
        # lane-dense 128-wide store, heads packed back along C
        o_ref[0] = jnp.concatenate(outs, axis=-1).astype(o_ref.dtype)


def flash_mha_from_qkv(qkv, *, num_heads, dim):
    """Flash-style MHA that reads q/k/v straight out of the packed qkv matmul
    output.  qkv: [B, L, 3*dim] with column layout [q | k | v] (heads packed
    inside each third).  Returns [B, L, dim]."""
    B, L, three_c = qkv.shape
    assert three_c == 3 * dim
    assert dim % num_heads == 0
    head_dim = dim // num_heads
    assert dim % _LANE == 0, "hidden dim must be a multiple of 128 lanes"
    assert _LANE % head_dim == 0, "head_dim must divide 128"
    heads_per_group = _LANE // head_dim
    n_groups = dim // _LANE
    scale = 1.0 / math.sqrt(head_dim)
    tq = _pick_tile(L, 256, 8)
    tk = _pick_tile(L, 256, 8)

    kernel = functools.partial(_flash_mha_kernel,
                               heads_per_group=heads_per_group,
                               head_dim=head_dim, scale=scale)
    return pl.pallas_call(
        kernel,
        out_shape=jax.ShapeDtypeStruct((B, L, dim), qkv.dtype),
        grid=(B, n_groups, L // tq, L // tk),
        in_specs=[
            # q / k / v blocks are column-block views of the same packed array
            pl.BlockSpec((1, tq, _LANE), lambda b, g, qi, ki: (b, qi, g)),
            pl.BlockSpec((1, tk, _LANE),
                         lambda b, g, qi, ki: (b, ki, n_groups + g)),
            pl.BlockSpec((1, tk, _LANE),
                         lambda b, g, qi, ki: (b, ki, 2 * n_groups + g)),
        ],
        out_specs=pl.BlockSpec((1, tq, _LANE), lambda b, g, qi, ki: (b, qi, g)),
        scratch_shapes=[
            pltpu.VMEM((heads_per_group, tq, _LANE), jnp.float32),     # running max
            pltpu.VMEM((heads_per_group, tq, _LANE), jnp.float32),     # running sum
            pltpu.VMEM((heads_per_group, tq, head_dim), jnp.float32),  # accumulator
        ],
        compiler_params=pltpu.CompilerParams(
            dimension_semantics=("parallel", "parallel", "parallel", "arbitrary"),
            vmem_limit_bytes=_VMEM_LIMIT),
    )(qkv, qkv, qkv)


# ----------------------- depthwise 3x3 conv (+ residual) ----------------------

def _dwconv3x3_res_kernel(x_ref, w_ref, b_ref, o_ref, xp_ref):
    H, W = x_ref.shape[1], x_ref.shape[2]
    xc = x_ref[0].astype(jnp.float32)                 # (H, W, tc)
    # build the 1-pixel zero halo in VMEM (no HBM pad round-trip)
    xp_ref[...] = jnp.zeros_like(xp_ref)
    xp_ref[1:H + 1, 1:W + 1, :] = xc
    acc = xc + b_ref[...].astype(jnp.float32)         # residual + conv bias
    for kh in range(3):
        for kw in range(3):
            acc = acc + (xp_ref[kh:kh + H, kw:kw + W, :]
                         * w_ref[kh * 3 + kw].astype(jnp.float32))
    o_ref[0] = acc.astype(o_ref.dtype)


def dwconv3x3_residual(x_nhwc, w9, b):
    """x + depthwise_conv3x3(x) (padding=1, with bias).
    x:[B,H,W,C], w9:[9,C] (tap-major), b:[C].  Tiled over (batch, channel
    blocks): depthwise conv is exact under channel tiling and needs no halo."""
    B, H, W, C = x_nhwc.shape
    tc = _pick_tile(C, _LANE, _LANE)
    return pl.pallas_call(
        _dwconv3x3_res_kernel,
        out_shape=jax.ShapeDtypeStruct((B, H, W, C), x_nhwc.dtype),
        grid=(B, C // tc),
        in_specs=[pl.BlockSpec((1, H, W, tc), lambda bi, ci: (bi, 0, 0, ci)),
                  pl.BlockSpec((9, tc), lambda bi, ci: (0, ci)),
                  pl.BlockSpec((1, tc), lambda bi, ci: (0, ci))],
        out_specs=pl.BlockSpec((1, H, W, tc), lambda bi, ci: (bi, 0, 0, ci)),
        scratch_shapes=[pltpu.VMEM((H + 2, W + 2, tc), jnp.float32)],
        compiler_params=pltpu.CompilerParams(
            dimension_semantics=("parallel", "parallel"),
            vmem_limit_bytes=_VMEM_LIMIT),
    )(x_nhwc, w9, b.reshape(1, C))


# -------------------------- BatchNorm2d (batch stats) -------------------------

def _bn_moments_kernel(x_ref, o_ref):
    @pl.when(pl.program_id(0) == 0)
    def _():
        o_ref[...] = jnp.zeros_like(o_ref)
    x = x_ref[...].astype(jnp.float32)
    o_ref[0:1, :] = o_ref[0:1, :] + jnp.sum(x, axis=0, keepdims=True)
    o_ref[1:2, :] = o_ref[1:2, :] + jnp.sum(x * x, axis=0, keepdims=True)


def _bn_affine_kernel(x_ref, s_ref, t_ref, o_ref):
    o_ref[...] = (x_ref[...].astype(jnp.float32) * s_ref[...] + t_ref[...]
                  ).astype(o_ref.dtype)


def batchnorm2d_batchstats(x_tokens, gamma, beta, eps=1e-5, out_dtype=jnp.float32):
    """BatchNorm2d over tokens [N*H*W, C] with per-channel batch (train-mode)
    statistics.  Two tiled passes (sum/sumsq reduction, then affine) so it
    stays VMEM-safe for large batches (v7x: 64 MiB VMEM per core)."""
    M, C = x_tokens.shape
    tr = _pick_tile(M, 1024, 8)
    moments = pl.pallas_call(
        _bn_moments_kernel,
        out_shape=jax.ShapeDtypeStruct((2, C), jnp.float32),
        grid=(M // tr,),
        in_specs=[pl.BlockSpec((tr, C), lambda i: (i, 0))],
        out_specs=pl.BlockSpec((2, C), lambda i: (0, 0)),
        compiler_params=pltpu.CompilerParams(
            dimension_semantics=("arbitrary",),
            vmem_limit_bytes=_VMEM_LIMIT),
    )(x_tokens)

    mean = moments[0] / M
    var = moments[1] / M - mean * mean          # biased variance (train-mode BN)
    scale = gamma * jax.lax.rsqrt(var + eps)
    shift = beta - mean * scale

    tm = _pick_tile(M, 1024, 8, min_blocks=2)
    return pl.pallas_call(
        _bn_affine_kernel,
        out_shape=jax.ShapeDtypeStruct((M, C), out_dtype),
        grid=(M // tm,),
        in_specs=[pl.BlockSpec((tm, C), lambda i: (i, 0)),
                  pl.BlockSpec((1, C), lambda i: (0, 0)),
                  pl.BlockSpec((1, C), lambda i: (0, 0))],
        out_specs=pl.BlockSpec((tm, C), lambda i: (i, 0)),
        compiler_params=pltpu.CompilerParams(
            dimension_semantics=("parallel",),
            vmem_limit_bytes=_VMEM_LIMIT),
    )(x_tokens, scale.reshape(1, C), shift.reshape(1, C))


# --------------------------------- parameters ---------------------------------

def init_params(key, *, in_channels, hidden, patch, depth, mlp_ratio):
    """Random parameters with the torch module's shapes.  Weights feeding MXU
    matmuls are pre-reshaped / pre-cast to bf16 ONCE here (not per forward)."""
    std = 0.02
    keys = iter(jax.random.split(key, 8 * depth + 8))
    patch_w = std * jax.random.normal(
        next(keys), (hidden, in_channels, patch, patch), jnp.float32)
    p = {
        # Conv2d(k=stride=patch) expressed as a [Cin*p*p, hidden] matmul weight.
        "patch_w": patch_w.reshape(hidden, in_channels * patch * patch).T
                          .astype(jnp.bfloat16),
        "patch_b": jnp.zeros((hidden,), jnp.float32),
        "bn_g": jnp.ones((hidden,), jnp.float32),
        "bn_b": jnp.zeros((hidden,), jnp.float32),
        "blocks": [],
    }
    for _ in range(depth):
        dw_w = std * jax.random.normal(next(keys), (hidden, 1, 3, 3), jnp.float32)
        p["blocks"].append({
            "dw_w9": dw_w.reshape(hidden, 9).T,            # [C,1,3,3] -> [9,C]
            "dw_b": jnp.zeros((hidden,), jnp.float32),
            "ln1_g": jnp.ones((hidden,), jnp.float32),
            "ln1_b": jnp.zeros((hidden,), jnp.float32),
            "ln2_g": jnp.ones((hidden,), jnp.float32),
            "ln2_b": jnp.zeros((hidden,), jnp.float32),
            "qkv_w": (std * jax.random.normal(
                next(keys), (hidden, 3 * hidden), jnp.float32)).astype(jnp.bfloat16),
            "qkv_b": jnp.zeros((3 * hidden,), jnp.float32),
            "proj_w": (std * jax.random.normal(
                next(keys), (hidden, hidden), jnp.float32)).astype(jnp.bfloat16),
            "proj_b": jnp.zeros((hidden,), jnp.float32),
            "fc1_w": (std * jax.random.normal(
                next(keys), (hidden, mlp_ratio * hidden), jnp.float32)).astype(jnp.bfloat16),
            "fc1_b": jnp.zeros((mlp_ratio * hidden,), jnp.float32),
            "fc2_w": (std * jax.random.normal(
                next(keys), (mlp_ratio * hidden, hidden), jnp.float32)).astype(jnp.bfloat16),
            "fc2_b": jnp.zeros((hidden,), jnp.float32),
        })
    return p


# -------------------------------- forward pass --------------------------------

def block_forward(x_nhwc, blk, *, num_heads):
    B, H, W, C = x_nhwc.shape
    L = H * W

    # (1) conditional positional encoding: x = x + dwconv3x3(x)   (residual fused)
    x_nhwc = dwconv3x3_residual(x_nhwc, blk["dw_w9"], blk["dw_b"])
    tokens = x_nhwc.reshape(B * L, C)

    # (2) attention branch: x = x + proj(attn(LN1(x)))
    #     LN fused into the qkv matmul; flash attention reads q/k/v straight out
    #     of the packed [B, L, 3C] qkv output; residual fused into the proj matmul.
    qkv = fused_linear(tokens, blk["qkv_w"], blk["qkv_b"],
                       ln_params=(blk["ln1_g"], blk["ln1_b"]))      # [B*L, 3C] bf16
    o = flash_mha_from_qkv(qkv.reshape(B, L, 3 * C), num_heads=num_heads, dim=C)
    tokens = fused_linear(o.reshape(B * L, C), blk["proj_w"], blk["proj_b"],
                          residual=tokens)

    # (3) MLP branch: x = x + fc2(GELU(fc1(LN2(x))))   (LN+GELU fused into fc1,
    #     residual fused into fc2)
    h = fused_linear(tokens, blk["fc1_w"], blk["fc1_b"],
                     ln_params=(blk["ln2_g"], blk["ln2_b"]), activation="gelu")
    tokens = fused_linear(h, blk["fc2_w"], blk["fc2_b"], residual=tokens)
    return tokens.reshape(B, H, W, C)


def transformer_forward(x_nchw, params, *, patch, num_heads):
    # --- Embeddings (non-hybrid): Conv2d(k=stride=patch) == patch-extract + matmul
    B, Cin, H, W = x_nchw.shape
    hidden = params["patch_b"].shape[0]
    Hp, Wp = H // patch, W // patch
    patches = x_nchw.reshape(B, Cin, Hp, patch, Wp, patch)
    patches = jnp.transpose(patches, (0, 2, 4, 1, 3, 5)).reshape(
        B * Hp * Wp, Cin * patch * patch)
    emb = fused_linear(patches.astype(jnp.bfloat16), params["patch_w"],
                       params["patch_b"])                  # [B*Hp*Wp, hidden] bf16
    features = None                                        # hybrid == False

    # --- Encoder: 4 Blocks, then BatchNorm2d (batch stats), pre_logits = Identity
    x = emb.reshape(B, Hp, Wp, hidden)
    for blk in params["blocks"]:
        x = block_forward(x, blk, num_heads=num_heads)
    tok = batchnorm2d_batchstats(x.reshape(B * Hp * Wp, hidden),
                                 params["bn_g"], params["bn_b"], eps=1e-5)
    encoded = jnp.transpose(tok.reshape(B, Hp, Wp, hidden), (0, 3, 1, 2))  # NCHW
    return encoded, features


# ------------------------------------ main -------------------------------------

if __name__ == "__main__":
    # Small shapes (scaled down from dim=768 / img=384 of the original config,
    # but keeping the 128-lane dim full and head_dim=32 as in the Encoder).
    B, Cin, H, W = 2, 3, 16, 16
    patch = 4
    hidden = 128         # config.hidden_size (768 in the original)
    head_dim = 32        # Encoder(head_dim=32) -> num_heads = hidden // head_dim
    num_heads = hidden // head_dim
    depth = 4            # Encoder(depth=[4])
    mlp_ratio = 3

    key = jax.random.PRNGKey(0)
    kx, kp = jax.random.split(key)
    x = jax.random.normal(kx, (B, Cin, H, W), jnp.float32)
    params = init_params(kp, in_channels=Cin, hidden=hidden, patch=patch,
                         depth=depth, mlp_ratio=mlp_ratio)

    fwd = jax.jit(functools.partial(transformer_forward, patch=patch,
                                    num_heads=num_heads))
    encoded, features = fwd(x, params)
    jax.block_until_ready(encoded)

    assert encoded.shape == (B, hidden, H // patch, W // patch), encoded.shape
    assert features is None
    assert bool(jnp.all(jnp.isfinite(encoded)))
    print("KERNEL_OK")
</pallas_src>

<mosaic_0001>
module attributes {stable_mosaic.version = 11 : i64} {
  func.func @_fused_matmul_kernel(%arg0: i32, %arg1: memref<16x48xbf16, #tpu.memory_space<vmem>>, %arg2: memref<48x128xbf16, #tpu.memory_space<vmem>>, %arg3: memref<1x128xf32, #tpu.memory_space<vmem>>, %arg4: memref<16x128xbf16, #tpu.memory_space<vmem>>) attributes {dimension_semantics = [#tpu.dimension_semantics<parallel>], iteration_bounds = array<i64: 2>, scalar_prefetch = 0 : i64, scratch_operands = 0 : i64, tpu.core_type = #tpu.core_type<tc>, window_params = [{transform_indices = @transform_0, window_bounds = array<i64: 16, 48>}, {pipeline_mode = #tpu.pipeline_mode<synchronous>, transform_indices = @transform_1, window_bounds = array<i64: 48, 128>}, {pipeline_mode = #tpu.pipeline_mode<synchronous>, transform_indices = @transform_2, window_bounds = array<i64: 1, 128>}, {transform_indices = @transform_3, window_bounds = array<i64: 16, 128>}]} {
    %c0 = arith.constant 0 : index
    %c0_0 = arith.constant 0 : index
    %0 = vector.load %arg1[%c0, %c0_0] : memref<16x48xbf16, #tpu.memory_space<vmem>>, vector<16x48xbf16>
    %c0_1 = arith.constant 0 : index
    %c0_2 = arith.constant 0 : index
    %1 = vector.load %arg2[%c0_1, %c0_2] : memref<48x128xbf16, #tpu.memory_space<vmem>>, vector<48x128xbf16>
    %cst = arith.constant dense<0.000000e+00> : vector<16x128xf32>
    %2 = tpu.matmul %0, %1, %cst {dimension_numbers = #tpu.dot_dimension_numbers<[1], [0], [0], [1], [0, 0, 1, 1], [], []>} : vector<16x48xbf16>, vector<48x128xbf16>, vector<16x128xf32> -> vector<16x128xf32>
    %c0_3 = arith.constant 0 : index
    %c0_4 = arith.constant 0 : index
    %3 = vector.load %arg3[%c0_3, %c0_4] : memref<1x128xf32, #tpu.memory_space<vmem>>, vector<1x128xf32>
    %4 = vector.broadcast %3 : vector<1x128xf32> to vector<16x128xf32>
    %5 = arith.addf %2, %4 : vector<16x128xf32>
    %6 = arith.truncf %5 : vector<16x128xf32> to vector<16x128xbf16>
    %c0_5 = arith.constant 0 : index
    %c0_6 = arith.constant 0 : index
    %7 = vector.load %arg4[%c0_5, %c0_6] : memref<16x128xbf16, #tpu.memory_space<vmem>>, vector<16x128xbf16>
    tpu.vector_store %arg4[%c0_5, %c0_6], %6 {strides = array<i32>} : memref<16x128xbf16, #tpu.memory_space<vmem>>, vector<16x128xbf16>,
    return
  }
  func.func @transform_0(%arg0: i32) -> (i32, i32) {
    %c0_i32 = arith.constant 0 : i32
    %c0_i32_0 = arith.constant 0 : i32
    return %arg0, %c0_i32 : i32, i32
  }
  func.func @transform_1(%arg0: i32) -> (i32, i32) {
    %c0_i32 = arith.constant 0 : i32
    %c0_i32_0 = arith.constant 0 : i32
    %c0_i32_1 = arith.constant 0 : i32
    return %c0_i32, %c0_i32_0 : i32, i32
  }
  func.func @transform_2(%arg0: i32) -> (i32, i32) {
    %c0_i32 = arith.constant 0 : i32
    %c0_i32_0 = arith.constant 0 : i32
    %c0_i32_1 = arith.constant 0 : i32
    return %c0_i32, %c0_i32_0 : i32, i32
  }
  func.func @transform_3(%arg0: i32) -> (i32, i32) {
    %c0_i32 = arith.constant 0 : i32
    %c0_i32_0 = arith.constant 0 : i32
    return %arg0, %c0_i32 : i32, i32
  }
}

module attributes {stable_mosaic.version = 11 : i64} {
  func.func @_fused_matmul_kernel(%arg0: i32, %arg1: memref<16x128xbf16, #tpu.memory_space<vmem>>, %arg2: memref<1x128xf32, #tpu.memory_space<vmem>>, %arg3: memref<1x128xf32, #tpu.memory_space<vmem>>, %arg4: memref<128x384xbf16, #tpu.memory_space<vmem>>, %arg5: memref<1x384xf32, #tpu.memory_space<vmem>>, %arg6: memref<16x384xbf16, #tpu.memory_space<vmem>>) attributes {dimension_semantics = [#tpu.dimension_semantics<parallel>], iteration_bounds = array<i64: 2>, scalar_prefetch = 0 : i64, scratch_operands = 0 : i64, tpu.core_type = #tpu.core_type<tc>, window_params = [{transform_indices = @transform_0, window_bounds = array<i64: 16, 128>}, {pipeline_mode = #tpu.pipeline_mode<synchronous>, transform_indices = @transform_1, window_bounds = array<i64: 1, 128>}, {pipeline_mode = #tpu.pipeline_mode<synchronous>, transform_indices = @transform_2, window_bounds = array<i64: 1, 128>}, {pipeline_mode = #tpu.pipeline_mode<synchronous>, transform_indices = @transform_3, window_bounds = array<i64: 128, 384>}, {pipeline_mode = #tpu.pipeline_mode<synchronous>, transform_indices = @transform_4, window_bounds = array<i64: 1, 384>}, {transform_indices = @transform_5, window_bounds = array<i64: 16, 384>}]} {
    %c0 = arith.constant 0 : index
    %c0_0 = arith.constant 0 : index
    %0 = vector.load %arg1[%c0, %c0_0] : memref<16x128xbf16, #tpu.memory_space<vmem>>, vector<16x128xbf16>
    %1 = arith.extf %0 : vector<16x128xbf16> to vector<16x128xf32>
    %cst = arith.constant dense<0.000000e+00> : vector<16xf32>
    %2 = vector.multi_reduction <add>, %1, %cst [1] : vector<16x128xf32> to vector<16xf32>
    %3 = vector.shape_cast %2 : vector<16xf32> to vector<16x1xf32>
    %cst_1 = arith.constant 1.280000e+02 : f32
    %4 = vector.broadcast %cst_1 : f32 to vector<16x1xf32>
    %5 = arith.divf %3, %4 : vector<16x1xf32>
    %6 = vector.broadcast %5 : vector<16x1xf32> to vector<16x128xf32>
    %7 = arith.subf %1, %6 : vector<16x128xf32>
    %8 = arith.mulf %7, %7 : vector<16x128xf32>
    %cst_2 = arith.constant dense<0.000000e+00> : vector<16xf32>
    %9 = vector.multi_reduction <add>, %8, %cst_2 [1] : vector<16x128xf32> to vector<16xf32>
    %10 = vector.shape_cast %9 : vector<16xf32> to vector<16x1xf32>
    %cst_3 = arith.constant 1.280000e+02 : f32
    %11 = vector.broadcast %cst_3 : f32 to vector<16x1xf32>
    %12 = arith.divf %10, %11 : vector<16x1xf32>
    %cst_4 = arith.constant 9.99999997E-7 : f32
    %13 = vector.broadcast %cst_4 : f32 to vector<16x1xf32>
    %14 = arith.addf %12, %13 : vector<16x1xf32>
    %15 = math.rsqrt %14 : vector<16x1xf32>
    %16 = vector.broadcast %15 : vector<16x1xf32> to vector<16x128xf32>
    %17 = arith.mulf %7, %16 : vector<16x128xf32>
    %c0_5 = arith.constant 0 : index
    %c0_6 = arith.constant 0 : index
    %18 = vector.load %arg2[%c0_5, %c0_6] : memref<1x128xf32, #tpu.memory_space<vmem>>, vector<1x128xf32>
    %19 = vector.broadcast %18 : vector<1x128xf32> to vector<16x128xf32>
    %20 = arith.mulf %17, %19 : vector<16x128xf32>
    %c0_7 = arith.constant 0 : index
    %c0_8 = arith.constant 0 : index
    %21 = vector.load %arg3[%c0_7, %c0_8] : memref<1x128xf32, #tpu.memory_space<vmem>>, vector<1x128xf32>
    %22 = vector.broadcast %21 : vector<1x128xf32> to vector<16x128xf32>
    %23 = arith.addf %20, %22 : vector<16x128xf32>
    %24 = arith.truncf %23 : vector<16x128xf32> to vector<16x128xbf16>
    %c0_9 = arith.constant 0 : index
    %c0_10 = arith.constant 0 : index
    %25 = vector.load %arg4[%c0_9, %c0_10] : memref<128x384xbf16, #tpu.memory_space<vmem>>, vector<128x384xbf16>
    %cst_11 = arith.constant dense<0.000000e+00> : vector<16x384xf32>
    %26 = tpu.matmul %24, %25, %cst_11 {dimension_numbers = #tpu.dot_dimension_numbers<[1], [0], [0], [1], [0, 0, 1, 1], [], []>} : vector<16x128xbf16>, vector<128x384xbf16>, vector<16x384xf32> -> vector<16x384xf32>
    %c0_12 = arith.constant 0 : index
    %c0_13 = arith.constant 0 : index
    %27 = vector.load %arg5[%c0_12, %c0_13] : memref<1x384xf32, #tpu.memory_space<vmem>>, vector<1x384xf32>
    %28 = vector.broadcast %27 : vector<1x384xf32> to vector<16x384xf32>
    %29 = arith.addf %26, %28 : vector<16x384xf32>
    %30 = arith.truncf %29 : vector<16x384xf32> to vector<16x384xbf16>
    %c0_14 = arith.constant 0 : index
    %c0_15 = arith.constant 0 : index
    %31 = vector.load %arg6[%c0_14, %c0_15] : memref<16x384xbf16, #tpu.memory_space<vmem>>, vector<16x384xbf16>
    tpu.vector_store %arg6[%c0_14, %c0_15], %30 {strides = array<i32>} : memref<16x384xbf16, #tpu.memory_space<vmem>>, vector<16x384xbf16>,
    return
  }
  func.func @transform_0(%arg0: i32) -> (i32, i32) {
    %c0_i32 = arith.constant 0 : i32
    %c0_i32_0 = arith.constant 0 : i32
    return %arg0, %c0_i32 : i32, i32
  }
  func.func @transform_1(%arg0: i32) -> (i32, i32) {
    %c0_i32 = arith.constant 0 : i32
    %c0_i32_0 = arith.constant 0 : i32
    %c0_i32_1 = arith.constant 0 : i32
    return %c0_i32, %c0_i32_0 : i32, i32
  }
  func.func @transform_2(%arg0: i32) -> (i32, i32) {
    %c0_i32 = arith.constant 0 : i32
    %c0_i32_0 = arith.constant 0 : i32
    %c0_i32_1 = arith.constant 0 : i32
    return %c0_i32, %c0_i32_0 : i32, i32
  }
  func.func @transform_3(%arg0: i32) -> (i32, i32) {
    %c0_i32 = arith.constant 0 : i32
    %c0_i32_0 = arith.constant 0 : i32
    %c0_i32_1 = arith.constant 0 : i32
    return %c0_i32, %c0_i32_0 : i32, i32
  }
  func.func @transform_4(%arg0: i32) -> (i32, i32) {
    %c0_i32 = arith.constant 0 : i32
    %c0_i32_0 = arith.constant 0 : i32
    %c0_i32_1 = arith.constant 0 : i32
    return %c0_i32, %c0_i32_0 : i32, i32
  }
  func.func @transform_5(%arg0: i32) -> (i32, i32) {
    %c0_i32 = arith.constant 0 : i32
    %c0_i32_0 = arith.constant 0 : i32
    return %arg0, %c0_i32 : i32, i32
  }
}

module attributes {stable_mosaic.version = 11 : i64} {
  func.func @_dwconv3x3_res_kernel(%arg0: i32, %arg1: i32, %arg2: memref<1x4x4x128xbf16, #tpu.memory_space<vmem>>, %arg3: memref<9x128xf32, #tpu.memory_space<vmem>>, %arg4: memref<1x128xf32, #tpu.memory_space<vmem>>, %arg5: memref<1x4x4x128xbf16, #tpu.memory_space<vmem>>, %arg6: memref<6x6x128xf32, #tpu.memory_space<vmem>>) attributes {dimension_semantics = [#tpu.dimension_semantics<parallel>, #tpu.dimension_semantics<parallel>], iteration_bounds = array<i64: 2, 1>, scalar_prefetch = 0 : i64, scratch_operands = 1 : i64, tpu.core_type = #tpu.core_type<tc>, window_params = [{transform_indices = @transform_0, window_bounds = array<i64: 1, 4, 4, 128>}, {transform_indices = @transform_1, window_bounds = array<i64: 9, 128>}, {transform_indices = @transform_2, window_bounds = array<i64: 1, 128>}, {transform_indices = @transform_3, window_bounds = array<i64: 1, 4, 4, 128>}]} {
    %c0 = arith.constant 0 : index
    %c0_0 = arith.constant 0 : index
    %c0_1 = arith.constant 0 : index
    %c0_2 = arith.constant 0 : index
    %0 = vector.load %arg2[%c0, %c0_0, %c0_1, %c0_2] : memref<1x4x4x128xbf16, #tpu.memory_space<vmem>>, vector<1x4x4x128xbf16>
    %1 = vector.shape_cast %0 : vector<1x4x4x128xbf16> to vector<4x4x128xbf16>
    %2 = arith.extf %1 : vector<4x4x128xbf16> to vector<4x4x128xf32>
    %cst = arith.constant 0.000000e+00 : f32
    %3 = vector.broadcast %cst : f32 to vector<6x6x128xf32>
    %c0_3 = arith.constant 0 : index
    %c0_4 = arith.constant 0 : index
    %c0_5 = arith.constant 0 : index
    %4 = vector.load %arg6[%c0_3, %c0_4, %c0_5] : memref<6x6x128xf32, #tpu.memory_space<vmem>>, vector<6x6x128xf32>
    tpu.vector_store %arg6[%c0_3, %c0_4, %c0_5], %3 {strides = array<i32>} : memref<6x6x128xf32, #tpu.memory_space<vmem>>, vector<6x6x128xf32>,
    %c1 = arith.constant 1 : index
    %c1_6 = arith.constant 1 : index
    %c0_7 = arith.constant 0 : index
    %5 = vector.load %arg6[%c1, %c1_6, %c0_7] : memref<6x6x128xf32, #tpu.memory_space<vmem>>, vector<4x4x128xf32>
    tpu.vector_store %arg6[%c1, %c1_6, %c0_7], %2 {strides = array<i32>} : memref<6x6x128xf32, #tpu.memory_space<vmem>>, vector<4x4x128xf32>,
    %c0_8 = arith.constant 0 : index
    %c0_9 = arith.constant 0 : index
    %6 = vector.load %arg4[%c0_8, %c0_9] : memref<1x128xf32, #tpu.memory_space<vmem>>, vector<1x128xf32>
    %7 = vector.shape_cast %6 : vector<1x128xf32> to vector<1x1x128xf32>
    %8 = vector.broadcast %7 : vector<1x1x128xf32> to vector<4x4x128xf32>
    %9 = arith.addf %2, %8 : vector<4x4x128xf32>
    %c0_10 = arith.constant 0 : index
    %c0_11 = arith.constant 0 : index
    %c0_12 = arith.constant 0 : index
    %10 = vector.load %arg6[%c0_10, %c0_11, %c0_12] : memref<6x6x128xf32, #tpu.memory_space<vmem>>, vector<4x4x128xf32>
    %c0_13 = arith.constant 0 : index
    %c0_14 = arith.constant 0 : index
    %11 = vector.load %arg3[%c0_13, %c0_14] : memref<9x128xf32, #tpu.memory_space<vmem>>, vector<1x128xf32>
    %12 = vector.shape_cast %11 : vector<1x128xf32> to vector<128xf32>
    %13 = vector.shape_cast %12 : vector<128xf32> to vector<1x1x128xf32>
    %14 = vector.broadcast %13 : vector<1x1x128xf32> to vector<4x4x128xf32>
    %15 = arith.mulf %10, %14 : vector<4x4x128xf32>
    %16 = arith.addf %9, %15 : vector<4x4x128xf32>
    %c0_15 = arith.constant 0 : index
    %c1_16 = arith.constant 1 : index
    %c0_17 = arith.constant 0 : index
    %17 = vector.load %arg6[%c0_15, %c1_16, %c0_17] : memref<6x6x128xf32, #tpu.memory_space<vmem>>, vector<4x4x128xf32>
    %c1_18 = arith.constant 1 : index
    %c0_19 = arith.constant 0 : index
    %18 = vector.load %arg3[%c1_18, %c0_19] : memref<9x128xf32, #tpu.memory_space<vmem>>, vector<1x128xf32>
    %19 = vector.shape_cast %18 : vector<1x128xf32> to vector<128xf32>
    %20 = vector.shape_cast %19 : vector<128xf32> to vector<1x1x128xf32>
    %21 = vector.broadcast %20 : vector<1x1x128xf32> to vector<4x4x128xf32>
    %22 = arith.mulf %17, %21 : vector<4x4x128xf32>
    %23 = arith.addf %16, %22 : vector<4x4x128xf32>
    %c0_20 = arith.constant 0 : index
    %c2 = arith.constant 2 : index
    %c0_21 = arith.constant 0 : index
    %24 = vector.load %arg6[%c0_20, %c2, %c0_21] : memref<6x6x128xf32, #tpu.memory_space<vmem>>, vector<4x4x128xf32>
    %c2_22 = arith.constant 2 : index
    %c0_23 = arith.constant 0 : index
    %25 = vector.load %arg3[%c2_22, %c0_23] : memref<9x128xf32, #tpu.memory_space<vmem>>, vector<1x128xf32>
    %26 = vector.shape_cast %25 : vector<1x128xf32> to vector<128xf32>
    %27 = vector.shape_cast %26 : vector<128xf32> to vector<1x1x128xf32>
    %28 = vector.broadcast %27 : vector<1x1x128xf32> to vector<4x4x128xf32>
    %29 = arith.mulf %24, %28 : vector<4x4x128xf32>
    %30 = arith.addf %23, %29 : vector<4x4x128xf32>
    %c1_24 = arith.constant 1 : index
    %c0_25 = arith.constant 0 : index
    %c0_26 = arith.constant 0 : index
    %31 = vector.load %arg6[%c1_24, %c0_25, %c0_26] : memref<6x6x128xf32, #tpu.memory_space<vmem>>, vector<4x4x128xf32>
    %c3 = arith.constant 3 : index
    %c0_27 = arith.constant 0 : index
    %32 = vector.load %arg3[%c3, %c0_27] : memref<9x128xf32, #tpu.memory_space<vmem>>, vector<1x128xf32>
    %33 = vector.shape_cast %32 : vector<1x128xf32> to vector<128xf32>
    %34 = vector.shape_cast %33 : vector<128xf32> to vector<1x1x128xf32>
    %35 = vector.broadcast %34 : vector<1x1x128xf32> to vector<4x4x128xf32>
    %36 = arith.mulf %31, %35 : vector<4x4x128xf32>
    %37 = arith.addf %30, %36 : vector<4x4x128xf32>
    %c1_28 = arith.constant 1 : index
    %c1_29 = arith.constant 1 : index
    %c0_30 = arith.constant 0 : index
    %38 = vector.load %arg6[%c1_28, %c1_29, %c0_30] : memref<6x6x128xf32, #tpu.memory_space<vmem>>, vector<4x4x128xf32>
    %c4 = arith.constant 4 : index
    %c0_31 = arith.constant 0 : index
    %39 = vector.load %arg3[%c4, %c0_31] : memref<9x128xf32, #tpu.memory_space<vmem>>, vector<1x128xf32>
    %40 = vector.shape_cast %39 : vector<1x128xf32> to vector<128xf32>
    %41 = vector.shape_cast %40 : vector<128xf32> to vector<1x1x128xf32>
    %42 = vector.broadcast %41 : vector<1x1x128xf32> to vector<4x4x128xf32>
    %43 = arith.mulf %38, %42 : vector<4x4x128xf32>
    %44 = arith.addf %37, %43 : vector<4x4x128xf32>
    %c1_32 = arith.constant 1 : index
    %c2_33 = arith.constant 2 : index
    %c0_34 = arith.constant 0 : index
    %45 = vector.load %arg6[%c1_32, %c2_33, %c0_34] : memref<6x6x128xf32, #tpu.memory_space<vmem>>, vector<4x4x128xf32>
    %c5 = arith.constant 5 : index
    %c0_35 = arith.constant 0 : index
    %46 = vector.load %arg3[%c5, %c0_35] : memref<9x128xf32, #tpu.memory_space<vmem>>, vector<1x128xf32>
    %47 = vector.shape_cast %46 : vector<1x128xf32> to vector<128xf32>
    %48 = vector.shape_cast %47 : vector<128xf32> to vector<1x1x128xf32>
    %49 = vector.broadcast %48 : vector<1x1x128xf32> to vector<4x4x128xf32>
    %50 = arith.mulf %45, %49 : vector<4x4x128xf32>
    %51 = arith.addf %44, %50 : vector<4x4x128xf32>
    %c2_36 = arith.constant 2 : index
    %c0_37 = arith.constant 0 : index
    %c0_38 = arith.constant 0 : index
    %52 = vector.load %arg6[%c2_36, %c0_37, %c0_38] : memref<6x6x128xf32, #tpu.memory_space<vmem>>, vector<4x4x128xf32>
    %c6 = arith.constant 6 : index
    %c0_39 = arith.constant 0 : index
    %53 = vector.load %arg3[%c6, %c0_39] : memref<9x128xf32, #tpu.memory_space<vmem>>, vector<1x128xf32>
    %54 = vector.shape_cast %53 : vector<1x128xf32> to vector<128xf32>
    %55 = vector.shape_cast %54 : vector<128xf32> to vector<1x1x128xf32>
    %56 = vector.broadcast %55 : vector<1x1x128xf32> to vector<4x4x128xf32>
    %57 = arith.mulf %52, %56 : vector<4x4x128xf32>
    %58 = arith.addf %51, %57 : vector<4x4x128xf32>
    %c2_40 = arith.constant 2 : index
    %c1_41 = arith.constant 1 : index
    %c0_42 = arith.constant 0 : index
    %59 = vector.load %arg6[%c2_40, %c1_41, %c0_42] : memref<6x6x128xf32, #tpu.memory_space<vmem>>, vector<4x4x128xf32>
    %c7 = arith.constant 7 : index
    %c0_43 = arith.constant 0 : index
    %60 = vector.load %arg3[%c7, %c0_43] : memref<9x128xf32, #tpu.memory_space<vmem>>, vector<1x128xf32>
    %61 = vector.shape_cast %60 : vector<1x128xf32> to vector<128xf32>
    %62 = vector.shape_cast %61 : vector<128xf32> to vector<1x1x128xf32>
    %63 = vector.broadcast %62 : vector<1x1x128xf32> to vector<4x4x128xf32>
    %64 = arith.mulf %59, %63 : vector<4x4x128xf32>
    %65 = arith.addf %58, %64 : vector<4x4x128xf32>
    %c2_44 = arith.constant 2 : index
    %c2_45 = arith.constant 2 : index
    %c0_46 = arith.constant 0 : index
    %66 = vector.load %arg6[%c2_44, %c2_45, %c0_46] : memref<6x6x128xf32, #tpu.memory_space<vmem>>, vector<4x4x128xf32>
    %c8 = arith.constant 8 : index
    %c0_47 = arith.constant 0 : index
    %67 = vector.load %arg3[%c8, %c0_47] : memref<9x128xf32, #tpu.memory_space<vmem>>, vector<1x128xf32>
    %68 = vector.shape_cast %67 : vector<1x128xf32> to vector<128xf32>
    %69 = vector.shape_cast %68 : vector<128xf32> to vector<1x1x128xf32>
    %70 = vector.broadcast %69 : vector<1x1x128xf32> to vector<4x4x128xf32>
    %71 = arith.mulf %66, %70 : vector<4x4x128xf32>
    %72 = arith.addf %65, %71 : vector<4x4x128xf32>
    %73 = arith.truncf %72 : vector<4x4x128xf32> to vector<4x4x128xbf16>
    %c0_48 = arith.constant 0 : index
    %c0_49 = arith.constant 0 : index
    %c0_50 = arith.constant 0 : index
    %c0_51 = arith.constant 0 : index
    %74 = vector.load %arg5[%c0_48, %c0_49, %c0_50, %c0_51] : memref<1x4x4x128xbf16, #tpu.memory_space<vmem>>, vector<1x4x4x128xbf16>
    %75 = vector.shape_cast %74 : vector<1x4x4x128xbf16> to vector<4x4x128xbf16>
    %76 = vector.shape_cast %73 : vector<4x4x128xbf16> to vector<1x4x4x128xbf16>
    tpu.vector_store %arg5[%c0_48, %c0_49, %c0_50, %c0_51], %76 {strides = array<i32>} : memref<1x4x4x128xbf16, #tpu.memory_space<vmem>>, vector<1x4x4x128xbf16>,
    return
  }
  func.func @transform_0(%arg0: i32, %arg1: i32) -> (i32, i32, i32, i32) {
    %c0_i32 = arith.constant 0 : i32
    %c0_i32_0 = arith.constant 0 : i32
    %c0_i32_1 = arith.constant 0 : i32
    return %arg0, %c0_i32, %c0_i32_0, %arg1 : i32, i32, i32, i32
  }
  func.func @transform_1(%arg0: i32, %arg1: i32) -> (i32, i32) {
    %c0_i32 = arith.constant 0 : i32
    %c0_i32_0 = arith.constant 0 : i32
    return %c0_i32, %arg1 : i32, i32
  }
  func.func @transform_2(%arg0: i32, %arg1: i32) -> (i32, i32) {
    %c0_i32 = arith.constant 0 : i32
    %c0_i32_0 = arith.constant 0 : i32
    return %c0_i32, %arg1 : i32, i32
  }
  func.func @transform_3(%arg0: i32, %arg1: i32) -> (i32, i32, i32, i32) {
    %c0_i32 = arith.constant 0 : i32
    %c0_i32_0 = arith.constant 0 : i32
    %c0_i32_1 = arith.constant 0 : i32
    return %arg0, %c0_i32, %c0_i32_0, %arg1 : i32, i32, i32, i32
  }
}

module attributes {stable_mosaic.version = 11 : i64} {
  func.func @_flash_mha_kernel(%arg0: i32, %arg1: i32, %arg2: i32, %arg3: i32, %arg4: memref<1x16x128xbf16, #tpu.memory_space<vmem>>, %arg5: memref<1x16x128xbf16, #tpu.memory_space<vmem>>, %arg6: memref<1x16x128xbf16, #tpu.memory_space<vmem>>, %arg7: memref<1x16x128xbf16, #tpu.memory_space<vmem>>, %arg8: memref<4x16x128xf32, #tpu.memory_space<vmem>>, %arg9: memref<4x16x128xf32, #tpu.memory_space<vmem>>, %arg10: memref<4x16x32xf32, #tpu.memory_space<vmem>>) attributes {dimension_semantics = [#tpu.dimension_semantics<parallel>, #tpu.dimension_semantics<parallel>, #tpu.dimension_semantics<parallel>, #tpu.dimension_semantics<arbitrary>], iteration_bounds = array<i64: 2, 1, 1, 1>, scalar_prefetch = 0 : i64, scratch_operands = 3 : i64, tpu.core_type = #tpu.core_type<tc>, window_params = [{transform_indices = @transform_0, window_bounds = array<i64: 1, 16, 128>}, {transform_indices = @transform_1, window_bounds = array<i64: 1, 16, 128>}, {transform_indices = @transform_2, window_bounds = array<i64: 1, 16, 128>}, {transform_indices = @transform_3, window_bounds = array<i64: 1, 16, 128>}]} {
    %c0_i32 = arith.constant 0 : i32
    %0 = arith.cmpi eq, %arg3, %c0_i32 : i32
    %1 = arith.extui %0 : i1 to i32
    %c0_i32_0 = arith.constant 0 : i32
    %2 = arith.cmpi ne, %1, %c0_i32_0 : i32
    scf.if %2 {
      %cst_99 = arith.constant 0xFF800000 : f32
      %176 = vector.broadcast %cst_99 : f32 to vector<4x16x128xf32>
      %c0_100 = arith.constant 0 : index
      %c0_101 = arith.constant 0 : index
      %c0_102 = arith.constant 0 : index
      %177 = vector.load %arg8[%c0_100, %c0_101, %c0_102] : memref<4x16x128xf32, #tpu.memory_space<vmem>>, vector<4x16x128xf32>
      tpu.vector_store %arg8[%c0_100, %c0_101, %c0_102], %176 {strides = array<i32>} : memref<4x16x128xf32, #tpu.memory_space<vmem>>, vector<4x16x128xf32>,
      %cst_103 = arith.constant 0.000000e+00 : f32
      %178 = vector.broadcast %cst_103 : f32 to vector<4x16x128xf32>
      %c0_104 = arith.constant 0 : index
      %c0_105 = arith.constant 0 : index
      %c0_106 = arith.constant 0 : index
      %179 = vector.load %arg9[%c0_104, %c0_105, %c0_106] : memref<4x16x128xf32, #tpu.memory_space<vmem>>, vector<4x16x128xf32>
      tpu.vector_store %arg9[%c0_104, %c0_105, %c0_106], %178 {strides = array<i32>} : memref<4x16x128xf32, #tpu.memory_space<vmem>>, vector<4x16x128xf32>,
      %cst_107 = arith.constant 0.000000e+00 : f32
      %180 = vector.broadcast %cst_107 : f32 to vector<4x16x32xf32>
      %c0_108 = arith.constant 0 : index
      %c0_109 = arith.constant 0 : index
      %c0_110 = arith.constant 0 : index
      %181 = vector.load %arg10[%c0_108, %c0_109, %c0_110] : memref<4x16x32xf32, #tpu.memory_space<vmem>>, vector<4x16x32xf32>
      tpu.vector_store %arg10[%c0_108, %c0_109, %c0_110], %180 {strides = array<i32>} : memref<4x16x32xf32, #tpu.memory_space<vmem>>, vector<4x16x32xf32>,
    } else {
    }
    %c0 = arith.constant 0 : index
    %c0_1 = arith.constant 0 : index
    %c0_2 = arith.constant 0 : index
    %3 = vector.load %arg4[%c0, %c0_1, %c0_2] : memref<1x16x128xbf16, #tpu.memory_space<vmem>>, vector<1x16x128xbf16>
    %4 = vector.shape_cast %3 : vector<1x16x128xbf16> to vector<16x128xbf16>
    %c0_3 = arith.constant 0 : index
    %c0_4 = arith.constant 0 : index
    %c0_5 = arith.constant 0 : index
    %5 = vector.load %arg5[%c0_3, %c0_4, %c0_5] : memref<1x16x128xbf16, #tpu.memory_space<vmem>>, vector<1x16x128xbf16>
    %6 = vector.shape_cast %5 : vector<1x16x128xbf16> to vector<16x128xbf16>
    %c0_6 = arith.constant 0 : index
    %c0_7 = arith.constant 0 : index
    %c0_8 = arith.constant 0 : index
    %7 = vector.load %arg6[%c0_6, %c0_7, %c0_8] : memref<1x16x128xbf16, #tpu.memory_space<vmem>>, vector<1x16x128xbf16>
    %8 = vector.shape_cast %7 : vector<1x16x128xbf16> to vector<16x128xbf16>
    %9 = vector.extract_strided_slice %4 {offsets = [0, 0], sizes = [16, 32], strides = [1, 1]} : vector<16x128xbf16> to vector<16x32xbf16>
    %cst = arith.constant 1.767580e-01 : bf16
    %10 = vector.broadcast %cst : bf16 to vector<16x32xbf16>
    %11 = arith.mulf %9, %10 : vector<16x32xbf16>
    %12 = vector.extract_strided_slice %6 {offsets = [0, 0], sizes = [16, 32], strides = [1, 1]} : vector<16x128xbf16> to vector<16x32xbf16>
    %13 = vector.extract_strided_slice %8 {offsets = [0, 0], sizes = [16, 32], strides = [1, 1]} : vector<16x128xbf16> to vector<16x32xbf16>
    %cst_9 = arith.constant dense<0.000000e+00> : vector<16x16xf32>
    %14 = tpu.matmul %11, %12, %cst_9 {dimension_numbers = #tpu.dot_dimension_numbers<[1], [1], [0], [0], [0, 0, 1, 0], [], []>} : vector<16x32xbf16>, vector<16x32xbf16>, vector<16x16xf32> -> vector<16x16xf32>
    %c0_10 = arith.constant 0 : index
    %c0_11 = arith.constant 0 : index
    %c0_12 = arith.constant 0 : index
    %15 = vector.load %arg8[%c0_10, %c0_11, %c0_12] : memref<4x16x128xf32, #tpu.memory_space<vmem>>, vector<1x16x128xf32>
    %16 = vector.shape_cast %15 : vector<1x16x128xf32> to vector<16x128xf32>
    %c0_13 = arith.constant 0 : index
    %c0_14 = arith.constant 0 : index
    %c0_15 = arith.constant 0 : index
    %17 = vector.load %arg9[%c0_13, %c0_14, %c0_15] : memref<4x16x128xf32, #tpu.memory_space<vmem>>, vector<1x16x128xf32>
    %18 = vector.shape_cast %17 : vector<1x16x128xf32> to vector<16x128xf32>
    %cst_16 = arith.constant dense<0xFF800000> : vector<16xf32>
    %19 = vector.multi_reduction <maximumf>, %14, %cst_16 [1] : vector<16x16xf32> to vector<16xf32>
    %20 = vector.shape_cast %19 : vector<16xf32> to vector<16x1xf32>
    %21 = vector.broadcast %20 : vector<16x1xf32> to vector<16x128xf32>
    %22 = arith.maximumf %16, %21 : vector<16x128xf32>
    %23 = arith.subf %16, %22 : vector<16x128xf32>
    %24 = math.exp %23 : vector<16x128xf32>
    %25 = vector.extract_strided_slice %22 {offsets = [0, 0], sizes = [16, 1], strides = [1, 1]} : vector<16x128xf32> to vector<16x1xf32>
    %26 = vector.broadcast %25 : vector<16x1xf32> to vector<16x16xf32>
    %27 = arith.subf %14, %26 : vector<16x16xf32>
    %28 = math.exp %27 : vector<16x16xf32>
    %29 = arith.mulf %24, %18 : vector<16x128xf32>
    %cst_17 = arith.constant dense<0.000000e+00> : vector<16xf32>
    %30 = vector.multi_reduction <add>, %28, %cst_17 [1] : vector<16x16xf32> to vector<16xf32>
    %31 = vector.shape_cast %30 : vector<16xf32> to vector<16x1xf32>
    %32 = vector.broadcast %31 : vector<16x1xf32> to vector<16x128xf32>
    %33 = arith.addf %29, %32 : vector<16x128xf32>
    %c0_18 = arith.constant 0 : index
    %c0_19 = arith.constant 0 : index
    %c0_20 = arith.constant 0 : index
    %34 = vector.load %arg9[%c0_18, %c0_19, %c0_20] : memref<4x16x128xf32, #tpu.memory_space<vmem>>, vector<1x16x128xf32>
    %35 = vector.shape_cast %34 : vector<1x16x128xf32> to vector<16x128xf32>
    %36 = vector.shape_cast %33 : vector<16x128xf32> to vector<1x16x128xf32>
    tpu.vector_store %arg9[%c0_18, %c0_19, %c0_20], %36 {strides = array<i32>} : memref<4x16x128xf32, #tpu.memory_space<vmem>>, vector<1x16x128xf32>,
    %37 = arith.truncf %28 : vector<16x16xf32> to vector<16x16xbf16>
    %cst_21 = arith.constant dense<0.000000e+00> : vector<16x32xf32>
    %38 = tpu.matmul %37, %13, %cst_21 {dimension_numbers = #tpu.dot_dimension_numbers<[1], [0], [0], [1], [0, 0, 1, 1], [], []>} : vector<16x16xbf16>, vector<16x32xbf16>, vector<16x32xf32> -> vector<16x32xf32>
    %39 = vector.extract_strided_slice %24 {offsets = [0, 0], sizes = [16, 32], strides = [1, 1]} : vector<16x128xf32> to vector<16x32xf32>
    %c0_22 = arith.constant 0 : index
    %c0_23 = arith.constant 0 : index
    %c0_24 = arith.constant 0 : index
    %40 = vector.load %arg10[%c0_22, %c0_23, %c0_24] : memref<4x16x32xf32, #tpu.memory_space<vmem>>, vector<1x16x32xf32>
    %41 = vector.shape_cast %40 : vector<1x16x32xf32> to vector<16x32xf32>
    %42 = arith.mulf %39, %41 : vector<16x32xf32>
    %43 = arith.addf %42, %38 : vector<16x32xf32>
    %c0_25 = arith.constant 0 : index
    %c0_26 = arith.constant 0 : index
    %c0_27 = arith.constant 0 : index
    %44 = vector.load %arg10[%c0_25, %c0_26, %c0_27] : memref<4x16x32xf32, #tpu.memory_space<vmem>>, vector<1x16x32xf32>
    %45 = vector.shape_cast %44 : vector<1x16x32xf32> to vector<16x32xf32>
    %46 = vector.shape_cast %43 : vector<16x32xf32> to vector<1x16x32xf32>
    tpu.vector_store %arg10[%c0_25, %c0_26, %c0_27], %46 {strides = array<i32>} : memref<4x16x32xf32, #tpu.memory_space<vmem>>, vector<1x16x32xf32>,
    %c0_28 = arith.constant 0 : index
    %c0_29 = arith.constant 0 : index
    %c0_30 = arith.constant 0 : index
    %47 = vector.load %arg8[%c0_28, %c0_29, %c0_30] : memref<4x16x128xf32, #tpu.memory_space<vmem>>, vector<1x16x128xf32>
    %48 = vector.shape_cast %47 : vector<1x16x128xf32> to vector<16x128xf32>
    %49 = vector.shape_cast %22 : vector<16x128xf32> to vector<1x16x128xf32>
    tpu.vector_store %arg8[%c0_28, %c0_29, %c0_30], %49 {strides = array<i32>} : memref<4x16x128xf32, #tpu.memory_space<vmem>>, vector<1x16x128xf32>,
    %50 = vector.extract_strided_slice %4 {offsets = [0, 32], sizes = [16, 32], strides = [1, 1]} : vector<16x128xbf16> to vector<16x32xbf16>
    %cst_31 = arith.constant 1.767580e-01 : bf16
    %51 = vector.broadcast %cst_31 : bf16 to vector<16x32xbf16>
    %52 = arith.mulf %50, %51 : vector<16x32xbf16>
    %53 = vector.extract_strided_slice %6 {offsets = [0, 32], sizes = [16, 32], strides = [1, 1]} : vector<16x128xbf16> to vector<16x32xbf16>
    %54 = vector.extract_strided_slice %8 {offsets = [0, 32], sizes = [16, 32], strides = [1, 1]} : vector<16x128xbf16> to vector<16x32xbf16>
    %cst_32 = arith.constant dense<0.000000e+00> : vector<16x16xf32>
    %55 = tpu.matmul %52, %53, %cst_32 {dimension_numbers = #tpu.dot_dimension_numbers<[1], [1], [0], [0], [0, 0, 1, 0], [], []>} : vector<16x32xbf16>, vector<16x32xbf16>, vector<16x16xf32> -> vector<16x16xf32>
    %c1 = arith.constant 1 : index
    %c0_33 = arith.constant 0 : index
    %c0_34 = arith.constant 0 : index
    %56 = vector.load %arg8[%c1, %c0_33, %c0_34] : memref<4x16x128xf32, #tpu.memory_space<vmem>>, vector<1x16x128xf32>
    %57 = vector.shape_cast %56 : vector<1x16x128xf32> to vector<16x128xf32>
    %c1_35 = arith.constant 1 : index
    %c0_36 = arith.constant 0 : index
    %c0_37 = arith.constant 0 : index
    %58 = vector.load %arg9[%c1_35, %c0_36, %c0_37] : memref<4x16x128xf32, #tpu.memory_space<vmem>>, vector<1x16x128xf32>
    %59 = vector.shape_cast %58 : vector<1x16x128xf32> to vector<16x128xf32>
    %cst_38 = arith.constant dense<0xFF800000> : vector<16xf32>
    %60 = vector.multi_reduction <maximumf>, %55, %cst_38 [1] : vector<16x16xf32> to vector<16xf32>
    %61 = vector.shape_cast %60 : vector<16xf32> to vector<16x1xf32>
    %62 = vector.broadcast %61 : vector<16x1xf32> to vector<16x128xf32>
    %63 = arith.maximumf %57, %62 : vector<16x128xf32>
    %64 = arith.subf %57, %63 : vector<16x128xf32>
    %65 = math.exp %64 : vector<16x128xf32>
    %66 = vector.extract_strided_slice %63 {offsets = [0, 0], sizes = [16, 1], strides = [1, 1]} : vector<16x128xf32> to vector<16x1xf32>
    %67 = vector.broadcast %66 : vector<16x1xf32> to vector<16x16xf32>
    %68 = arith.subf %55, %67 : vector<16x16xf32>
    %69 = math.exp %68 : vector<16x16xf32>
    %70 = arith.mulf %65, %59 : vector<16x128xf32>
    %cst_39 = arith.constant dense<0.000000e+00> : vector<16xf32>
    %71 = vector.multi_reduction <add>, %69, %cst_39 [1] : vector<16x16xf32> to vector<16xf32>
    %72 = vector.shape_cast %71 : vector<16xf32> to vector<16x1xf32>
    %73 = vector.broadcast %72 : vector<16x1xf32> to vector<16x128xf32>
    %74 = arith.addf %70, %73 : vector<16x128xf32>
    %c1_40 = arith.constant 1 : index
    %c0_41 = arith.constant 0 : index
    %c0_42 = arith.constant 0 : index
    %75 = vector.load %arg9[%c1_40, %c0_41, %c0_42] : memref<4x16x128xf32, #tpu.memory_space<vmem>>, vector<1x16x128xf32>
    %76 = vector.shape_cast %75 : vector<1x16x128xf32> to vector<16x128xf32>
    %77 = vector.shape_cast %74 : vector<16x128xf32> to vector<1x16x128xf32>
    tpu.vector_store %arg9[%c1_40, %c0_41, %c0_42], %77 {strides = array<i32>} : memref<4x16x128xf32, #tpu.memory_space<vmem>>, vector<1x16x128xf32>,
    %78 = arith.truncf %69 : vector<16x16xf32> to vector<16x16xbf16>
    %cst_43 = arith.constant dense<0.000000e+00> : vector<16x32xf32>
    %79 = tpu.matmul %78, %54, %cst_43 {dimension_numbers = #tpu.dot_dimension_numbers<[1], [0], [0], [1], [0, 0, 1, 1], [], []>} : vector<16x16xbf16>, vector<16x32xbf16>, vector<16x32xf32> -> vector<16x32xf32>
    %80 = vector.extract_strided_slice %65 {offsets = [0, 0], sizes = [16, 32], strides = [1, 1]} : vector<16x128xf32> to vector<16x32xf32>
    %c1_44 = arith.constant 1 : index
    %c0_45 = arith.constant 0 : index
    %c0_46 = arith.constant 0 : index
    %81 = vector.load %arg10[%c1_44, %c0_45, %c0_46] : memref<4x16x32xf32, #tpu.memory_space<vmem>>, vector<1x16x32xf32>
    %82 = vector.shape_cast %81 : vector<1x16x32xf32> to vector<16x32xf32>
    %83 = arith.mulf %80, %82 : vector<16x32xf32>
    %84 = arith.addf %83, %79 : vector<16x32xf32>
    %c1_47 = arith.constant 1 : index
    %c0_48 = arith.constant 0 : index
    %c0_49 = arith.constant 0 : index
    %85 = vector.load %arg10[%c1_47, %c0_48, %c0_49] : memref<4x16x32xf32, #tpu.memory_space<vmem>>, vector<1x16x32xf32>
    %86 = vector.shape_cast %85 : vector<1x16x32xf32> to vector<16x32xf32>
    %87 = vector.shape_cast %84 : vector<16x32xf32> to vector<1x16x32xf32>
    tpu.vector_store %arg10[%c1_47, %c0_48, %c0_49], %87 {strides = array<i32>} : memref<4x16x32xf32, #tpu.memory_space<vmem>>, vector<1x16x32xf32>,
    %c1_50 = arith.constant 1 : index
    %c0_51 = arith.constant 0 : index
    %c0_52 = arith.constant 0 : index
    %88 = vector.load %arg8[%c1_50, %c0_51, %c0_52] : memref<4x16x128xf32, #tpu.memory_space<vmem>>, vector<1x16x128xf32>
    %89 = vector.shape_cast %88 : vector<1x16x128xf32> to vector<16x128xf32>
    %90 = vector.shape_cast %63 : vector<16x128xf32> to vector<1x16x128xf32>
    tpu.vector_store %arg8[%c1_50, %c0_51, %c0_52], %90 {strides = array<i32>} : memref<4x16x128xf32, #tpu.memory_space<vmem>>, vector<1x16x128xf32>,
    %91 = vector.extract_strided_slice %4 {offsets = [0, 64], sizes = [16, 32], strides = [1, 1]} : vector<16x128xbf16> to vector<16x32xbf16>
    %cst_53 = arith.constant 1.767580e-01 : bf16
    %92 = vector.broadcast %cst_53 : bf16 to vector<16x32xbf16>
    %93 = arith.mulf %91, %92 : vector<16x32xbf16>
    %94 = vector.extract_strided_slice %6 {offsets = [0, 64], sizes = [16, 32], strides = [1, 1]} : vector<16x128xbf16> to vector<16x32xbf16>
    %95 = vector.extract_strided_slice %8 {offsets = [0, 64], sizes = [16, 32], strides = [1, 1]} : vector<16x128xbf16> to vector<16x32xbf16>
    %cst_54 = arith.constant dense<0.000000e+00> : vector<16x16xf32>
    %96 = tpu.matmul %93, %94, %cst_54 {dimension_numbers = #tpu.dot_dimension_numbers<[1], [1], [0], [0], [0, 0, 1, 0], [], []>} : vector<16x32xbf16>, vector<16x32xbf16>, vector<16x16xf32> -> vector<16x16xf32>
    %c2 = arith.constant 2 : index
    %c0_55 = arith.constant 0 : index
    %c0_56 = arith.constant 0 : index
    %97 = vector.load %arg8[%c2, %c0_55, %c0_56] : memref<4x16x128xf32, #tpu.memory_space<vmem>>, vector<1x16x128xf32>
    %98 = vector.shape_cast %97 : vector<1x16x128xf32> to vector<16x128xf32>
    %c2_57 = arith.constant 2 : index
    %c0_58 = arith.constant 0 : index
    %c0_59 = arith.constant 0 : index
    %99 = vector.load %arg9[%c2_57, %c0_58, %c0_59] : memref<4x16x128xf32, #tpu.memory_space<vmem>>, vector<1x16x128xf32>
    %100 = vector.shape_cast %99 : vector<1x16x128xf32> to vector<16x128xf32>
    %cst_60 = arith.constant dense<0xFF800000> : vector<16xf32>
    %101 = vector.multi_reduction <maximumf>, %96, %cst_60 [1] : vector<16x16xf32> to vector<16xf32>
    %102 = vector.shape_cast %101 : vector<16xf32> to vector<16x1xf32>
    %103 = vector.broadcast %102 : vector<16x1xf32> to vector<16x128xf32>
    %104 = arith.maximumf %98, %103 : vector<16x128xf32>
    %105 = arith.subf %98, %104 : vector<16x128xf32>
    %106 = math.exp %105 : vector<16x128xf32>
    %107 = vector.extract_strided_slice %104 {offsets = [0, 0], sizes = [16, 1], strides = [1, 1]} : vector<16x128xf32> to vector<16x1xf32>
    %108 = vector.broadcast %107 : vector<16x1xf32> to vector<16x16xf32>
    %109 = arith.subf %96, %108 : vector<16x16xf32>
    %110 = math.exp %109 : vector<16x16xf32>
    %111 = arith.mulf %106, %100 : vector<16x128xf32>
    %cst_61 = arith.constant dense<0.000000e+00> : vector<16xf32>
    %112 = vector.multi_reduction <add>, %110, %cst_61 [1] : vector<16x16xf32> to vector<16xf32>
    %113 = vector.shape_cast %112 : vector<16xf32> to vector<16x1xf32>
    %114 = vector.broadcast %113 : vector<16x1xf32> to vector<16x128xf32>
    %115 = arith.addf %111, %114 : vector<16x128xf32>
    %c2_62 = arith.constant 2 : index
    %c0_63 = arith.constant 0 : index
    %c0_64 = arith.constant 0 : index
    %116 = vector.load %arg9[%c2_62, %c0_63, %c0_64] : memref<4x16x128xf32, #tpu.memory_space<vmem>>, vector<1x16x128xf32>
    %117 = vector.shape_cast %116 : vector<1x16x128xf32> to vector<16x128xf32>
    %118 = vector.shape_cast %115 : vector<16x128xf32> to vector<1x16x128xf32>
    tpu.vector_store %arg9[%c2_62, %c0_63, %c0_64], %118 {strides = array<i32>} : memref<4x16x128xf32, #tpu.memory_space<vmem>>, vector<1x16x128xf32>,
    %119 = arith.truncf %110 : vector<16x16xf32> to vector<16x16xbf16>
    %cst_65 = arith.constant dense<0.000000e+00> : vector<16x32xf32>
    %120 = tpu.matmul %119, %95, %cst_65 {dimension_numbers = #tpu.dot_dimension_numbers<[1], [0], [0], [1], [0, 0, 1, 1], [], []>} : vector<16x16xbf16>, vector<16x32xbf16>, vector<16x32xf32> -> vector<16x32xf32>
    %121 = vector.extract_strided_slice %106 {offsets = [0, 0], sizes = [16, 32], strides = [1, 1]} : vector<16x128xf32> to vector<16x32xf32>
    %c2_66 = arith.constant 2 : index
    %c0_67 = arith.constant 0 : index
    %c0_68 = arith.constant 0 : index
    %122 = vector.load %arg10[%c2_66, %c0_67, %c0_68] : memref<4x16x32xf32, #tpu.memory_space<vmem>>, vector<1x16x32xf32>
    %123 = vector.shape_cast %122 : vector<1x16x32xf32> to vector<16x32xf32>
    %124 = arith.mulf %121, %123 : vector<16x32xf32>
    %125 = arith.addf %124, %120 : vector<16x32xf32>
    %c2_69 = arith.constant 2 : index
    %c0_70 = arith.constant 0 : index
    %c0_71 = arith.constant 0 : index
    %126 = vector.load %arg10[%c2_69, %c0_70, %c0_71] : memref<4x16x32xf32, #tpu.memory_space<vmem>>, vector<1x16x32xf32>
    %127 = vector.shape_cast %126 : vector<1x16x32xf32> to vector<16x32xf32>
    %128 = vector.shape_cast %125 : vector<16x32xf32> to vector<1x16x32xf32>
    tpu.vector_store %arg10[%c2_69, %c0_70, %c0_71], %128 {strides = array<i32>} : memref<4x16x32xf32, #tpu.memory_space<vmem>>, vector<1x16x32xf32>,
    %c2_72 = arith.constant 2 : index
    %c0_73 = arith.constant 0 : index
    %c0_74 = arith.constant 0 : index
    %129 = vector.load %arg8[%c2_72, %c0_73, %c0_74] : memref<4x16x128xf32, #tpu.memory_space<vmem>>, vector<1x16x128xf32>
    %130 = vector.shape_cast %129 : vector<1x16x128xf32> to vector<16x128xf32>
    %131 = vector.shape_cast %104 : vector<16x128xf32> to vector<1x16x128xf32>
    tpu.vector_store %arg8[%c2_72, %c0_73, %c0_74], %131 {strides = array<i32>} : memref<4x16x128xf32, #tpu.memory_space<vmem>>, vector<1x16x128xf32>,
    %132 = vector.extract_strided_slice %4 {offsets = [0, 96], sizes = [16, 32], strides = [1, 1]} : vector<16x128xbf16> to vector<16x32xbf16>
    %cst_75 = arith.constant 1.767580e-01 : bf16
    %133 = vector.broadcast %cst_75 : bf16 to vector<16x32xbf16>
    %134 = arith.mulf %132, %133 : vector<16x32xbf16>
    %135 = vector.extract_strided_slice %6 {offsets = [0, 96], sizes = [16, 32], strides = [1, 1]} : vector<16x128xbf16> to vector<16x32xbf16>
    %136 = vector.extract_strided_slice %8 {offsets = [0, 96], sizes = [16, 32], strides = [1, 1]} : vector<16x128xbf16> to vector<16x32xbf16>
    %cst_76 = arith.constant dense<0.000000e+00> : vector<16x16xf32>
    %137 = tpu.matmul %134, %135, %cst_76 {dimension_numbers = #tpu.dot_dimension_numbers<[1], [1], [0], [0], [0, 0, 1, 0], [], []>} : vector<16x32xbf16>, vector<16x32xbf16>, vector<16x16xf32> -> vector<16x16xf32>
    %c3 = arith.constant 3 : index
    %c0_77 = arith.constant 0 : index
    %c0_78 = arith.constant 0 : index
    %138 = vector.load %arg8[%c3, %c0_77, %c0_78] : memref<4x16x128xf32, #tpu.memory_space<vmem>>, vector<1x16x128xf32>
    %139 = vector.shape_cast %138 : vector<1x16x128xf32> to vector<16x128xf32>
    %c3_79 = arith.constant 3 : index
    %c0_80 = arith.constant 0 : index
    %c0_81 = arith.constant 0 : index
    %140 = vector.load %arg9[%c3_79, %c0_80, %c0_81] : memref<4x16x128xf32, #tpu.memory_space<vmem>>, vector<1x16x128xf32>
    %141 = vector.shape_cast %140 : vector<1x16x128xf32> to vector<16x128xf32>
    %cst_82 = arith.constant dense<0xFF800000> : vector<16xf32>
    %142 = vector.multi_reduction <maximumf>, %137, %cst_82 [1] : vector<16x16xf32> to vector<16xf32>
    %143 = vector.shape_cast %142 : vector<16xf32> to vector<16x1xf32>
    %144 = vector.broadcast %143 : vector<16x1xf32> to vector<16x128xf32>
    %145 = arith.maximumf %139, %144 : vector<16x128xf32>
    %146 = arith.subf %139, %145 : vector<16x128xf32>
    %147 = math.exp %146 : vector<16x128xf32>
    %148 = vector.extract_strided_slice %145 {offsets = [0, 0], sizes = [16, 1], strides = [1, 1]} : vector<16x128xf32> to vector<16x1xf32>
    %149 = vector.broadcast %148 : vector<16x1xf32> to vector<16x16xf32>
    %150 = arith.subf %137, %149 : vector<16x16xf32>
    %151 = math.exp %150 : vector<16x16xf32>
    %152 = arith.mulf %147, %141 : vector<16x128xf32>
    %cst_83 = arith.constant dense<0.000000e+00> : vector<16xf32>
    %153 = vector.multi_reduction <add>, %151, %cst_83 [1] : vector<16x16xf32> to vector<16xf32>
    %154 = vector.shape_cast %153 : vector<16xf32> to vector<16x1xf32>
    %155 = vector.broadcast %154 : vector<16x1xf32> to vector<16x128xf32>
    %156 = arith.addf %152, %155 : vector<16x128xf32>
    %c3_84 = arith.constant 3 : index
    %c0_85 = arith.constant 0 : index
    %c0_86 = arith.constant 0 : index
    %157 = vector.load %arg9[%c3_84, %c0_85, %c0_86] : memref<4x16x128xf32, #tpu.memory_space<vmem>>, vector<1x16x128xf32>
    %158 = vector.shape_cast %157 : vector<1x16x128xf32> to vector<16x128xf32>
    %159 = vector.shape_cast %156 : vector<16x128xf32> to vector<1x16x128xf32>
    tpu.vector_store %arg9[%c3_84, %c0_85, %c0_86], %159 {strides = array<i32>} : memref<4x16x128xf32, #tpu.memory_space<vmem>>, vector<1x16x128xf32>,
    %160 = arith.truncf %151 : vector<16x16xf32> to vector<16x16xbf16>
    %cst_87 = arith.constant dense<0.000000e+00> : vector<16x32xf32>
    %161 = tpu.matmul %160, %136, %cst_87 {dimension_numbers = #tpu.dot_dimension_numbers<[1], [0], [0], [1], [0, 0, 1, 1], [], []>} : vector<16x16xbf16>, vector<16x32xbf16>, vector<16x32xf32> -> vector<16x32xf32>
    %162 = vector.extract_strided_slice %147 {offsets = [0, 0], sizes = [16, 32], strides = [1, 1]} : vector<16x128xf32> to vector<16x32xf32>
    %c3_88 = arith.constant 3 : index
    %c0_89 = arith.constant 0 : index
    %c0_90 = arith.constant 0 : index
    %163 = vector.load %arg10[%c3_88, %c0_89, %c0_90] : memref<4x16x32xf32, #tpu.memory_space<vmem>>, vector<1x16x32xf32>
    %164 = vector.shape_cast %163 : vector<1x16x32xf32> to vector<16x32xf32>
    %165 = arith.mulf %162, %164 : vector<16x32xf32>
    %166 = arith.addf %165, %161 : vector<16x32xf32>
    %c3_91 = arith.constant 3 : index
    %c0_92 = arith.constant 0 : index
    %c0_93 = arith.constant 0 : index
    %167 = vector.load %arg10[%c3_91, %c0_92, %c0_93] : memref<4x16x32xf32, #tpu.memory_space<vmem>>, vector<1x16x32xf32>
    %168 = vector.shape_cast %167 : vector<1x16x32xf32> to vector<16x32xf32>
    %169 = vector.shape_cast %166 : vector<16x32xf32> to vector<1x16x32xf32>
    tpu.vector_store %arg10[%c3_91, %c0_92, %c0_93], %169 {strides = array<i32>} : memref<4x16x32xf32, #tpu.memory_space<vmem>>, vector<1x16x32xf32>,
    %c3_94 = arith.constant 3 : index
    %c0_95 = arith.constant 0 : index
    %c0_96 = arith.constant 0 : index
    %170 = vector.load %arg8[%c3_94, %c0_95, %c0_96] : memref<4x16x128xf32, #tpu.memory_space<vmem>>, vector<1x16x128xf32>
    %171 = vector.shape_cast %170 : vector<1x16x128xf32> to vector<16x128xf32>
    %172 = vector.shape_cast %145 : vector<16x128xf32> to vector<1x16x128xf32>
    tpu.vector_store %arg8[%c3_94, %c0_95, %c0_96], %172 {strides = array<i32>} : memref<4x16x128xf32, #tpu.memory_space<vmem>>, vector<1x16x128xf32>,
    %c0_i32_97 = arith.constant 0 : i32
    %173 = arith.cmpi eq, %arg3, %c0_i32_97 : i32
    %174 = arith.extui %173 : i1 to i32
    %c0_i32_98 = arith.constant 0 : i32
    %175 = arith.cmpi ne, %174, %c0_i32_98 : i32
    scf.if %175 {
      %c0_99 = arith.constant 0 : index
      %c0_100 = arith.constant 0 : index
      %c0_101 = arith.constant 0 : index
      %176 = vector.load %arg10[%c0_99, %c0_100, %c0_101] : memref<4x16x32xf32, #tpu.memory_space<vmem>>, vector<1x16x32xf32>
      %177 = vector.shape_cast %176 : vector<1x16x32xf32> to vector<16x32xf32>
      %c0_102 = arith.constant 0 : index
      %c0_103 = arith.constant 0 : index
      %c0_104 = arith.constant 0 : index
      %178 = vector.load %arg9[%c0_102, %c0_103, %c0_104] : memref<4x16x128xf32, #tpu.memory_space<vmem>>, vector<1x16x128xf32>
      %179 = vector.shape_cast %178 : vector<1x16x128xf32> to vector<16x128xf32>
      %180 = vector.extract_strided_slice %179 {offsets = [0, 0], sizes = [16, 32], strides = [1, 1]} : vector<16x128xf32> to vector<16x32xf32>
      %181 = arith.divf %177, %180 : vector<16x32xf32>
      %c1_105 = arith.constant 1 : index
      %c0_106 = arith.constant 0 : index
      %c0_107 = arith.constant 0 : index
      %182 = vector.load %arg10[%c1_105, %c0_106, %c0_107] : memref<4x16x32xf32, #tpu.memory_space<vmem>>, vector<1x16x32xf32>
      %183 = vector.shape_cast %182 : vector<1x16x32xf32> to vector<16x32xf32>
      %c1_108 = arith.constant 1 : index
      %c0_109 = arith.constant 0 : index
      %c0_110 = arith.constant 0 : index
      %184 = vector.load %arg9[%c1_108, %c0_109, %c0_110] : memref<4x16x128xf32, #tpu.memory_space<vmem>>, vector<1x16x128xf32>
      %185 = vector.shape_cast %184 : vector<1x16x128xf32> to vector<16x128xf32>
      %186 = vector.extract_strided_slice %185 {offsets = [0, 0], sizes = [16, 32], strides = [1, 1]} : vector<16x128xf32> to vector<16x32xf32>
      %187 = arith.divf %183, %186 : vector<16x32xf32>
      %c2_111 = arith.constant 2 : index
      %c0_112 = arith.constant 0 : index
      %c0_113 = arith.constant 0 : index
      %188 = vector.load %arg10[%c2_111, %c0_112, %c0_113] : memref<4x16x32xf32, #tpu.memory_space<vmem>>, vector<1x16x32xf32>
      %189 = vector.shape_cast %188 : vector<1x16x32xf32> to vector<16x32xf32>
      %c2_114 = arith.constant 2 : index
      %c0_115 = arith.constant 0 : index
      %c0_116 = arith.constant 0 : index
      %190 = vector.load %arg9[%c2_114, %c0_115, %c0_116] : memref<4x16x128xf32, #tpu.memory_space<vmem>>, vector<1x16x128xf32>
      %191 = vector.shape_cast %190 : vector<1x16x128xf32> to vector<16x128xf32>
      %192 = vector.extract_strided_slice %191 {offsets = [0, 0], sizes = [16, 32], strides = [1, 1]} : vector<16x128xf32> to vector<16x32xf32>
      %193 = arith.divf %189, %192 : vector<16x32xf32>
      %c3_117 = arith.constant 3 : index
      %c0_118 = arith.constant 0 : index
      %c0_119 = arith.constant 0 : index
      %194 = vector.load %arg10[%c3_117, %c0_118, %c0_119] : memref<4x16x32xf32, #tpu.memory_space<vmem>>, vector<1x16x32xf32>
      %195 = vector.shape_cast %194 : vector<1x16x32xf32> to vector<16x32xf32>
      %c3_120 = arith.constant 3 : index
      %c0_121 = arith.constant 0 : index
      %c0_122 = arith.constant 0 : index
      %196 = vector.load %arg9[%c3_120, %c0_121, %c0_122] : memref<4x16x128xf32, #tpu.memory_space<vmem>>, vector<1x16x128xf32>
      %197 = vector.shape_cast %196 : vector<1x16x128xf32> to vector<16x128xf32>
      %198 = vector.extract_strided_slice %197 {offsets = [0, 0], sizes = [16, 32], strides = [1, 1]} : vector<16x128xf32> to vector<16x32xf32>
      %199 = arith.divf %195, %198 : vector<16x32xf32>
      %200 = tpu.concatenate %181, %187, %193, %199 in 1 : vector<16x32xf32>, vector<16x32xf32>, vector<16x32xf32>, vector<16x32xf32> -> vector<16x128xf32>
      %201 = arith.truncf %200 : vector<16x128xf32> to vector<16x128xbf16>
      %c0_123 = arith.constant 0 : index
      %c0_124 = arith.constant 0 : index
      %c0_125 = arith.constant 0 : index
      %202 = vector.load %arg7[%c0_123, %c0_124, %c0_125] : memref<1x16x128xbf16, #tpu.memory_space<vmem>>, vector<1x16x128xbf16>
      %203 = vector.shape_cast %202 : vector<1x16x128xbf16> to vector<16x128xbf16>
      %204 = vector.shape_cast %201 : vector<16x128xbf16> to vector<1x16x128xbf16>
      tpu.vector_store %arg7[%c0_123, %c0_124, %c0_125], %204 {strides = array<i32>} : memref<1x16x128xbf16, #tpu.memory_space<vmem>>, vector<1x16x128xbf16>,
    } else {
    }
    return
  }
  func.func @transform_0(%arg0: i32, %arg1: i32, %arg2: i32, %arg3: i32) -> (i32, i32, i32) {
    %c0_i32 = arith.constant 0 : i32
    return %arg0, %arg2, %arg1 : i32, i32, i32
  }
  func.func @transform_1(%arg0: i32, %arg1: i32, %arg2: i32, %arg3: i32) -> (i32, i32, i32) {
    %c1_i32 = arith.constant 1 : i32
    %0 = arith.addi %c1_i32, %arg1 : i32
    %c0_i32 = arith.constant 0 : i32
    return %arg0, %arg3, %0 : i32, i32, i32
  }
  func.func @transform_2(%arg0: i32, %arg1: i32, %arg2: i32, %arg3: i32) -> (i32, i32, i32) {
    %c2_i32 = arith.constant 2 : i32
    %0 = arith.addi %c2_i32, %arg1 : i32
    %c0_i32 = arith.constant 0 : i32
    return %arg0, %arg3, %0 : i32, i32, i32
  }
  func.func @transform_3(%arg0: i32, %arg1: i32, %arg2: i32, %arg3: i32) -> (i32, i32, i32) {
    %c0_i32 = arith.constant 0 : i32
    return %arg0, %arg2, %arg1 : i32, i32, i32
  }
}

module attributes {stable_mosaic.version = 11 : i64} {
  func.func @_fused_matmul_kernel(%arg0: i32, %arg1: memref<16x128xbf16, #tpu.memory_space<vmem>>, %arg2: memref<128x128xbf16, #tpu.memory_space<vmem>>, %arg3: memref<1x128xf32, #tpu.memory_space<vmem>>, %arg4: memref<16x128xbf16, #tpu.memory_space<vmem>>, %arg5: memref<16x128xbf16, #tpu.memory_space<vmem>>) attributes {dimension_semantics = [#tpu.dimension_semantics<parallel>], iteration_bounds = array<i64: 2>, scalar_prefetch = 0 : i64, scratch_operands = 0 : i64, tpu.core_type = #tpu.core_type<tc>, window_params = [{transform_indices = @transform_0, window_bounds = array<i64: 16, 128>}, {pipeline_mode = #tpu.pipeline_mode<synchronous>, transform_indices = @transform_1, window_bounds = array<i64: 128, 128>}, {pipeline_mode = #tpu.pipeline_mode<synchronous>, transform_indices = @transform_2, window_bounds = array<i64: 1, 128>}, {transform_indices = @transform_3, window_bounds = array<i64: 16, 128>}, {transform_indices = @transform_4, window_bounds = array<i64: 16, 128>}]} {
    %c0 = arith.constant 0 : index
    %c0_0 = arith.constant 0 : index
    %0 = vector.load %arg1[%c0, %c0_0] : memref<16x128xbf16, #tpu.memory_space<vmem>>, vector<16x128xbf16>
    %c0_1 = arith.constant 0 : index
    %c0_2 = arith.constant 0 : index
    %1 = vector.load %arg2[%c0_1, %c0_2] : memref<128x128xbf16, #tpu.memory_space<vmem>>, vector<128x128xbf16>
    %cst = arith.constant dense<0.000000e+00> : vector<16x128xf32>
    %2 = tpu.matmul %0, %1, %cst {dimension_numbers = #tpu.dot_dimension_numbers<[1], [0], [0], [1], [0, 0, 1, 1], [], []>} : vector<16x128xbf16>, vector<128x128xbf16>, vector<16x128xf32> -> vector<16x128xf32>
    %c0_3 = arith.constant 0 : index
    %c0_4 = arith.constant 0 : index
    %3 = vector.load %arg3[%c0_3, %c0_4] : memref<1x128xf32, #tpu.memory_space<vmem>>, vector<1x128xf32>
    %4 = vector.broadcast %3 : vector<1x128xf32> to vector<16x128xf32>
    %5 = arith.addf %2, %4 : vector<16x128xf32>
    %c0_5 = arith.constant 0 : index
    %c0_6 = arith.constant 0 : index
    %6 = vector.load %arg4[%c0_5, %c0_6] : memref<16x128xbf16, #tpu.memory_space<vmem>>, vector<16x128xbf16>
    %7 = arith.extf %6 : vector<16x128xbf16> to vector<16x128xf32>
    %8 = arith.addf %5, %7 : vector<16x128xf32>
    %9 = arith.truncf %8 : vector<16x128xf32> to vector<16x128xbf16>
    %c0_7 = arith.constant 0 : index
    %c0_8 = arith.constant 0 : index
    %10 = vector.load %arg5[%c0_7, %c0_8] : memref<16x128xbf16, #tpu.memory_space<vmem>>, vector<16x128xbf16>
    tpu.vector_store %arg5[%c0_7, %c0_8], %9 {strides = array<i32>} : memref<16x128xbf16, #tpu.memory_space<vmem>>, vector<16x128xbf16>,
    return
  }
  func.func @transform_0(%arg0: i32) -> (i32, i32) {
    %c0_i32 = arith.constant 0 : i32
    %c0_i32_0 = arith.constant 0 : i32
    return %arg0, %c0_i32 : i32, i32
  }
  func.func @transform_1(%arg0: i32) -> (i32, i32) {
    %c0_i32 = arith.constant 0 : i32
    %c0_i32_0 = arith.constant 0 : i32
    %c0_i32_1 = arith.constant 0 : i32
    return %c0_i32, %c0_i32_0 : i32, i32
  }
  func.func @transform_2(%arg0: i32) -> (i32, i32) {
    %c0_i32 = arith.constant 0 : i32
    %c0_i32_0 = arith.constant 0 : i32
    %c0_i32_1 = arith.constant 0 : i32
    return %c0_i32, %c0_i32_0 : i32, i32
  }
  func.func @transform_3(%arg0: i32) -> (i32, i32) {
    %c0_i32 = arith.constant 0 : i32
    %c0_i32_0 = arith.constant 0 : i32
    return %arg0, %c0_i32 : i32, i32
  }
  func.func @transform_4(%arg0: i32) -> (i32, i32) {
    %c0_i32 = arith.constant 0 : i32
    %c0_i32_0 = arith.constant 0 : i32
    return %arg0, %c0_i32 : i32, i32
  }
}

module attributes {stable_mosaic.version = 11 : i64} {
  func.func @_fused_matmul_kernel(%arg0: i32, %arg1: memref<16x384xbf16, #tpu.memory_space<vmem>>, %arg2: memref<384x128xbf16, #tpu.memory_space<vmem>>, %arg3: memref<1x128xf32, #tpu.memory_space<vmem>>, %arg4: memref<16x128xbf16, #tpu.memory_space<vmem>>, %arg5: memref<16x128xbf16, #tpu.memory_space<vmem>>) attributes {dimension_semantics = [#tpu.dimension_semantics<parallel>], iteration_bounds = array<i64: 2>, scalar_prefetch = 0 : i64, scratch_operands = 0 : i64, tpu.core_type = #tpu.core_type<tc>, window_params = [{transform_indices = @transform_0, window_bounds = array<i64: 16, 384>}, {pipeline_mode = #tpu.pipeline_mode<synchronous>, transform_indices = @transform_1, window_bounds = array<i64: 384, 128>}, {pipeline_mode = #tpu.pipeline_mode<synchronous>, transform_indices = @transform_2, window_bounds = array<i64: 1, 128>}, {transform_indices = @transform_3, window_bounds = array<i64: 16, 128>}, {transform_indices = @transform_4, window_bounds = array<i64: 16, 128>}]} {
    %c0 = arith.constant 0 : index
    %c0_0 = arith.constant 0 : index
    %0 = vector.load %arg1[%c0, %c0_0] : memref<16x384xbf16, #tpu.memory_space<vmem>>, vector<16x384xbf16>
    %c0_1 = arith.constant 0 : index
    %c0_2 = arith.constant 0 : index
    %1 = vector.load %arg2[%c0_1, %c0_2] : memref<384x128xbf16, #tpu.memory_space<vmem>>, vector<384x128xbf16>
    %cst = arith.constant dense<0.000000e+00> : vector<16x128xf32>
    %2 = tpu.matmul %0, %1, %cst {dimension_numbers = #tpu.dot_dimension_numbers<[1], [0], [0], [1], [0, 0, 1, 1], [], []>} : vector<16x384xbf16>, vector<384x128xbf16>, vector<16x128xf32> -> vector<16x128xf32>
    %c0_3 = arith.constant 0 : index
    %c0_4 = arith.constant 0 : index
    %3 = vector.load %arg3[%c0_3, %c0_4] : memref<1x128xf32, #tpu.memory_space<vmem>>, vector<1x128xf32>
    %4 = vector.broadcast %3 : vector<1x128xf32> to vector<16x128xf32>
    %5 = arith.addf %2, %4 : vector<16x128xf32>
    %c0_5 = arith.constant 0 : index
    %c0_6 = arith.constant 0 : index
    %6 = vector.load %arg4[%c0_5, %c0_6] : memref<16x128xbf16, #tpu.memory_space<vmem>>, vector<16x128xbf16>
    %7 = arith.extf %6 : vector<16x128xbf16> to vector<16x128xf32>
    %8 = arith.addf %5, %7 : vector<16x128xf32>
    %9 = arith.truncf %8 : vector<16x128xf32> to vector<16x128xbf16>
    %c0_7 = arith.constant 0 : index
    %c0_8 = arith.constant 0 : index
    %10 = vector.load %arg5[%c0_7, %c0_8] : memref<16x128xbf16, #tpu.memory_space<vmem>>, vector<16x128xbf16>
    tpu.vector_store %arg5[%c0_7, %c0_8], %9 {strides = array<i32>} : memref<16x128xbf16, #tpu.memory_space<vmem>>, vector<16x128xbf16>,
    return
  }
  func.func @transform_0(%arg0: i32) -> (i32, i32) {
    %c0_i32 = arith.constant 0 : i32
    %c0_i32_0 = arith.constant 0 : i32
    return %arg0, %c0_i32 : i32, i32
  }
  func.func @transform_1(%arg0: i32) -> (i32, i32) {
    %c0_i32 = arith.constant 0 : i32
    %c0_i32_0 = arith.constant 0 : i32
    %c0_i32_1 = arith.constant 0 : i32
    return %c0_i32, %c0_i32_0 : i32, i32
  }
  func.func @transform_2(%arg0: i32) -> (i32, i32) {
    %c0_i32 = arith.constant 0 : i32
    %c0_i32_0 = arith.constant 0 : i32
    %c0_i32_1 = arith.constant 0 : i32
    return %c0_i32, %c0_i32_0 : i32, i32
  }
  func.func @transform_3(%arg0: i32) -> (i32, i32) {
    %c0_i32 = arith.constant 0 : i32
    %c0_i32_0 = arith.constant 0 : i32
    return %arg0, %c0_i32 : i32, i32
  }
  func.func @transform_4(%arg0: i32) -> (i32, i32) {
    %c0_i32 = arith.constant 0 : i32
    %c0_i32_0 = arith.constant 0 : i32
    return %arg0, %c0_i32 : i32, i32
  }
}

module attributes {stable_mosaic.version = 11 : i64} {
  func.func @_fused_matmul_kernel(%arg0: i32, %arg1: memref<16x128xbf16, #tpu.memory_space<vmem>>, %arg2: memref<1x128xf32, #tpu.memory_space<vmem>>, %arg3: memref<1x128xf32, #tpu.memory_space<vmem>>, %arg4: memref<128x384xbf16, #tpu.memory_space<vmem>>, %arg5: memref<1x384xf32, #tpu.memory_space<vmem>>, %arg6: memref<16x384xbf16, #tpu.memory_space<vmem>>) attributes {dimension_semantics = [#tpu.dimension_semantics<parallel>], iteration_bounds = array<i64: 2>, scalar_prefetch = 0 : i64, scratch_operands = 0 : i64, tpu.core_type = #tpu.core_type<tc>, window_params = [{transform_indices = @transform_0, window_bounds = array<i64: 16, 128>}, {pipeline_mode = #tpu.pipeline_mode<synchronous>, transform_indices = @transform_1, window_bounds = array<i64: 1, 128>}, {pipeline_mode = #tpu.pipeline_mode<synchronous>, transform_indices = @transform_2, window_bounds = array<i64: 1, 128>}, {pipeline_mode = #tpu.pipeline_mode<synchronous>, transform_indices = @transform_3, window_bounds = array<i64: 128, 384>}, {pipeline_mode = #tpu.pipeline_mode<synchronous>, transform_indices = @transform_4, window_bounds = array<i64: 1, 384>}, {transform_indices = @transform_5, window_bounds = array<i64: 16, 384>}]} {
    %c0 = arith.constant 0 : index
    %c0_0 = arith.constant 0 : index
    %0 = vector.load %arg1[%c0, %c0_0] : memref<16x128xbf16, #tpu.memory_space<vmem>>, vector<16x128xbf16>
    %1 = arith.extf %0 : vector<16x128xbf16> to vector<16x128xf32>
    %cst = arith.constant dense<0.000000e+00> : vector<16xf32>
    %2 = vector.multi_reduction <add>, %1, %cst [1] : vector<16x128xf32> to vector<16xf32>
    %3 = vector.shape_cast %2 : vector<16xf32> to vector<16x1xf32>
    %cst_1 = arith.constant 1.280000e+02 : f32
    %4 = vector.broadcast %cst_1 : f32 to vector<16x1xf32>
    %5 = arith.divf %3, %4 : vector<16x1xf32>
    %6 = vector.broadcast %5 : vector<16x1xf32> to vector<16x128xf32>
    %7 = arith.subf %1, %6 : vector<16x128xf32>
    %8 = arith.mulf %7, %7 : vector<16x128xf32>
    %cst_2 = arith.constant dense<0.000000e+00> : vector<16xf32>
    %9 = vector.multi_reduction <add>, %8, %cst_2 [1] : vector<16x128xf32> to vector<16xf32>
    %10 = vector.shape_cast %9 : vector<16xf32> to vector<16x1xf32>
    %cst_3 = arith.constant 1.280000e+02 : f32
    %11 = vector.broadcast %cst_3 : f32 to vector<16x1xf32>
    %12 = arith.divf %10, %11 : vector<16x1xf32>
    %cst_4 = arith.constant 9.99999997E-7 : f32
    %13 = vector.broadcast %cst_4 : f32 to vector<16x1xf32>
    %14 = arith.addf %12, %13 : vector<16x1xf32>
    %15 = math.rsqrt %14 : vector<16x1xf32>
    %16 = vector.broadcast %15 : vector<16x1xf32> to vector<16x128xf32>
    %17 = arith.mulf %7, %16 : vector<16x128xf32>
    %c0_5 = arith.constant 0 : index
    %c0_6 = arith.constant 0 : index
    %18 = vector.load %arg2[%c0_5, %c0_6] : memref<1x128xf32, #tpu.memory_space<vmem>>, vector<1x128xf32>
    %19 = vector.broadcast %18 : vector<1x128xf32> to vector<16x128xf32>
    %20 = arith.mulf %17, %19 : vector<16x128xf32>
    %c0_7 = arith.constant 0 : index
    %c0_8 = arith.constant 0 : index
    %21 = vector.load %arg3[%c0_7, %c0_8] : memref<1x128xf32, #tpu.memory_space<vmem>>, vector<1x128xf32>
    %22 = vector.broadcast %21 : vector<1x128xf32> to vector<16x128xf32>
    %23 = arith.addf %20, %22 : vector<16x128xf32>
    %24 = arith.truncf %23 : vector<16x128xf32> to vector<16x128xbf16>
    %c0_9 = arith.constant 0 : index
    %c0_10 = arith.constant 0 : index
    %25 = vector.load %arg4[%c0_9, %c0_10] : memref<128x384xbf16, #tpu.memory_space<vmem>>, vector<128x384xbf16>
    %cst_11 = arith.constant dense<0.000000e+00> : vector<16x384xf32>
    %26 = tpu.matmul %24, %25, %cst_11 {dimension_numbers = #tpu.dot_dimension_numbers<[1], [0], [0], [1], [0, 0, 1, 1], [], []>} : vector<16x128xbf16>, vector<128x384xbf16>, vector<16x384xf32> -> vector<16x384xf32>
    %c0_12 = arith.constant 0 : index
    %c0_13 = arith.constant 0 : index
    %27 = vector.load %arg5[%c0_12, %c0_13] : memref<1x384xf32, #tpu.memory_space<vmem>>, vector<1x384xf32>
    %28 = vector.broadcast %27 : vector<1x384xf32> to vector<16x384xf32>
    %29 = arith.addf %26, %28 : vector<16x384xf32>
    %cst_14 = arith.constant 5.000000e-01 : f32
    %30 = vector.broadcast %cst_14 : f32 to vector<16x384xf32>
    %31 = arith.mulf %30, %29 : vector<16x384xf32>
    %cst_15 = arith.constant 0.707106769 : f32
    %32 = vector.broadcast %cst_15 : f32 to vector<16x384xf32>
    %33 = arith.mulf %29, %32 : vector<16x384xf32>
    %34 = math.erf %33 : vector<16x384xf32>
    %cst_16 = arith.constant 1.000000e+00 : f32
    %35 = vector.broadcast %cst_16 : f32 to vector<16x384xf32>
    %36 = arith.addf %35, %34 : vector<16x384xf32>
    %37 = arith.mulf %31, %36 : vector<16x384xf32>
    %38 = arith.truncf %37 : vector<16x384xf32> to vector<16x384xbf16>
    %c0_17 = arith.constant 0 : index
    %c0_18 = arith.constant 0 : index
    %39 = vector.load %arg6[%c0_17, %c0_18] : memref<16x384xbf16, #tpu.memory_space<vmem>>, vector<16x384xbf16>
    tpu.vector_store %arg6[%c0_17, %c0_18], %38 {strides = array<i32>} : memref<16x384xbf16, #tpu.memory_space<vmem>>, vector<16x384xbf16>,
    return
  }
  func.func @transform_0(%arg0: i32) -> (i32, i32) {
    %c0_i32 = arith.constant 0 : i32
    %c0_i32_0 = arith.constant 0 : i32
    return %arg0, %c0_i32 : i32, i32
  }
  func.func @transform_1(%arg0: i32) -> (i32, i32) {
    %c0_i32 = arith.constant 0 : i32
    %c0_i32_0 = arith.constant 0 : i32
    %c0_i32_1 = arith.constant 0 : i32
    return %c0_i32, %c0_i32_0 : i32, i32
  }
  func.func @transform_2(%arg0: i32) -> (i32, i32) {
    %c0_i32 = arith.constant 0 : i32
    %c0_i32_0 = arith.constant 0 : i32
    %c0_i32_1 = arith.constant 0 : i32
    return %c0_i32, %c0_i32_0 : i32, i32
  }
  func.func @transform_3(%arg0: i32) -> (i32, i32) {
    %c0_i32 = arith.constant 0 : i32
    %c0_i32_0 = arith.constant 0 : i32
    %c0_i32_1 = arith.constant 0 : i32
    return %c0_i32, %c0_i32_0 : i32, i32
  }
  func.func @transform_4(%arg0: i32) -> (i32, i32) {
    %c0_i32 = arith.constant 0 : i32
    %c0_i32_0 = arith.constant 0 : i32
    %c0_i32_1 = arith.constant 0 : i32
    return %c0_i32, %c0_i32_0 : i32, i32
  }
  func.func @transform_5(%arg0: i32) -> (i32, i32) {
    %c0_i32 = arith.constant 0 : i32
    %c0_i32_0 = arith.constant 0 : i32
    return %arg0, %c0_i32 : i32, i32
  }
}

module attributes {stable_mosaic.version = 11 : i64} {
  func.func @_bn_moments_kernel(%arg0: i32, %arg1: memref<32x128xbf16, #tpu.memory_space<vmem>>, %arg2: memref<2x128xf32, #tpu.memory_space<vmem>>) attributes {dimension_semantics = [#tpu.dimension_semantics<arbitrary>], iteration_bounds = array<i64: 1>, scalar_prefetch = 0 : i64, scratch_operands = 0 : i64, tpu.core_type = #tpu.core_type<tc>, window_params = [{transform_indices = @transform_0, window_bounds = array<i64: 32, 128>}, {pipeline_mode = #tpu.pipeline_mode<synchronous>, transform_indices = @transform_1, window_bounds = array<i64: 2, 128>}]} {
    %c0_i32 = arith.constant 0 : i32
    %0 = arith.cmpi eq, %arg0, %c0_i32 : i32
    %1 = arith.extui %0 : i1 to i32
    %c0_i32_0 = arith.constant 0 : i32
    %2 = arith.cmpi ne, %1, %c0_i32_0 : i32
    scf.if %2 {
      %cst_10 = arith.constant 0.000000e+00 : f32
      %16 = vector.broadcast %cst_10 : f32 to vector<2x128xf32>
      %c0_11 = arith.constant 0 : index
      %c0_12 = arith.constant 0 : index
      %17 = vector.load %arg2[%c0_11, %c0_12] : memref<2x128xf32, #tpu.memory_space<vmem>>, vector<2x128xf32>
      tpu.vector_store %arg2[%c0_11, %c0_12], %16 {strides = array<i32>} : memref<2x128xf32, #tpu.memory_space<vmem>>, vector<2x128xf32>,
    } else {
    }
    %c0 = arith.constant 0 : index
    %c0_1 = arith.constant 0 : index
    %3 = vector.load %arg1[%c0, %c0_1] : memref<32x128xbf16, #tpu.memory_space<vmem>>, vector<32x128xbf16>
    %4 = arith.extf %3 : vector<32x128xbf16> to vector<32x128xf32>
    %c0_2 = arith.constant 0 : index
    %c0_3 = arith.constant 0 : index
    %5 = vector.load %arg2[%c0_2, %c0_3] : memref<2x128xf32, #tpu.memory_space<vmem>>, vector<1x128xf32>
    %cst = arith.constant dense<0.000000e+00> : vector<128xf32>
    %6 = vector.multi_reduction <add>, %4, %cst [0] : vector<32x128xf32> to vector<128xf32>
    %7 = vector.shape_cast %6 : vector<128xf32> to vector<1x128xf32>
    %8 = arith.addf %5, %7 : vector<1x128xf32>
    %c0_4 = arith.constant 0 : index
    %c0_5 = arith.constant 0 : index
    %9 = vector.load %arg2[%c0_4, %c0_5] : memref<2x128xf32, #tpu.memory_space<vmem>>, vector<1x128xf32>
    tpu.vector_store %arg2[%c0_4, %c0_5], %8 {strides = array<i32>} : memref<2x128xf32, #tpu.memory_space<vmem>>, vector<1x128xf32>,
    %c1 = arith.constant 1 : index
    %c0_6 = arith.constant 0 : index
    %10 = vector.load %arg2[%c1, %c0_6] : memref<2x128xf32, #tpu.memory_space<vmem>>, vector<1x128xf32>
    %11 = arith.mulf %4, %4 : vector<32x128xf32>
    %cst_7 = arith.constant dense<0.000000e+00> : vector<128xf32>
    %12 = vector.multi_reduction <add>, %11, %cst_7 [0] : vector<32x128xf32> to vector<128xf32>
    %13 = vector.shape_cast %12 : vector<128xf32> to vector<1x128xf32>
    %14 = arith.addf %10, %13 : vector<1x128xf32>
    %c1_8 = arith.constant 1 : index
    %c0_9 = arith.constant 0 : index
    %15 = vector.load %arg2[%c1_8, %c0_9] : memref<2x128xf32, #tpu.memory_space<vmem>>, vector<1x128xf32>
    tpu.vector_store %arg2[%c1_8, %c0_9], %14 {strides = array<i32>} : memref<2x128xf32, #tpu.memory_space<vmem>>, vector<1x128xf32>,
    return
  }
  func.func @transform_0(%arg0: i32) -> (i32, i32) {
    %c0_i32 = arith.constant 0 : i32
    %c0_i32_0 = arith.constant 0 : i32
    return %arg0, %c0_i32 : i32, i32
  }
  func.func @transform_1(%arg0: i32) -> (i32, i32) {
    %c0_i32 = arith.constant 0 : i32
    %c0_i32_0 = arith.constant 0 : i32
    %c0_i32_1 = arith.constant 0 : i32
    return %c0_i32, %c0_i32_0 : i32, i32
  }
}

module attributes {stable_mosaic.version = 11 : i64} {
  func.func @_bn_affine_kernel(%arg0: i32, %arg1: memref<16x128xbf16, #tpu.memory_space<vmem>>, %arg2: memref<1x128xf32, #tpu.memory_space<vmem>>, %arg3: memref<1x128xf32, #tpu.memory_space<vmem>>, %arg4: memref<16x128xf32, #tpu.memory_space<vmem>>) attributes {dimension_semantics = [#tpu.dimension_semantics<parallel>], iteration_bounds = array<i64: 2>, scalar_prefetch = 0 : i64, scratch_operands = 0 : i64, tpu.core_type = #tpu.core_type<tc>, window_params = [{transform_indices = @transform_0, window_bounds = array<i64: 16, 128>}, {pipeline_mode = #tpu.pipeline_mode<synchronous>, transform_indices = @transform_1, window_bounds = array<i64: 1, 128>}, {pipeline_mode = #tpu.pipeline_mode<synchronous>, transform_indices = @transform_2, window_bounds = array<i64: 1, 128>}, {transform_indices = @transform_3, window_bounds = array<i64: 16, 128>}]} {
    %c0 = arith.constant 0 : index
    %c0_0 = arith.constant 0 : index
    %0 = vector.load %arg1[%c0, %c0_0] : memref<16x128xbf16, #tpu.memory_space<vmem>>, vector<16x128xbf16>
    %1 = arith.extf %0 : vector<16x128xbf16> to vector<16x128xf32>
    %c0_1 = arith.constant 0 : index
    %c0_2 = arith.constant 0 : index
    %2 = vector.load %arg2[%c0_1, %c0_2] : memref<1x128xf32, #tpu.memory_space<vmem>>, vector<1x128xf32>
    %3 = vector.broadcast %2 : vector<1x128xf32> to vector<16x128xf32>
    %4 = arith.mulf %1, %3 : vector<16x128xf32>
    %c0_3 = arith.constant 0 : index
    %c0_4 = arith.constant 0 : index
    %5 = vector.load %arg3[%c0_3, %c0_4] : memref<1x128xf32, #tpu.memory_space<vmem>>, vector<1x128xf32>
    %6 = vector.broadcast %5 : vector<1x128xf32> to vector<16x128xf32>
    %7 = arith.addf %4, %6 : vector<16x128xf32>
    %c0_5 = arith.constant 0 : index
    %c0_6 = arith.constant 0 : index
    %8 = vector.load %arg4[%c0_5, %c0_6] : memref<16x128xf32, #tpu.memory_space<vmem>>, vector<16x128xf32>
    tpu.vector_store %arg4[%c0_5, %c0_6], %7 {strides = array<i32>} : memref<16x128xf32, #tpu.memory_space<vmem>>, vector<16x128xf32>,
    return
  }
  func.func @transform_0(%arg0: i32) -> (i32, i32) {
    %c0_i32 = arith.constant 0 : i32
    %c0_i32_0 = arith.constant 0 : i32
    return %arg0, %c0_i32 : i32, i32
  }
  func.func @transform_1(%arg0: i32) -> (i32, i32) {
    %c0_i32 = arith.constant 0 : i32
    %c0_i32_0 = arith.constant 0 : i32
    %c0_i32_1 = arith.constant 0 : i32
    return %c0_i32, %c0_i32_0 : i32, i32
  }
  func.func @transform_2(%arg0: i32) -> (i32, i32) {
    %c0_i32 = arith.constant 0 : i32
    %c0_i32_0 = arith.constant 0 : i32
    %c0_i32_1 = arith.constant 0 : i32
    return %c0_i32, %c0_i32_0 : i32, i32
  }
  func.func @transform_3(%arg0: i32) -> (i32, i32) {
    %c0_i32 = arith.constant 0 : i32
    %c0_i32_0 = arith.constant 0 : i32
    return %arg0, %c0_i32 : i32, i32
  }
}

</mosaic_0001>

<bundles_post_ra>
// kernel: transformer_forward.27
= control target key start
LH: loop header
LB: loop body
LE: loop exit
PB: predicated region body
PF: predicated region fallthrough
CT: control target
= control target key end

     0   :  { %s408_s12 = smov 0   ;;  %s437_s0 = inlined_call_operand.vmem [shape: bf16[32,48], index: 0, kind: input, shape index: {}]   ;;  %s438_s1 = inlined_call_operand.vmem [shape: bf16[48,128], index: 1, kind: input, shape index: {}]   ;;  %s439_s2 = inlined_call_operand.vmem [shape: f32[1,128], index: 2, kind: input, shape index: {}]   ;;  %s440_s3 = inlined_call_operand.vmem [shape: bf16[32,128], index: 3, kind: output, shape index: {}]  }
   0x1 LB: > { %s324_s13 = sadd.s32 4294967295, %s384_s12   ;;  %p328_p0 = scmp.ge.s32.totalorder %s384_s12, 1  ;;  %s384_s12 = sphi %s408_s12, %s13_s12  }
   0x2   : > { %p138_p1 = scmp.lt.s32.totalorder %s384_s12, 3 }
   0x4   : > { %p139_p2 = pnand %p328_p0, %p138_p1 }
   0x5   : > { %s329_s18 = sshll.u32 (!%p139_p2), %s324_s13, 1 }
   0x6   : > { %142 = sbr.rel (%p139_p2) target bundleno = 226 (0xe2), region = 32  ;;  %p163_p3 = scmp.lt.s32.totalorder (!%p139_p2), %s329_s18, 3 }
   0xb   : > { %v374_v0 = vld [vmem:[%s438_s1 + $0x10] sm:$0xff]   ;;  %v386_v1 = vmov 0.0   ;;  %v375_v2 = vld [vmem:[%s438_s1 + $0x8] sm:$0xff]   ;;  %vm387_vm0 = vmmov 0   ;;  %s442_s18 = smov (!%p163_p3, %s329_s18), 3  ;;  %v376_v3 = vld [vmem:[%s438_s1] sm:$0xff]  }
   0xc   : > { %354 = vmatprep.subr.bf16.mxu0 %v386_v1  ;;  %360 = vmatprep.mubr.msk.bf16.mxu0 %vm387_vm0, %v386_v1  ;;  %s330_s21 = sshll.u32 %s442_s18, 2  ;;  %vm213_vm1 = vcmask 392192   ;;  %v333_v6 = vld [vmem:[%s439_s2] ss:$0 sm:$0xff] }
   0xd   : > { %355 = vmatpush3.bf16.msra.mxu0 %v374_v0  ;;  %s166_s24 = scalar_lea.vmem %s437_s0, %s330_s21  ;;  %s172_s29 = scalar_lea.vmem %s440_s3, %s330_s21 }
   0xe   : > { %356 = vmatprep.subr.bf16.mxu0 %v386_v1  ;;  %v377_v4 = vld [vmem:[%s166_s24] sm:$0xff]  }
  0x11   : > { %357 = vmatpush3.bf16.msra.mxu0 %v375_v2 }
  0x12   : > { %358 = vmatprep.subr.bf16.mxu0 %v386_v1 }
  0x15   : > { %359 = vmatpush3.bf16.msra.mxu0 %v376_v3 }
  0x18   : > { %361 = vmatmul.mubr.msk.bf16.vlgmr.msra.gmra.mxu0 %vm213_vm1, %v377_v4 }
  0xd8   : > { %v251_v5 = vpop.f32.mrf.mxu0 }
  0xd9   : > { %v252_v9 = vadd.f32 %v333_v6, %v251_v5 }
  0xda   : > { %v362_v7 = vpop.f32.mrf.mxu0 }
  0xdc   : > { %v254_v8 = vpop.f32.mrf.mxu0 }
  0xdd   : > { %v255_v10 = vadd.f32 %v333_v6, %v254_v8 }
  0xde   : > { %v363_v11 = vpop.f32.mrf.mxu0 }
  0xdf   : > { %v348_v12 = vpack.c.bf16 %v255_v10, %v252_v9 }
  0xe1   : > { %349 = vst [vmem:[%s172_s29] sm:$0xff] %v348_v12  }
  0xe2 PF: > { %s13_s12 = sadd.s32 1, %s384_s12  }
  0xe3   : > { %p10_p4 = scmp.ge.s32.totalorder %s13_s12, 4  }
  0xe5   :  { %12 = sbr.rel (!%p10_p4) target bundleno = 1 (0x1), region = 62 }

// kernel: transformer_forward.28
= control target key start
LH: loop header
LB: loop body
LE: loop exit
PB: predicated region body
PF: predicated region fallthrough
CT: control target
= control target key end

     0   :  { %s631_s12 = smov 0   ;;  %s633_s13 = smov 0   ;;  %s719_s0 = inlined_call_operand.vmem [shape: bf16[2,4,4,128], index: 0, kind: input, shape index: {}]   ;;  %s720_s1 = inlined_call_operand.vmem [shape: f32[9,128], index: 1, kind: input, shape index: {}]   ;;  %s721_s2 = inlined_call_operand.vmem [shape: f32[1,128], index: 2, kind: input, shape index: {}]   ;;  %s722_s3 = inlined_call_operand.vmem [shape: bf16[2,4,4,128], index: 3, kind: output, shape index: {}]  }
   0x1   :  { %s635_s14 = smov 0  }
   0x2 LB: > { %s25_s15 = sadd.s32 1, %s604_s13  ;;  %p542_p0 = scmp.ge.s32.totalorder %s608_s14, 1  ;;  %s608_s14 = sphi %s635_s14, %s13_s14   ;;  %s604_s13 = sphi %s633_s13, %s724_s13   ;;  %s600_s12 = sphi %s631_s12, %s723_s12  }
   0x3   : > { %p27_p1 = scmp.ge.s32.totalorder %s25_s15, 2  ;;  %p173_p2 = scmp.lt.s32.totalorder %s608_s14, 3 }
   0x5   : > { %s726_s15 = smov (%p27_p1, %s25_s15), 0  ;;  %p174_p3 = pnand %p542_p0, %p173_p2 }
   0x6   : > { %p210_p4 = scmp.lt.s32.totalorder (!%p174_p3), %s600_s12, 1 }
   0x7   : > { %177 = sbr.rel (%p174_p3) target bundleno = 52 (0x34), region = 32 }
   0xc   : > { %v610_v0 = vmov 0.0   ;;  %s728_s12 = smov (!%p210_p4, %s600_s12), 1  ;;  %v547_v1 = vld [vmem:[%s721_s2] ss:$0 sm:$0xff]  ;;  %v549_v3 = vld [vmem:[%s720_s1 + $0x1] ss:$0 sm:$0xff] }
   0xd   : > { %241 = vst [vmem:[#allocation2] sm:$0x3f] %v610_v0  ;;  %242 = vst [vmem:[#allocation2 + $0x8] sm:$0x3f] %v610_v0  ;;  %s559_s16 = sshll.u32 %s728_s12, 3 }
   0xe   : > { %243 = vst [vmem:[#allocation2 + $0x10] sm:$0x3f] %v610_v0  ;;  %244 = vst [vmem:[#allocation2 + $0x18] sm:$0x3f] %v610_v0  ;;  %s217_s19 = scalar_lea.vmem %s719_s0, %s559_s16  ;;  %v548_v2 = vld [vmem:[%s720_s1] ss:$0 sm:$0xff]  ;;  %s232_s20 = scalar_lea.vmem %s722_s3, %s559_s16 }
   0xf   : > { %245 = vst [vmem:[#allocation2 + $0x20] sm:$0x3f] %v610_v0  ;;  %246 = vst [vmem:[#allocation2 + $0x28] sm:$0x3f] %v610_v0  ;;  %v233_v4 = vld [vmem:[%s217_s19] sm:$0x3] }
  0x10   : > { %v234_v5 = vld [vmem:[%s217_s19 + $0x2] sm:$0x3]  ;;  %v235_v6 = vld [vmem:[%s217_s19 + $0x4] sm:$0x3]  ;;  %v237_v7 = vunpack.c.l.bf16 %v233_v4  ;;  %v236_v11 = vld [vmem:[%s217_s19 + $0x6] sm:$0x3] }
  0x11   : > { %v669_v8 = vld [vmem:[%s720_s1 + $0x2] ss:$0 sm:$0xff]  ;;  %v238_v9 = vunpack.c.l.bf16 %v234_v5  ;;  %v239_v10 = vunpack.c.l.bf16 %v235_v6  ;;  %v240_v15 = vunpack.c.l.bf16 %v236_v11  ;;  %v551_v22 = vld [vmem:[%s720_s1 + $0x3] ss:$0 sm:$0xff]  ;;  %v678_v32 = vld [vmem:[%s720_s1 + $0x4] ss:$0 sm:$0xff] }
  0x12   : > { %248 = vst [vmem:[#allocation2 + $0x9] sm:$0xf] %v237_v7  ;;  %v259_v16 = vadd.f32 %v547_v1, %v237_v7  ;;  %v683_v38 = vld [vmem:[%s720_s1 + $0x5] ss:$0 sm:$0xff]  ;;  %v554_v62 = vld [vmem:[%s720_s1 + $0x6] ss:$0 sm:$0xff] }
  0x13   : > { %249 = vst [vmem:[#allocation2 + $0x11] sm:$0xf] %v238_v9  ;;  %250 = vst [vmem:[#allocation2 + $0x19] sm:$0xf] %v239_v10  ;;  %v260_v24 = vadd.f32 %v547_v1, %v238_v9  ;;  %v261_v28 = vadd.f32 %v547_v1, %v239_v10  ;;  %v262_v37 = vadd.f32 %v547_v1, %v240_v15 }
  0x14   : > { %v263_v12 = vld [vmem:[#allocation2] sm:$0xf]  ;;  %251 = vst [vmem:[#allocation2 + $0x21] sm:$0xf] %v240_v15 }
  0x15   : > { %v280_v13 = vld [vmem:[#allocation2 + $0x1] sm:$0xf]  ;;  %v272_v17 = vmul.f32 %v548_v2, %v263_v12 }
  0x16   : > { %v297_v14 = vld [vmem:[#allocation2 + $0x2] sm:$0xf]  ;;  %v289_v18 = vmul.f32 %v549_v3, %v280_v13 }
  0x17   : > { %v276_v19 = vadd.f32 %v272_v17, %v259_v16  ;;  %v306_v20 = vmul.f32 %v669_v8, %v297_v14  ;;  %v556_v17 = vld [vmem:[%s720_s1 + $0x8] ss:$0 sm:$0xff] }
  0x19   : > { %v293_v21 = vadd.f32 %v289_v18, %v276_v19  ;;  %v314_v25 = vld [vmem:[#allocation2 + $0x8] sm:$0xf] }
  0x1a   : > { %v264_v26 = vld [vmem:[#allocation2 + $0x8] sm:$0xf]  ;;  %v323_v29 = vmul.f32 %v551_v22, %v314_v25  ;;  %v265_v31 = vld [vmem:[#allocation2 + $0x10] sm:$0xf]  ;;  %v266_v43 = vld [vmem:[#allocation2 + $0x18] sm:$0xf] }
  0x1b   : > { %v310_v23 = vadd.f32 %v306_v20, %v293_v21  ;;  %v281_v27 = vld [vmem:[#allocation2 + $0x9] sm:$0xf]  ;;  %v273_v30 = vmul.f32 %v548_v2, %v264_v26  ;;  %v315_v34 = vld [vmem:[#allocation2 + $0x10] sm:$0xf]  ;;  %v274_v35 = vmul.f32 %v548_v2, %v265_v31  ;;  %v283_v44 = vld [vmem:[#allocation2 + $0x19] sm:$0xf]  ;;  %v275_v48 = vmul.f32 %v548_v2, %v266_v43 }
  0x1c   : > { %v298_v33 = vld [vmem:[#allocation2 + $0xa] sm:$0xf]  ;;  %v282_v36 = vld [vmem:[#allocation2 + $0x11] sm:$0xf]  ;;  %v290_v41 = vmul.f32 %v549_v3, %v281_v27  ;;  %v316_v47 = vld [vmem:[#allocation2 + $0x18] sm:$0xf]  ;;  %v324_v53 = vmul.f32 %v551_v22, %v315_v34  ;;  %v292_v60 = vmul.f32 %v549_v3, %v283_v44 }
  0x1d   : > { %v327_v39 = vadd.f32 %v323_v29, %v310_v23  ;;  %v277_v40 = vadd.f32 %v273_v30, %v260_v24  ;;  %v299_v42 = vld [vmem:[#allocation2 + $0x12] sm:$0xf]  ;;  %v278_v45 = vadd.f32 %v274_v35, %v261_v28  ;;  %v291_v46 = vmul.f32 %v549_v3, %v282_v36  ;;  %v331_v49 = vld [vmem:[#allocation2 + $0x9] sm:$0xf]  ;;  %v300_v54 = vld [vmem:[#allocation2 + $0x1a] sm:$0xf] }
  0x1e   : > { %v348_v50 = vld [vmem:[#allocation2 + $0xa] sm:$0xf]  ;;  %v307_v52 = vmul.f32 %v669_v8, %v298_v33  ;;  %v317_v55 = vld [vmem:[#allocation2 + $0x20] sm:$0xf]  ;;  %v340_v56 = vmul.f32 %v678_v32, %v331_v49  ;;  %v308_v58 = vmul.f32 %v669_v8, %v299_v42  ;;  %v279_v59 = vadd.f32 %v275_v48, %v262_v37  ;;  %v366_v61 = vld [vmem:[#allocation2 + $0x10] sm:$0xf] }
  0x1f   : > { %v294_v51 = vadd.f32 %v290_v41, %v277_v40  ;;  %v295_v57 = vadd.f32 %v291_v46, %v278_v45  ;;  %v332_v63 = vld [vmem:[#allocation2 + $0x11] sm:$0xf]  ;;  %v325_v1 = vmul.f32 %v551_v22, %v316_v47  ;;  %v357_v4 = vmul.f32 %v683_v38, %v348_v50  ;;  %v333_v5 = vld [vmem:[#allocation2 + $0x19] sm:$0xf]  ;;  %v555_v3 = vld [vmem:[%s720_s1 + $0x7] ss:$0 sm:$0xff] }
  0x20   : > { %v344_v2 = vadd.f32 %v340_v56, %v327_v39  ;;  %v296_v7 = vadd.f32 %v292_v60, %v279_v59  ;;  %v309_v9 = vmul.f32 %v669_v8, %v300_v54  ;;  %v326_v10 = vmul.f32 %v551_v22, %v317_v55  ;;  %v383_v11 = vld [vmem:[#allocation2 + $0x11] sm:$0xf]  ;;  %v350_v19 = vld [vmem:[#allocation2 + $0x1a] sm:$0xf]  ;;  %v334_v23 = vld [vmem:[#allocation2 + $0x21] sm:$0xf] }
  0x21   : > { %v311_v0 = vadd.f32 %v307_v52, %v294_v51  ;;  %v312_v6 = vadd.f32 %v308_v58, %v295_v57  ;;  %v349_v12 = vld [vmem:[#allocation2 + $0x12] sm:$0xf]  ;;  %v375_v15 = vmul.f32 %v554_v62, %v366_v61  ;;  %v341_v18 = vmul.f32 %v678_v32, %v332_v63  ;;  %v367_v21 = vld [vmem:[#allocation2 + $0x18] sm:$0xf]  ;;  %v368_v29 = vld [vmem:[#allocation2 + $0x20] sm:$0xf] }
  0x22   : > { %v361_v14 = vadd.f32 %v357_v4, %v344_v2  ;;  %v400_v16 = vld [vmem:[#allocation2 + $0x12] sm:$0xf]  ;;  %v313_v8 = vadd.f32 %v309_v9, %v296_v7  ;;  %v342_v22 = vmul.f32 %v678_v32, %v333_v5  ;;  %v392_v25 = vmul.f32 %v555_v3, %v383_v11  ;;  %v384_v28 = vld [vmem:[#allocation2 + $0x19] sm:$0xf]  ;;  %v369_v30 = vld [vmem:[#allocation2 + $0x28] sm:$0xf] }
  0x23   : > { %v328_v13 = vadd.f32 %v324_v53, %v311_v0  ;;  %v329_v20 = vadd.f32 %v325_v1, %v312_v6  ;;  %v358_v27 = vmul.f32 %v683_v38, %v349_v12  ;;  %v409_v33 = vmul.f32 %v556_v17, %v400_v16  ;;  %v351_v36 = vld [vmem:[#allocation2 + $0x22] sm:$0xf]  ;;  %v401_v44 = vld [vmem:[#allocation2 + $0x1a] sm:$0xf]  ;;  %v386_v55 = vld [vmem:[#allocation2 + $0x29] sm:$0xf] }
  0x24   : > { %v379_v24 = vadd.f32 %v375_v15, %v361_v14  ;;  %v330_v31 = vadd.f32 %v326_v10, %v313_v8  ;;  %v359_v35 = vmul.f32 %v683_v38, %v350_v19  ;;  %v376_v40 = vmul.f32 %v554_v62, %v367_v21  ;;  %v385_v41 = vld [vmem:[#allocation2 + $0x21] sm:$0xf]  ;;  %v403_v61 = vld [vmem:[#allocation2 + $0x2a] sm:$0xf] }
  0x25   : > { %v345_v26 = vadd.f32 %v341_v18, %v328_v13  ;;  %v346_v34 = vadd.f32 %v342_v22, %v329_v20  ;;  %v343_v42 = vmul.f32 %v678_v32, %v334_v23  ;;  %v393_v43 = vmul.f32 %v555_v3, %v384_v28  ;;  %v402_v50 = vld [vmem:[#allocation2 + $0x22] sm:$0xf] }
  0x26   : > { %v396_v37 = vadd.f32 %v392_v25, %v379_v24  ;;  %v377_v46 = vmul.f32 %v554_v62, %v368_v29  ;;  %v378_v47 = vmul.f32 %v554_v62, %v369_v30  ;;  %v360_v52 = vmul.f32 %v683_v38, %v351_v36 }
  0x27   : > { %v362_v39 = vadd.f32 %v358_v27, %v345_v26  ;;  %v363_v45 = vadd.f32 %v359_v35, %v346_v34  ;;  %v347_v51 = vadd.f32 %v343_v42, %v330_v31  ;;  %v394_v54 = vmul.f32 %v555_v3, %v385_v41 }
  0x28   : > { %v413_v48 = vadd.f32 %v409_v33, %v396_v37  ;;  %v410_v57 = vmul.f32 %v556_v17, %v401_v44  ;;  %v411_v60 = vmul.f32 %v556_v17, %v402_v50  ;;  %v395_v0 = vmul.f32 %v555_v3, %v386_v55 }
  0x29   : > { %v380_v49 = vadd.f32 %v376_v40, %v362_v39  ;;  %v381_v53 = vadd.f32 %v377_v46, %v363_v45  ;;  %v364_v58 = vadd.f32 %v360_v52, %v347_v51  ;;  %v412_v4 = vmul.f32 %v556_v17, %v403_v61 }
  0x2a   : > { %v417_v32 = vpack.c.bf16 %v413_v48, %v413_v48 }
  0x2b   : > { %v397_v56 = vadd.f32 %v393_v43, %v380_v49  ;;  %v398_v59 = vadd.f32 %v394_v54, %v381_v53  ;;  %v382_v63 = vadd.f32 %v378_v47, %v364_v58 }
  0x2c   : > { %421 = vst [vmem:[%s232_s20] sm:$0x3] %v417_v32 }
  0x2d   : > { %v414_v62 = vadd.f32 %v410_v57, %v397_v56  ;;  %v415_v38 = vadd.f32 %v411_v60, %v398_v59  ;;  %v399_v2 = vadd.f32 %v395_v0, %v382_v63 }
  0x2f   : > { %v418_v1 = vpack.c.bf16 %v414_v62, %v414_v62  ;;  %v419_v5 = vpack.c.bf16 %v415_v38, %v415_v38  ;;  %v416_v6 = vadd.f32 %v412_v4, %v399_v2 }
  0x31   : > { %422 = vst [vmem:[%s232_s20 + $0x2] sm:$0x3] %v418_v1  ;;  %423 = vst [vmem:[%s232_s20 + $0x4] sm:$0x3] %v419_v5  ;;  %v420_v7 = vpack.c.bf16 %v416_v6, %v416_v6 }
  0x33   : > { %424 = vst [vmem:[%s232_s20 + $0x6] sm:$0x3] %v420_v7 }
  0x34 PF: > { %s13_s14 = sadd.s32 1, %s608_s14   ;;  %s723_s12 = smov %s604_s13 }
  0x35   : > { %p10_p5 = scmp.ge.s32.totalorder %s13_s14, 4   ;;  %s724_s13 = smov %s726_s15 }
  0x37   :  { %12 = sbr.rel (!%p10_p5) target bundleno = 2 (0x2), region = 70 }

// kernel: transformer_forward.29
= control target key start
LH: loop header
LB: loop body
LE: loop exit
PB: predicated region body
PF: predicated region fallthrough
CT: control target
= control target key end

     0   :  { %s787_s18 = smov 0   ;;  %s908_s0 = inlined_call_operand.vmem [shape: bf16[32,128], index: 0, kind: input, shape index: {}]   ;;  %s909_s1 = inlined_call_operand.vmem [shape: f32[1,128], index: 1, kind: input, shape index: {}]   ;;  %s910_s2 = inlined_call_operand.vmem [shape: f32[1,128], index: 2, kind: input, shape index: {}]   ;;  %s911_s3 = inlined_call_operand.vmem [shape: bf16[128,384], index: 3, kind: input, shape index: {}]   ;;  %s912_s4 = inlined_call_operand.vmem [shape: f32[1,384], index: 4, kind: input, shape index: {}]   ;;  %s913_s5 = inlined_call_operand.vmem [shape: bf16[32,384], index: 5, kind: output, shape index: {}]  }
   0x1 LB: > { %s620_s19 = sadd.s32 4294967295, %s752_s18   ;;  %p624_p0 = scmp.ge.s32.totalorder %s752_s18, 1  ;;  %s752_s18 = sphi %s787_s18, %s15_s18  }
   0x2   : > { %p188_p1 = scmp.lt.s32.totalorder %s752_s18, 3 }
   0x4   : > { %p189_p2 = pnand %p624_p0, %p188_p1 }
   0x5   : > { %s625_s20 = sshll.u32 (!%p189_p2), %s620_s19, 1 }
   0x6   : > { %192 = sbr.rel (%p189_p2) target bundleno = 533 (0x215), region = 40  ;;  %p218_p3 = scmp.lt.s32.totalorder (!%p189_p2), %s625_s20, 3 }
   0xb   : > { %s915_s20 = smov (!%p218_p3, %s625_s20), 3  ;;  %v710_v3 = vld [vmem:[%s911_s3 + $0xac] ss:$12 sps:$4 sm:$0xff]   ;;  %v712_v4 = vld [vmem:[%s911_s3 + $0xa8] ss:$12 sps:$4 sm:$0xff]   ;;  %v754_v5 = vmov 0.0   ;;  %v311_v54 = vlaneseq }
   0xc   : > { %s626_s21 = sshll.u32 %s915_s20, 2  ;;  %678 = vmatprep.subr.bf16.mxu1 %v754_v5  ;;  %v713_v6 = vld [vmem:[%s911_s3 + $0xb0] ss:$12 sps:$4 sm:$0xff]   ;;  %454 = vmatprep.subr.bf16.mxu0 %v710_v3  ;;  %v714_v15 = vld [vmem:[%s911_s3 + $0x94] ss:$12 sps:$4 sm:$0xff]   ;;  %v755_v28 = vmov 0  }
   0xd   : > { %s221_s24 = scalar_lea.vmem %s908_s0, %s626_s21  ;;  %455 = vmatpush1.bf16.msra.mxu0 %v712_v4  ;;  %679 = vmatpush3.bf16.msra.mxu1 %v713_v6  ;;  %v716_v16 = vld [vmem:[%s911_s3 + $0x90] ss:$12 sps:$4 sm:$0xff]   ;;  %v717_v17 = vld [vmem:[%s911_s3 + $0x98] ss:$12 sps:$4 sm:$0xff]   ;;  %v721_v20 = vld [vmem:[%s911_s3 + $0x80] ss:$12 sps:$4 sm:$0xff]  }
   0xe   : > { %v666_v0 = vld [vmem:[%s221_s24] sm:$0xff]   ;;  %680 = vmatprep.subr.bf16.mxu1 %v754_v5  ;;  %456 = vmatprep.subr.bf16.mxu0 %v714_v15  ;;  %v718_v18 = vld [vmem:[%s911_s3 + $0x7c] ss:$12 sps:$4 sm:$0xff]   ;;  %v726_v24 = vld [vmem:[%s911_s3 + $0x4c] ss:$12 sps:$4 sm:$0xff]   ;;  %vm756_vm0 = vmmov 0  }
   0xf   : > { %v667_v1 = vunpack.c.l.bf16 %v666_v0  ;;  %v668_v2 = vunpack.c.h.bf16 %v666_v0  ;;  %v720_v19 = vld [vmem:[%s911_s3 + $0x78] ss:$12 sps:$4 sm:$0xff]   ;;  %v724_v22 = vld [vmem:[%s911_s3 + $0x60] ss:$12 sps:$4 sm:$0xff]   ;;  %v725_v23 = vld [vmem:[%s911_s3 + $0x68] ss:$12 sps:$4 sm:$0xff]   ;;  %486 = vmatprep.mubr.bf16.mxu0 %v755_v28  ;;  %694 = vmatprep.mubr.msk.bf16.mxu1 %vm756_vm0, %v754_v5 }
  0x10   : > { %v722_v21 = vld [vmem:[%s911_s3 + $0x64] ss:$12 sps:$4 sm:$0xff]   ;;  %v728_v25 = vld [vmem:[%s911_s3 + $0x48] ss:$12 sps:$4 sm:$0xff]   ;;  %v737_v33 = vld [vmem:[%s911_s3 + $0x20] ss:$12 sps:$4 sm:$0xff]  }
  0x11   : > { %235 = vadd.xlane.f32.xlu0 %v667_v1  ;;  %457 = vmatpush1.bf16.msra.mxu0 %v716_v16  ;;  %v729_v26 = vld [vmem:[%s911_s3 + $0x50] ss:$12 sps:$4 sm:$0xff]   ;;  %v730_v27 = vld [vmem:[%s911_s3 + $0x34] ss:$12 sps:$4 sm:$0xff]   ;;  %v733_v30 = vld [vmem:[%s911_s3 + $0x38] ss:$12 sps:$4 sm:$0xff]  }
  0x12   : > { %681 = vmatpush3.bf16.msra.mxu1 %v717_v17  ;;  %458 = vmatprep.subr.bf16.mxu0 %v718_v18  ;;  %v732_v29 = vld [vmem:[%s911_s3 + $0x30] ss:$12 sps:$4 sm:$0xff]   ;;  %v736_v32 = vld [vmem:[%s911_s3 + $0x18] ss:$12 sps:$4 sm:$0xff]   ;;  %v740_v35 = vld [vmem:[%s911_s3] ss:$12 sps:$4 sm:$0xff]  }
  0x13   : > { %682 = vmatprep.subr.bf16.mxu1 %v754_v5  ;;  %v734_v31 = vld [vmem:[%s911_s3 + $0x1c] ss:$12 sps:$4 sm:$0xff]   ;;  %v738_v34 = vld [vmem:[%s911_s3 + $0x4] ss:$12 sps:$4 sm:$0xff]   ;;  %v629_v45 = vld [vmem:[%s909_s1] ss:$0 sm:$0xff] }
  0x14   : > { %v741_v36 = vld [vmem:[%s911_s3 + $0x8] ss:$12 sps:$4 sm:$0xff]   ;;  %v630_v49 = vld [vmem:[%s910_s2] ss:$0 sm:$0xff]  ;;  %v312_v55 = vshrl.u32 %v311_v54, 7  ;;  %s698_s8 = smul.u32 12, %s915_s20 }
  0x15   : > { %237 = vadd.xlane.f32.xlu0 %v668_v2  ;;  %459 = vmatpush1.bf16.msra.mxu0 %v720_v19  ;;  %v309_v57 = vld [vmem:[%s912_s4] sm:$0x7] }
  0x16   : > { %683 = vmatpush3.bf16.msra.mxu1 %v721_v20  ;;  %460 = vmatprep.subr.bf16.mxu0 %v722_v21  ;;  %v321_v56 = vsub.s32 2, %v312_v55  ;;  %v313_v58 = vsub.s32 0, %v312_v55  ;;  %v317_v59 = vsub.s32 1, %v312_v55  ;;  %s228_s11 = scalar_lea.vmem %s913_s5, %s698_s8 }
  0x17   : > { %684 = vmatprep.subr.bf16.mxu1 %v754_v5 }
  0x18   : > { %v322_v60 = vrot.slane %v309_v57, %v321_v56  ;;  %v314_v61 = vrot.slane %v309_v57, %v313_v58  ;;  %v318_v62 = vrot.slane %v309_v57, %v317_v59 }
  0x19   : > { %461 = vmatpush1.bf16.msra.mxu0 %v724_v22 }
  0x1a   : > { %685 = vmatpush3.bf16.msra.mxu1 %v725_v23  ;;  %462 = vmatprep.subr.bf16.mxu0 %v726_v24 }
  0x1b   : > { %686 = vmatprep.subr.bf16.mxu1 %v754_v5 }
  0x1d   : > { %463 = vmatpush1.bf16.msra.mxu0 %v728_v25 }
  0x1e   : > { %687 = vmatpush3.bf16.msra.mxu1 %v729_v26  ;;  %464 = vmatprep.subr.bf16.mxu0 %v730_v27 }
  0x1f   : > { %688 = vmatprep.subr.bf16.mxu1 %v754_v5 }
  0x21   : > { %465 = vmatpush1.bf16.msra.mxu0 %v732_v29 }
  0x22   : > { %689 = vmatpush3.bf16.msra.mxu1 %v733_v30  ;;  %466 = vmatprep.subr.bf16.mxu0 %v734_v31 }
  0x23   : > { %690 = vmatprep.subr.bf16.mxu1 %v754_v5 }
  0x25   : > { %467 = vmatpush1.bf16.msra.mxu0 %v736_v32 }
  0x26   : > { %691 = vmatpush3.bf16.msra.mxu1 %v737_v33  ;;  %468 = vmatprep.subr.bf16.mxu0 %v738_v34 }
  0x27   : > { %692 = vmatprep.subr.bf16.mxu1 %v754_v5 }
  0x29   : > { %469 = vmatpush1.bf16.msra.mxu0 %v740_v35 }
  0x2a   : > { %693 = vmatpush3.bf16.msra.mxu1 %v741_v36 }
  0x9a   : > { %v236_v7 = vpop.xlane.xlu0 %235 }
  0x9b   : > { %v240_v8 = vmul.f32 0.0078125, %v236_v7 }
  0x9d   : > { %v812_v9 = vsub.f32 %v667_v1, %v240_v8 }
  0x9e   : > { %v238_v10 = vpop.xlane.xlu0 %237 }
  0x9f   : > { %v241_v11 = vmul.f32 0.0078125, %v238_v10  ;;  %v244_v12 = vmul.f32 %v812_v9, %v812_v9 }
  0xa1   : > { %v816_v13 = vsub.f32 %v668_v2, %v241_v11  ;;  %246 = vadd.xlane.f32.xlu1 %v244_v12 }
  0xa3   : > { %v245_v14 = vmul.f32 %v816_v13, %v816_v13 }
  0xa5   : > { %248 = vadd.xlane.f32.xlu1 %v245_v14 }
 0x12a   : > { %v247_v37 = vpop.xlane.xlu1 %246 }
 0x12b   : > { %v250_v38 = vmul.f32 0.0078125, %v247_v37 }
 0x12d   : > { %v252_v39 = vadd.f32 1e-06, %v250_v38 }
 0x12e   : > { %v249_v40 = vpop.xlane.xlu1 %248 }
 0x12f   : > { %742 = vrsqrt.f32 %v252_v39  ;;  %v251_v41 = vmul.f32 0.0078125, %v249_v40 }
 0x131   : > { %v253_v42 = vadd.f32 1e-06, %v251_v41 }
 0x133   : > { %744 = vrsqrt.f32 %v253_v42 }
 0x13c   : > { %v743_v43 = vpop.eup %742 }
 0x13d   : > { %v256_v44 = vmul.f32 %v743_v43, %v812_v9 }
 0x13f   : > { %v265_v48 = vmul.f32 %v629_v45, %v256_v44 }
 0x140   : > { %v745_v46 = vpop.eup %744 }
 0x141   : > { %v257_v47 = vmul.f32 %v745_v46, %v816_v13  ;;  %v274_v51 = vadd.f32 %v630_v49, %v265_v48 }
 0x143   : > { %v266_v50 = vmul.f32 %v629_v45, %v257_v47 }
 0x145   : > { %v275_v52 = vadd.f32 %v630_v49, %v266_v50 }
 0x147   : > { %v276_v53 = vpack.c.bf16 %v275_v52, %v274_v51 }
 0x149   : > { %487 = vmatmul.mubr.bf16.vlgmr.msra.gmra.mxu0 %v276_v53  ;;  %695 = vmatmul.mubr.bf16.vlgmr.msra.gmra.mxu1 %v276_v53 }
 0x209   : > { %v488_v63 = vpop.f32.mrf.mxu0  ;;  %v531_v0 = vpop.f32.mrf.mxu1 }
 0x20a   : > { %v532_v1 = vadd.f32 %v531_v0, %v322_v60  ;;  %v489_v4 = vadd.f32 %v488_v63, %v314_v61 }
 0x20b   : > { %v490_v2 = vpop.f32.mrf.mxu0  ;;  %v696_v3 = vpop.f32.mrf.mxu1 }
 0x20c   : > { %v662_v5 = vpack.c.bf16 %v532_v1, %v532_v1  ;;  %v491_v6 = vadd.f32 %v490_v2, %v318_v62 }
 0x20d   : > { %v492_v7 = vpop.f32.mrf.mxu0  ;;  %v534_v8 = vpop.f32.mrf.mxu1 }
 0x20e   : > { %559 = vst [vmem:[%s228_s11 + $0x8] sm:$0xf] %v662_v5  ;;  %v661_v9 = vpack.c.bf16 %v491_v6, %v489_v4  ;;  %v535_v10 = vadd.f32 %v534_v8, %v322_v60  ;;  %v493_v13 = vadd.f32 %v492_v7, %v314_v61 }
 0x20f   : > { %v494_v11 = vpop.f32.mrf.mxu0  ;;  %v697_v12 = vpop.f32.mrf.mxu1 }
 0x210   : > { %558 = vst [vmem:[%s228_s11] sm:$0xff] %v661_v9  ;;  %v664_v14 = vpack.c.bf16 %v535_v10, %v535_v10  ;;  %v495_v15 = vadd.f32 %v494_v11, %v318_v62 }
 0x212   : > { %561 = vst [vmem:[%s228_s11 + $0x14] sm:$0xf] %v664_v14  ;;  %v663_v16 = vpack.c.bf16 %v495_v15, %v493_v13 }
 0x214   : > { %560 = vst [vmem:[%s228_s11 + $0xc] sm:$0xff] %v663_v16 }
 0x215 PF: > { %s15_s18 = sadd.s32 1, %s752_s18  }
 0x216   : > { %p12_p4 = scmp.ge.s32.totalorder %s15_s18, 4  }
 0x218   :  { %14 = sbr.rel (!%p12_p4) target bundleno = 1 (0x1), region = 70 }

// kernel: transformer_forward.31
= control target key start
LH: loop header
LB: loop body
LE: loop exit
PB: predicated region body
PF: predicated region fallthrough
CT: control target
= control target key end

     0   :  { %s547_s15 = smov 0   ;;  %s599_s0 = inlined_call_operand.vmem [shape: bf16[32,128], index: 0, kind: input, shape index: {}]   ;;  %s600_s1 = inlined_call_operand.vmem [shape: bf16[128,128], index: 1, kind: input, shape index: {}]   ;;  %s601_s2 = inlined_call_operand.vmem [shape: f32[1,128], index: 2, kind: input, shape index: {}]   ;;  %s602_s3 = inlined_call_operand.vmem [shape: bf16[32,128], index: 3, kind: input, shape index: {}]   ;;  %s603_s4 = inlined_call_operand.vmem [shape: bf16[32,128], index: 4, kind: output, shape index: {}]  }
   0x1 LB: > { %s428_s16 = sadd.s32 4294967295, %s518_s15   ;;  %p432_p0 = scmp.ge.s32.totalorder %s518_s15, 1  ;;  %s518_s15 = sphi %s547_s15, %s14_s15  }
   0x2   : > { %p174_p1 = scmp.lt.s32.totalorder %s518_s15, 3 }
   0x4   : > { %p175_p2 = pnand %p432_p0, %p174_p1 }
   0x5   : > { %s433_s21 = sshll.u32 (!%p175_p2), %s428_s16, 1 }
   0x6   : > { %178 = sbr.rel (%p175_p2) target bundleno = 248 (0xf8), region = 36  ;;  %p206_p3 = scmp.lt.s32.totalorder (!%p175_p2), %s433_s21, 3 }
   0xb   : > { %v503_v0 = vld [vmem:[%s600_s1 + $0x38] sm:$0xff]   ;;  %v520_v1 = vmov 0.0   ;;  %v504_v2 = vld [vmem:[%s600_s1 + $0x30] sm:$0xff]   ;;  %vm521_vm0 = vmmov 0   ;;  %s605_s21 = smov (!%p206_p3, %s433_s21), 3  ;;  %v505_v3 = vld [vmem:[%s600_s1 + $0x28] sm:$0xff]  }
   0xc   : > { %473 = vmatprep.subr.bf16.mxu0 %v520_v1  ;;  %489 = vmatprep.mubr.msk.bf16.mxu0 %vm521_vm0, %v520_v1  ;;  %s564_s24 = sshll.u32 %s605_s21, 2  ;;  %v506_v4 = vld [vmem:[%s600_s1 + $0x20] sm:$0xff]   ;;  %v507_v5 = vld [vmem:[%s600_s1 + $0x18] sm:$0xff]   ;;  %v508_v6 = vld [vmem:[%s600_s1 + $0x10] sm:$0xff]  }
   0xd   : > { %474 = vmatpush3.bf16.msra.mxu0 %v503_v0  ;;  %s209_s27 = scalar_lea.vmem %s599_s0, %s564_s24  ;;  %v509_v7 = vld [vmem:[%s600_s1 + $0x8] sm:$0xff]   ;;  %v510_v8 = vld [vmem:[%s600_s1] sm:$0xff]   ;;  %s215_s14 = scalar_lea.vmem %s602_s3, %s564_s24 }
   0xe   : > { %475 = vmatprep.subr.bf16.mxu0 %v520_v1  ;;  %v511_v9 = vld [vmem:[%s209_s27] sm:$0xff]   ;;  %s221_s20 = scalar_lea.vmem %s603_s4, %s564_s24 }
   0xf   : > { %v439_v10 = vld [vmem:[%s601_s2] ss:$0 sm:$0xff] }
  0x10   : > { %v456_v12 = vld [vmem:[%s215_s14] sm:$0xff]  }
  0x11   : > { %476 = vmatpush3.bf16.msra.mxu0 %v504_v2  ;;  %v457_v15 = vunpack.c.l.bf16 %v456_v12  ;;  %v458_v16 = vunpack.c.h.bf16 %v456_v12 }
  0x12   : > { %477 = vmatprep.subr.bf16.mxu0 %v520_v1 }
  0x15   : > { %478 = vmatpush3.bf16.msra.mxu0 %v505_v3 }
  0x16   : > { %479 = vmatprep.subr.bf16.mxu0 %v520_v1 }
  0x19   : > { %480 = vmatpush3.bf16.msra.mxu0 %v506_v4 }
  0x1a   : > { %481 = vmatprep.subr.bf16.mxu0 %v520_v1 }
  0x1d   : > { %482 = vmatpush3.bf16.msra.mxu0 %v507_v5 }
  0x1e   : > { %483 = vmatprep.subr.bf16.mxu0 %v520_v1 }
  0x21   : > { %484 = vmatpush3.bf16.msra.mxu0 %v508_v6 }
  0x22   : > { %485 = vmatprep.subr.bf16.mxu0 %v520_v1 }
  0x25   : > { %486 = vmatpush3.bf16.msra.mxu0 %v509_v7 }
  0x26   : > { %487 = vmatprep.subr.bf16.mxu0 %v520_v1 }
  0x29   : > { %488 = vmatpush3.bf16.msra.mxu0 %v510_v8 }
  0x2c   : > { %490 = vmatmul.mubr.bf16.vlgmr.msra.gmra.mxu0 %v511_v9 }
  0xec   : > { %v337_v11 = vpop.f32.mrf.mxu0 }
  0xed   : > { %v338_v14 = vadd.f32 %v439_v10, %v337_v11 }
  0xee   : > { %v491_v13 = vpop.f32.mrf.mxu0 }
  0xef   : > { %v348_v20 = vadd.f32 %v457_v15, %v338_v14 }
  0xf0   : > { %v340_v17 = vpop.f32.mrf.mxu0 }
  0xf1   : > { %v341_v18 = vadd.f32 %v439_v10, %v340_v17 }
  0xf2   : > { %v492_v19 = vpop.f32.mrf.mxu0 }
  0xf3   : > { %v349_v21 = vadd.f32 %v458_v16, %v341_v18 }
  0xf5   : > { %v462_v22 = vpack.c.bf16 %v349_v21, %v348_v20 }
  0xf7   : > { %463 = vst [vmem:[%s221_s20] sm:$0xff] %v462_v22  }
  0xf8 PF: > { %s14_s15 = sadd.s32 1, %s518_s15  }
  0xf9   : > { %p11_p4 = scmp.ge.s32.totalorder %s14_s15, 4  }
  0xfb   :  { %13 = sbr.rel (!%p11_p4) target bundleno = 1 (0x1), region = 69 }

// kernel: transformer_forward.30
= control target key start
LH: loop header
LB: loop body
LE: loop exit
PB: predicated region body
PF: predicated region fallthrough
CT: control target
= control target key end

     0   :  { %s1631_s12 = smov 0   ;;  %s1633_s13 = smov 0   ;;  %s1864_s0 = inlined_call_operand.vmem [shape: bf16[2,16,384], index: 0, kind: input, shape index: {}, may-alias: {0,1,2}]   ;;  %s1865_s1 = inlined_call_operand.vmem [shape: bf16[2,16,384], index: 1, kind: input, shape index: {}, may-alias: {0,1,2}]   ;;  %s1866_s2 = inlined_call_operand.vmem [shape: bf16[2,16,384], index: 2, kind: input, shape index: {}, may-alias: {0,1,2}]   ;;  %s1867_s3 = inlined_call_operand.vmem [shape: bf16[2,16,128], index: 3, kind: output, shape index: {}]  }
   0x1   :  { %s1635_s14 = smov 0   ;;  %s1637_s15 = smov 0  }
   0x2   :  { %s1639_s16 = smov 0  }
   0x3 LB: > { %s39_s17 = sadd.s32 1, %s1599_s15  ;;  %p57_p1 = scmp.ne.s32.totalorder %s1591_s13, %s1587_s12  ;;  %s1603_s16 = sphi %s1639_s16, %s13_s16   ;;  %s1599_s15 = sphi %s1637_s15, %s1872_s15   ;;  %s1595_s14 = sphi %s1635_s14, %s1871_s14   ;;  %s1591_s13 = sphi %s1633_s13, %s1870_s13   ;;  %s1587_s12 = sphi %s1631_s12, %s1869_s12  }
   0x4   : > { %p41_p0 = scmp.ge.s32.totalorder %s39_s17, 2  ;;  %p58_p2 = scmp.eq.s32.totalorder %s1603_s16, 0 }
   0x5   : > { %s50_s20 = sadd.s32 1, %s1591_s13  ;;  %p1347_p5 = scmp.ge.s32.totalorder %s1603_s16, 2 }
   0x6   : > { %s1874_s17 = smov (%p41_p0, %s39_s17), 0  ;;  %p1662_p3 = por %p58_p2, %p57_p1 }
   0x7   : > { %s43_s19 = ssub.s32 %s1599_s15, %s1874_s17  ;;  %177 = sbr.rel (%p1347_p5) target bundleno = 30 (0x1e), region = 16 }
   0x8   : > { %p48_p4 = scmp.eq.s32.totalorder %s43_s19, 0 }
   0xa   : > { %s1670_s21 = scalar_select %p48_p4, %s1591_s13, %s50_s20  }
   0xc   : > { %180 = sbr.rel (!%p1662_p3) target bundleno = 18 (0x12), region = 20  ;;  %s182_s22 = sand.u32 (%p1662_p3), 1, %s1591_s13  }
   0xd   : > { %s1451_s23 = smul.u32 (%p1662_p3), 24, %s1599_s15  ;;  %s1348_s24 = sshll.u32 (%p1662_p3), %s182_s22, 3 }
   0xe   : > { %s184_s28 = scalar_lea.vmem (%p1662_p3), [#allocation5], %s1348_s24 }
   0xf   : > { %s191_s27 = scalar_lea.vmem (%p1662_p3), %s1864_s0, %s1451_s23 }
  0x10   : > { %v208_v0 = vld [vmem:[%s191_s27] sm:$0xf] (%p1662_p3)  ;;  %v210_v1 = vld [vmem:[%s191_s27 + $0xc] sm:$0xf] (%p1662_p3) }
  0x11   : > { %209 = vst [vmem:[%s184_s28] sm:$0xf] %v208_v0  ;;  %211 = vst [vmem:[%s184_s28 + $0x4] sm:$0xf] %v210_v1 }
  0x12 PF: > { %239 = sbr.rel (!%p1662_p3) target bundleno = 24 (0x18), region = 61  ;;  %s241_s29 = sand.u32 (%p1662_p3), 1, %s1591_s13  }
  0x13   : > { %s1351_s30 = smul.u32 (%p1662_p3), 24, %s1599_s15  ;;  %s1350_s4 = sshll.u32 (%p1662_p3), %s241_s29, 3 }
  0x14   : > { %s243_s8 = scalar_lea.vmem (%p1662_p3), [#allocation6], %s1350_s4 }
  0x15   : > { %s1242_s7 = scalar_lea.vmem (%p1662_p3), %s1865_s1, %s1351_s30 }
  0x16   : > { %v1352_v2 = vld [vmem:[%s1242_s7 + $0x4] sm:$0xf] (%p1662_p3)  ;;  %v1353_v3 = vld [vmem:[%s1242_s7 + $0x10] sm:$0xf] (%p1662_p3) }
  0x17   : > { %269 = vst [vmem:[%s243_s8] sm:$0xf] %v1352_v2  ;;  %271 = vst [vmem:[%s243_s8 + $0x4] sm:$0xf] %v1353_v3 }
  0x18 PF: > { %299 = sbr.rel (!%p1662_p3) target bundleno = 30 (0x1e), region = 102  ;;  %s301_s9 = sand.u32 (%p1662_p3), 1, %s1591_s13  }
  0x19   : > { %s1355_s10 = smul.u32 (%p1662_p3), 24, %s1599_s15  ;;  %s1354_s11 = sshll.u32 (%p1662_p3), %s301_s9, 3 }
  0x1a   : > { %s303_s23 = scalar_lea.vmem (%p1662_p3), [#allocation7], %s1354_s11 }
  0x1b   : > { %s1251_s22 = scalar_lea.vmem (%p1662_p3), %s1866_s2, %s1355_s10 }
  0x1c   : > { %v1356_v4 = vld [vmem:[%s1251_s22 + $0x8] sm:$0xf] (%p1662_p3)  ;;  %v1357_v5 = vld [vmem:[%s1251_s22 + $0x14] sm:$0xf] (%p1662_p3) }
  0x1d   : > { %329 = vst [vmem:[%s303_s23] sm:$0xf] %v1356_v4  ;;  %331 = vst [vmem:[%s303_s23 + $0x4] sm:$0xf] %v1357_v5 }
  0x1e PF: > { %p1358_p6 = scmp.ge.s32.totalorder %s1603_s16, 1  ;;  %p358_p7 = scmp.lt.s32.totalorder %s1603_s16, 3 }
  0x20   : > { %p359_p8 = pnand %p1358_p6, %p358_p7 }
  0x21   : > { %s365_s18 = sand.u32 (!%p359_p8), 1, %s1587_s12   ;;  %s1608_s26 = smov (!%p359_p8), 96  }
  0x22   : > { %362 = sbr.rel (%p359_p8) target bundleno = 1368 (0x558), region = 143  ;;  %s1698_s24 = sshll.u32 (!%p359_p8), %s365_s18, 3 }
  0x23   : > { %s374_s12 = scalar_lea.vmem (!%p359_p8), [#allocation6], %s1698_s24  ;;  %s367_s25 = scalar_lea.vmem (!%p359_p8), [#allocation5], %s1698_s24 }
  0x24   : > { %s381_s27 = scalar_lea.vmem (!%p359_p8), [#allocation7], %s1698_s24  ;;  %s1609_s28 = smov (!%p359_p8), 64  }
  0x25   : > { %s1610_s29 = smov (!%p359_p8), 32   ;;  %p423_p9 = scmp.lt.s32.totalorder (!%p359_p8), %s1595_s14, 1 }
  0x27   : > { %vm457_vm0 = vcmask 261120   ;;  %v1605_v6 = vmov 0.0   ;;  %vm1606_vm1 = vmmov 0   ;;  %v1515_v7 = vld [vmem:[%s374_s12] sm:$0xff]   ;;  %v466_v8 = vld [vmem:[%s367_s25] sm:$0xf] }
  0x28   : > { %1403 = vmatprep.subr.bf16.mxu0 %v1605_v6  ;;  %458 = vst.msk [vmem:[#allocation4] sm:$0xff] %vm457_vm0, %v1605_v6  ;;  %459 = vst.msk [vmem:[#allocation4 + $0x8] sm:$0xff] %vm457_vm0, %v1605_v6  ;;  %1405 = vmatprep.mubr.msk.bf16.mxu0 %vm1606_vm1, %v1605_v6  ;;  %v467_v9 = vld [vmem:[%s367_s25 + $0x4] sm:$0xf]  ;;  %v489_v10 = vsel %vm457_vm0, %v1515_v7, 0  ;;  %v1607_v14 = vmov 0  }
  0x29   : > { %460 = vst.msk [vmem:[#allocation4 + $0x10] sm:$0xff] %vm457_vm0, %v1605_v6  ;;  %461 = vst.msk [vmem:[#allocation4 + $0x18] sm:$0xff] %vm457_vm0, %v1605_v6  ;;  %1409 = vmatprep.subr.bf16.mxu1 %v1605_v6  ;;  %1411 = vmatprep.mubr.msk.bf16.mxu1 %vm1606_vm1, %v1605_v6  ;;  %v472_v11 = vmul.bf16 1043676725, %v466_v8  ;;  %v473_v12 = vmul.bf16 1043676725, %v467_v9 }
  0x2a   : > { %462 = vst.msk [vmem:[#allocation4 + $0x20] sm:$0xff] %vm457_vm0, %v1605_v6  ;;  %463 = vst.msk [vmem:[#allocation4 + $0x28] sm:$0xff] %vm457_vm0, %v1605_v6  ;;  %1404 = vmatpush3.bf16.xpose.msra.mxu0 %v489_v10  ;;  %1498 = vset.pattern.permute.xlu1 %v1607_v14  ;;  %vm536_vm2 = vcmask 130048   ;;  %v1732_v23 = vld [vmem:[%s381_s27] sm:$0xff]   ;;  %s1876_s14 = smov (!%p423_p9, %s1595_s14), 1  ;;  %vm1175_vm3 = vcmask 523264  }
  0x2b   : > { %464 = vst.msk [vmem:[#allocation4 + $0x30] sm:$0xff] %vm457_vm0, %v1605_v6  ;;  %465 = vst.msk [vmem:[#allocation4 + $0x38] sm:$0xff] %vm457_vm0, %v1605_v6  ;;  %1421 = vmatprep.subr.bf16.mxu0 %v1605_v6  ;;  %v1364_v13 = vcombine.low %v472_v11, %v473_v12  ;;  %1499 = vset.pattern.permute.xlu0 %v1607_v14  ;;  %s1379_s30 = sshll.u32 %s1876_s14, 3  ;;  %vm1178_vm4 = vcmask 785408  }
  0x2c   : > { %1410 = vmatpush3.bf16.msra.mxu1 %v1732_v23  ;;  %s433_s6 = scalar_lea.vmem %s1867_s3, %s1379_s30 }
  0x2d   : > { %1415 = vmatprep.subr.bf16.mxu1 %v1605_v6 }
  0x2f   : > { %v630_v47 = vld [vmem:[#allocation4] sm:$0xff]  ;;  %v631_v51 = vld [vmem:[#allocation4 + $0x8] sm:$0xff] }
  0x31   : > { %1406 = vmatmul.mubr.msk.bf16.vlgmr.msra.gmra.mxu0 %vm457_vm0, %v1364_v13 }
  0x32   : > { %1423 = vmatprep.mubr.msk.bf16.mxu0 %vm1606_vm1, %v1605_v6 }
  0xf1   : > { %v525_v15 = vpop.f32.mrf.mxu0 }
  0xf2   : > { %v537_v16 = vsel %vm536_vm2, %v525_v15, -inf }
  0xf3   : > { %538 = vmax.xlane.f32.xlu0 %v537_v16  ;;  %v1407_v17 = vpop.f32.mrf.mxu0 }
  0xf5   : > { %v528_v18 = vpop.f32.mrf.mxu0 }
  0xf6   : > { %v540_v19 = vsel %vm536_vm2, %v528_v18, -inf }
  0xf7   : > { %541 = vmax.xlane.f32.xlu0 %v540_v19  ;;  %v1408_v20 = vpop.f32.mrf.mxu0 }
 0x10d   : > { %642 = vrot.lane.b32.xlu0 %v1515_v7, %s1608_s26 }
 0x17c   : > { %v539_v21 = vpop.xlane.xlu0 %538 }
 0x17d   : > { %553 = vperm.xlu1 %1498, %v539_v21   ;;  %v545_v42 = vsub.f32 -inf, %v539_v21 }
 0x17f   : > { %v547_v43 = vmul.f32 1.442695, %v545_v42 }
 0x180   : > { %v542_v22 = vpop.xlane.xlu0 %541 }
 0x181   : > { %558 = vperm.xlu1 %1498, %v542_v22   ;;  %v546_v44 = vsub.f32 -inf, %v542_v22 }
 0x183   : > { %v549_v45 = vmul.f32 1.442695, %v546_v44 }
 0x184   : > { %v643_v31 = vpop.permute.xlu0 %642 }
 0x185   : > { %640 = vrot.lane.b32.xlu1 %v1364_v13, %s1608_s26  ;;  %v648_v34 = vsel %vm457_vm0, %v643_v31, 0 }
 0x189   : > { %800 = vrot.lane.b32.xlu1 %v1515_v7, %s1609_s28 }
 0x18d   : > { %798 = vrot.lane.b32.xlu1 %v1364_v13, %s1609_s28 }
 0x191   : > { %958 = vrot.lane.b32.xlu1 %v1515_v7, %s1610_s29 }
 0x195   : > { %956 = vrot.lane.b32.xlu1 %v1364_v13, %s1610_s29 }
 0x1f8   : > { %v554_v24 = vpop.permute.xlu1 %553 }
 0x1f9   : > { %v561_v25 = vsub.f32 %v525_v15, %v554_v24 }
 0x1fb   : > { %v563_v26 = vmul.f32 1.442695, %v561_v25 }
 0x1fc   : > { %v559_v27 = vpop.permute.xlu1 %558 }
 0x1fd   : > { %v562_v28 = vsub.f32 %v528_v18, %v559_v27  ;;  %1517 = vpow2.f32 %v563_v26 }
 0x1ff   : > { %v565_v29 = vmul.f32 1.442695, %v562_v28 }
 0x200   : > { %v641_v30 = vpop.permute.xlu1 %640 }
 0x201   : > { %1519 = vpow2.f32 %v565_v29 }
 0x202   : > { %1521 = vpow2.f32 %v547_v43 }
 0x203   : > { %1523 = vpow2.f32 %v549_v45 }
 0x204   : > { %v801_v36 = vpop.permute.xlu1 %800 }
 0x205   : > { %v806_v38 = vsel %vm457_vm0, %v801_v36, 0 }
 0x208   : > { %v799_v37 = vpop.permute.xlu1 %798 }
 0x20a   : > { %v1741_v32 = vpop.eup %1517 }
 0x20b   : > { %v569_v20 = vsel %vm536_vm2, %v1741_v32, 0.0 }
 0x20c   : > { %v959_v39 = vpop.permute.xlu1 %958 }
 0x20d   : > { %v964_v40 = vsel %vm457_vm0, %v959_v39, 0 }
 0x20e   : > { %v1743_v33 = vpop.eup %1519 }
 0x20f   : > { %v579_v35 = vpack.c.bf16 %v1743_v33, %v1741_v32  ;;  %v1762_v46 = vpop.eup %1521  ;;  %v572_v19 = vsel %vm536_vm2, %v1743_v33, 0.0 }
 0x210   : > { %v957_v41 = vpop.permute.xlu1 %956  ;;  %v632_v48 = vmul.f32 %v1762_v46, %v630_v47  ;;  %v1765_v49 = vpop.eup %1523 }
 0x211   : > { %1412 = vmatmul.mubr.msk.bf16.vlgmr.msra.gmra.mxu1 %vm536_vm2, %v579_v35  ;;  %v633_v54 = vmul.f32 %v1765_v49, %v631_v51 }
 0x212   : > { %1416 = vmatpush3.bf16.xpose.msra.mxu1 %v648_v34  ;;  %1417 = vmatprep.mubr.msk.bf16.mxu1 %vm1606_vm1, %v1605_v6 }
 0x213   : > { %1427 = vmatprep.subr.bf16.mxu1 %v1605_v6 }
 0x219   : > { %1418 = vmatmul.mubr.msk.bf16.vlgmr.msra.gmra.mxu1 %vm457_vm0, %v641_v30 }
 0x21a   : > { %1428 = vmatpush3.bf16.xpose.msra.mxu1 %v806_v38  ;;  %1429 = vmatprep.mubr.msk.bf16.mxu1 %vm1606_vm1, %v1605_v6 }
 0x21b   : > { %1439 = vmatprep.subr.bf16.mxu1 %v1605_v6 }
 0x221   : > { %1430 = vmatmul.mubr.msk.bf16.vlgmr.msra.gmra.mxu1 %vm457_vm0, %v799_v37 }
 0x222   : > { %1440 = vmatpush3.bf16.xpose.msra.mxu1 %v964_v40  ;;  %1441 = vmatprep.mubr.msk.bf16.mxu1 %vm1606_vm1, %v1605_v6 }
 0x229   : > { %1442 = vmatmul.mubr.msk.bf16.vlgmr.msra.gmra.mxu1 %vm457_vm0, %v957_v41 }
 0x2d1   : > { %v623_v50 = vpop.f32.mrf.mxu1 }
 0x2d2   : > { %v634_v52 = vadd.f32 %v632_v48, %v623_v50 }
 0x2d3   : > { %v1413_v53 = vpop.f32.mrf.mxu1 }
 0x2d4   : > { %636 = vst.msk [vmem:[#allocation4] sm:$0xff] %vm457_vm0, %v634_v52 }
 0x2d5   : > { %v626_v55 = vpop.f32.mrf.mxu1 }
 0x2d6   : > { %v635_v56 = vadd.f32 %v633_v54, %v626_v55 }
 0x2d7   : > { %v1414_v57 = vpop.f32.mrf.mxu1 }
 0x2d8   : > { %637 = vst.msk [vmem:[#allocation4 + $0x8] sm:$0xff] %vm457_vm0, %v635_v56 }
 0x2d9   : > { %v684_v58 = vpop.f32.mrf.mxu1 }
 0x2da   : > { %v697_v59 = vsel %vm536_vm2, %v684_v58, -inf }
 0x2db   : > { %698 = vmax.xlane.f32.xlu1 %v697_v59  ;;  %v1419_v60 = vpop.f32.mrf.mxu1 }
 0x2dd   : > { %v687_v61 = vpop.f32.mrf.mxu1 }
 0x2de   : > { %v700_v62 = vsel %vm536_vm2, %v687_v61, -inf }
 0x2df   : > { %701 = vmax.xlane.f32.xlu0 %v700_v62  ;;  %v1420_v63 = vpop.f32.mrf.mxu1 }
 0x2e1   : > { %v842_v0 = vpop.f32.mrf.mxu1 }
 0x2e2   : > { %v855_v1 = vsel %vm536_vm2, %v842_v0, -inf }
 0x2e3   : > { %856 = vmax.xlane.f32.xlu0 %v855_v1  ;;  %v1431_v2 = vpop.f32.mrf.mxu1 }
 0x2e5   : > { %v845_v3 = vpop.f32.mrf.mxu1 }
 0x2e6   : > { %v858_v4 = vsel %vm536_vm2, %v845_v3, -inf }
 0x2e7   : > { %859 = vmax.xlane.f32.xlu1 %v858_v4  ;;  %v1432_v5 = vpop.f32.mrf.mxu1 }
 0x2e9   : > { %v1000_v7 = vpop.f32.mrf.mxu1 }
 0x2ea   : > { %v1013_v8 = vsel %vm536_vm2, %v1000_v7, -inf }
 0x2eb   : > { %1014 = vmax.xlane.f32.xlu0 %v1013_v8  ;;  %v1443_v9 = vpop.f32.mrf.mxu1 }
 0x2ed   : > { %v1003_v10 = vpop.f32.mrf.mxu1 }
 0x2ee   : > { %v1016_v11 = vsel %vm536_vm2, %v1003_v10, -inf }
 0x2ef   : > { %1017 = vmax.xlane.f32.xlu1 %v1016_v11  ;;  %v1444_v12 = vpop.f32.mrf.mxu1 }
 0x364   : > { %v1776_v13 = vpop.xlane.xlu1 %698 }
 0x365   : > { %713 = vperm.xlu0 %1499, %v1776_v13   ;;  %v705_v59 = vsub.f32 -inf, %v1776_v13 }
 0x368   : > { %v1779_v14 = vpop.xlane.xlu0 %701 }
 0x369   : > { %718 = vperm.xlu1 %1498, %v1779_v14   ;;  %1056 = vrot.lane.b32.xlu0 %v1732_v23, %s1610_s29  ;;  %v706_v60 = vsub.f32 -inf, %v1779_v14 }
 0x36b   : > { %v709_v62 = vmul.f32 1.442695, %v706_v60 }
 0x36c   : > { %v1784_v15 = vpop.xlane.xlu0 %856 }
 0x36d   : > { %871 = vperm.xlu1 %1498, %v1784_v15   ;;  %v863_v63 = vsub.f32 -inf, %v1784_v15 }
 0x370   : > { %v1787_v16 = vpop.xlane.xlu1 %859 }
 0x371   : > { %876 = vperm.xlu1 %1498, %v1787_v16  }
 0x374   : > { %v1790_v17 = vpop.xlane.xlu0 %1014 }
 0x375   : > { %1029 = vperm.xlu1 %1498, %v1790_v17   ;;  %v1021_v2 = vsub.f32 -inf, %v1790_v17 }
 0x377   : > { %v1023_v5 = vmul.f32 1.442695, %v1021_v2 }
 0x378   : > { %v1793_v18 = vpop.xlane.xlu1 %1017 }
 0x379   : > { %1034 = vperm.xlu1 %1498, %v1793_v18  }
 0x37d   : > { %740 = vrot.lane.b32.xlu1 %v1732_v23, %s1608_s26 }
 0x381   : > { %898 = vrot.lane.b32.xlu1 %v1732_v23, %s1609_s28 }
 0x388   : > { %573 = vadd.xlane.f32.xlu0 %v572_v19 }
 0x3a5   : > { %570 = vadd.xlane.f32.xlu1 %v569_v20 }
 0x3e0   : > { %v714_v21 = vpop.permute.xlu0 %713 }
 0x3e1   : > { %v721_v22 = vsub.f32 %v684_v58, %v714_v21 }
 0x3e3   : > { %v723_v24 = vmul.f32 1.442695, %v721_v22  ;;  %v789_v22 = vld [vmem:[#allocation4 + $0x18] sm:$0xff] }
 0x3e4   : > { %v719_v25 = vpop.permute.xlu1 %718  ;;  %v1057_v54 = vpop.permute.xlu0 %1056 }
 0x3e5   : > { %1525 = vpow2.f32 %v723_v24  ;;  %v722_v26 = vsub.f32 %v687_v61, %v719_v25  ;;  %v707_v61 = vmul.f32 1.442695, %v705_v59 }
 0x3e7   : > { %v725_v27 = vmul.f32 1.442695, %v722_v26 }
 0x3e8   : > { %v872_v28 = vpop.permute.xlu1 %871 }
 0x3e9   : > { %1527 = vpow2.f32 %v725_v27  ;;  %v879_v29 = vsub.f32 %v842_v0, %v872_v28  ;;  %v864_v0 = vsub.f32 -inf, %v1787_v16  ;;  %v788_v16 = vld [vmem:[#allocation4 + $0x10] sm:$0xff] }
 0x3eb   : > { %v881_v30 = vmul.f32 1.442695, %v879_v29  ;;  %v867_v1 = vmul.f32 1.442695, %v864_v0  ;;  %v1105_v0 = vld [vmem:[#allocation4 + $0x38] sm:$0xff] }
 0x3ec   : > { %v877_v23 = vpop.permute.xlu1 %876 }
 0x3ed   : > { %1529 = vpow2.f32 %v881_v30  ;;  %v880_v31 = vsub.f32 %v845_v3, %v877_v23  ;;  %v1022_v3 = vsub.f32 -inf, %v1793_v18 }
 0x3ef   : > { %v883_v33 = vmul.f32 1.442695, %v880_v31  ;;  %v1025_v9 = vmul.f32 1.442695, %v1022_v3 }
 0x3f0   : > { %v1030_v34 = vpop.permute.xlu1 %1029 }
 0x3f1   : > { %1531 = vpow2.f32 %v883_v33  ;;  %v1037_v35 = vsub.f32 %v1000_v7, %v1030_v34  ;;  %v946_v33 = vld [vmem:[#allocation4 + $0x20] sm:$0xff] }
 0x3f2   : > { %v1526_v32 = vpop.eup %1525 }
 0x3f3   : > { %v1039_v36 = vmul.f32 1.442695, %v1037_v35  ;;  %v729_v37 = vsel %vm536_vm2, %v1526_v32, 0.0 }
 0x3f4   : > { %730 = vadd.xlane.f32.xlu0 %v729_v37  ;;  %v1035_v38 = vpop.permute.xlu1 %1034 }
 0x3f5   : > { %1533 = vpow2.f32 %v1039_v36  ;;  %v1038_v39 = vsub.f32 %v1003_v10, %v1035_v38 }
 0x3f6   : > { %v1528_v40 = vpop.eup %1527 }
 0x3f7   : > { %v1041_v41 = vmul.f32 1.442695, %v1038_v39  ;;  %v732_v42 = vsel %vm536_vm2, %v1528_v40, 0.0  ;;  %v739_v45 = vpack.c.bf16 %v1528_v40, %v1526_v32  ;;  %v947_v40 = vld [vmem:[#allocation4 + $0x28] sm:$0xff] }
 0x3f8   : > { %733 = vadd.xlane.f32.xlu1 %v732_v42  ;;  %v741_v43 = vpop.permute.xlu1 %740 }
 0x3f9   : > { %1535 = vpow2.f32 %v1041_v41  ;;  %1422 = vmatpush3.bf16.msra.mxu0 %v741_v43 }
 0x3fa   : > { %v1530_v44 = vpop.eup %1529  ;;  %1433 = vmatprep.subr.bf16.mxu0 %v1605_v6  ;;  %1537 = vpow2.f32 %v707_v61 }
 0x3fb   : > { %v887_v47 = vsel %vm536_vm2, %v1530_v44, 0.0  ;;  %1539 = vpow2.f32 %v709_v62 }
 0x3fc   : > { %888 = vadd.xlane.f32.xlu0 %v887_v47  ;;  %1424 = vmatmul.mubr.msk.bf16.vlgmr.msra.gmra.mxu0 %vm536_vm2, %v739_v45  ;;  %v899_v48 = vpop.permute.xlu1 %898 }
 0x3fd   : > { %1434 = vmatpush3.bf16.msra.mxu0 %v899_v48  ;;  %1435 = vmatprep.mubr.msk.bf16.mxu0 %vm1606_vm1, %v1605_v6 }
 0x3fe   : > { %v1532_v50 = vpop.eup %1531  ;;  %1445 = vmatprep.subr.bf16.mxu0 %v1605_v6 }
 0x3ff   : > { %v890_v51 = vsel %vm536_vm2, %v1532_v50, 0.0  ;;  %v897_v53 = vpack.c.bf16 %v1532_v50, %v1530_v44 }
 0x400   : > { %891 = vadd.xlane.f32.xlu1 %v890_v51 }
 0x402   : > { %v1534_v52 = vpop.eup %1533 }
 0x403   : > { %v1045_v55 = vsel %vm536_vm2, %v1534_v52, 0.0 }
 0x404   : > { %1046 = vadd.xlane.f32.xlu0 %v1045_v55  ;;  %1436 = vmatmul.mubr.msk.bf16.vlgmr.msra.gmra.mxu0 %vm536_vm2, %v897_v53 }
 0x405   : > { %1446 = vmatpush3.bf16.msra.mxu0 %v1057_v54  ;;  %1447 = vmatprep.mubr.msk.bf16.mxu0 %vm1606_vm1, %v1605_v6  ;;  %v865_v6 = vmul.f32 1.442695, %v863_v63 }
 0x406   : > { %v1536_v56 = vpop.eup %1535 }
 0x407   : > { %v1048_v57 = vsel %vm536_vm2, %v1536_v56, 0.0  ;;  %v1055_v58 = vpack.c.bf16 %v1536_v56, %v1534_v52  ;;  %1541 = vpow2.f32 %v865_v6  ;;  %v1538_v8 = vpop.eup %1537  ;;  %v1104_v52 = vld [vmem:[#allocation4 + $0x30] sm:$0xff] }
 0x408   : > { %1049 = vadd.xlane.f32.xlu1 %v1048_v57  ;;  %1543 = vpow2.f32 %v867_v1  ;;  %v1540_v10 = vpop.eup %1539  ;;  %v727_v12 = vmul.f32 0.0, %v1538_v8  ;;  %v790_v20 = vmul.f32 %v1538_v8, %v788_v16 }
 0x409   : > { %1545 = vpow2.f32 %v1023_v5  ;;  %v728_v14 = vmul.f32 0.0, %v1540_v10  ;;  %v791_v30 = vmul.f32 %v1540_v10, %v789_v22 }
 0x40a   : > { %1547 = vpow2.f32 %v1025_v9 }
 0x40c   : > { %1448 = vmatmul.mubr.msk.bf16.vlgmr.msra.gmra.mxu0 %vm536_vm2, %v1055_v58 }
 0x411   : > { %v1825_v4 = vpop.xlane.xlu0 %573 }
 0x414   : > { %v1542_v19 = vpop.eup %1541 }
 0x415   : > { %v1544_v18 = vpop.eup %1543  ;;  %v885_v26 = vmul.f32 0.0, %v1542_v19  ;;  %v948_v37 = vmul.f32 %v1542_v19, %v946_v33 }
 0x416   : > { %v886_v29 = vmul.f32 0.0, %v1544_v18  ;;  %v1546_v36 = vpop.eup %1545  ;;  %v949_v48 = vmul.f32 %v1544_v18, %v947_v40 }
 0x417   : > { %v1548_v38 = vpop.eup %1547  ;;  %v1043_v43 = vmul.f32 0.0, %v1546_v36  ;;  %v1106_v60 = vmul.f32 %v1546_v36, %v1104_v52 }
 0x418   : > { %v1044_v47 = vmul.f32 0.0, %v1548_v38  ;;  %v1107_v3 = vmul.f32 %v1548_v38, %v1105_v0 }
 0x42e   : > { %v1827_v7 = vpop.xlane.xlu1 %570 }
 0x47d   : > { %v731_v11 = vpop.xlane.xlu0 %730 }
 0x47e   : > { %v735_v15 = vadd.f32 %v731_v11, %v727_v12 }
 0x480   : > { %1549 = vrcp.f32 %v735_v15 }
 0x481   : > { %v734_v13 = vpop.xlane.xlu1 %733 }
 0x482   : > { %v736_v17 = vadd.f32 %v734_v13, %v728_v14 }
 0x484   : > { %1551 = vrcp.f32 %v736_v17 }
 0x485   : > { %v889_v24 = vpop.xlane.xlu0 %888 }
 0x486   : > { %v893_v23 = vadd.f32 %v889_v24, %v885_v26  ;;  %v567_v26 = vmul.f32 0.0, %v1762_v46 }
 0x488   : > { %1553 = vrcp.f32 %v893_v23 }
 0x489   : > { %v892_v27 = vpop.xlane.xlu1 %891 }
 0x48a   : > { %v894_v34 = vadd.f32 %v892_v27, %v886_v29 }
 0x48c   : > { %1555 = vrcp.f32 %v894_v34 }
 0x48d   : > { %v1047_v41 = vpop.xlane.xlu0 %1046  ;;  %v1550_v54 = vpop.eup %1549 }
 0x48e   : > { %v1051_v50 = vadd.f32 %v1047_v41, %v1043_v43 }
 0x490   : > { %1557 = vrcp.f32 %v1051_v50 }
 0x491   : > { %v1050_v44 = vpop.xlane.xlu1 %1049  ;;  %v1552_v57 = vpop.eup %1551 }
 0x492   : > { %v1052_v55 = vadd.f32 %v1050_v44, %v1044_v47 }
 0x494   : > { %1559 = vrcp.f32 %v1052_v55 }
 0x495   : > { %v1554_v9 = vpop.eup %1553 }
 0x499   : > { %v1556_v11 = vpop.eup %1555 }
 0x49d   : > { %v1558_v19 = vpop.eup %1557 }
 0x4bc   : > { %v780_v21 = vpop.f32.mrf.mxu0 }
 0x4bd   : > { %v792_v25 = vadd.f32 %v790_v20, %v780_v21  ;;  %v1560_v20 = vpop.eup %1559 }
 0x4be   : > { %v1425_v28 = vpop.f32.mrf.mxu0 }
 0x4bf   : > { %794 = vst.msk [vmem:[#allocation4 + $0x10] sm:$0xff] %vm457_vm0, %v792_v25  ;;  %v568_v25 = vmul.f32 0.0, %v1765_v49  ;;  %v575_v28 = vadd.f32 %v1827_v7, %v567_v26 }
 0x4c0   : > { %v783_v31 = vpop.f32.mrf.mxu0 }
 0x4c1   : > { %v793_v35 = vadd.f32 %v791_v30, %v783_v31  ;;  %v576_v27 = vadd.f32 %v1825_v4, %v568_v25 }
 0x4c2   : > { %v1426_v32 = vpop.f32.mrf.mxu0 }
 0x4c3   : > { %795 = vst.msk [vmem:[#allocation4 + $0x18] sm:$0xff] %vm457_vm0, %v793_v35  ;;  %1561 = vrcp.f32 %v576_v27  ;;  %v1117_v35 = vld [vmem:[#allocation4] sm:$0xff]  ;;  %v1118_v32 = vld [vmem:[#allocation4 + $0x8] sm:$0xff] }
 0x4c4   : > { %v938_v39 = vpop.f32.mrf.mxu0  ;;  %1563 = vrcp.f32 %v575_v28 }
 0x4c5   : > { %v950_v42 = vadd.f32 %v948_v37, %v938_v39 }
 0x4c6   : > { %v1437_v45 = vpop.f32.mrf.mxu0  ;;  %v1125_v53 = vld [vmem:[#allocation4 + $0x10] sm:$0xff] }
 0x4c7   : > { %952 = vst.msk [vmem:[#allocation4 + $0x20] sm:$0xff] %vm457_vm0, %v950_v42  ;;  %v1130_v61 = vmul.f32 %v1550_v54, %v1125_v53 }
 0x4c8   : > { %v941_v51 = vpop.f32.mrf.mxu0 }
 0x4c9   : > { %v951_v56 = vadd.f32 %v949_v48, %v941_v51 }
 0x4ca   : > { %v1438_v58 = vpop.f32.mrf.mxu0  ;;  %v1126_v59 = vld [vmem:[#allocation4 + $0x18] sm:$0xff] }
 0x4cb   : > { %953 = vst.msk [vmem:[#allocation4 + $0x28] sm:$0xff] %vm457_vm0, %v951_v56  ;;  %v1132_v62 = vmul.f32 %v1552_v57, %v1126_v59 }
 0x4cc   : > { %v1096_v63 = vpop.f32.mrf.mxu0 }
 0x4cd   : > { %v1108_v6 = vadd.f32 %v1106_v60, %v1096_v63  ;;  %v1500_v1 = vpack.i.bf16 %v1132_v62, %v1130_v61 }
 0x4ce   : > { %v1449_v2 = vpop.f32.mrf.mxu0  ;;  %v1133_v8 = vld [vmem:[#allocation4 + $0x20] sm:$0xff] }
 0x4cf   : > { %1110 = vst.msk [vmem:[#allocation4 + $0x30] sm:$0xff] %vm457_vm0, %v1108_v6  ;;  %1501 = vrot.lane.b32.xlu0 %v1500_v1, %s1610_s29  ;;  %v1138_v14 = vmul.f32 %v1554_v9, %v1133_v8 }
 0x4d0   : > { %v1099_v5 = vpop.f32.mrf.mxu0  ;;  %v1562_v30 = vpop.eup %1561 }
 0x4d1   : > { %v1109_v10 = vadd.f32 %v1107_v3, %v1099_v5  ;;  %v1564_v31 = vpop.eup %1563  ;;  %v1124_v46 = vmul.f32 %v1562_v30, %v1118_v32 }
 0x4d2   : > { %v1450_v12 = vpop.f32.mrf.mxu0  ;;  %v1134_v13 = vld [vmem:[#allocation4 + $0x28] sm:$0xff]  ;;  %v1122_v37 = vmul.f32 %v1564_v31, %v1117_v35 }
 0x4d3   : > { %1111 = vst.msk [vmem:[#allocation4 + $0x38] sm:$0xff] %vm457_vm0, %v1109_v10  ;;  %v1140_v15 = vmul.f32 %v1556_v11, %v1134_v13 }
 0x4d5   : > { %v1505_v16 = vpack.i.bf16 %v1140_v15, %v1138_v14 }
 0x4d6   : > { %v1141_v17 = vld [vmem:[#allocation4 + $0x30] sm:$0xff] }
 0x4d7   : > { %1506 = vrot.lane.b32.xlu1 %v1505_v16, %s1609_s28  ;;  %v1146_v21 = vmul.f32 %v1558_v19, %v1141_v17 }
 0x4da   : > { %v1142_v18 = vld [vmem:[#allocation4 + $0x38] sm:$0xff] }
 0x4db   : > { %v1148_v22 = vmul.f32 %v1560_v20, %v1142_v18 }
 0x4dd   : > { %v1510_v24 = vpack.i.bf16 %v1148_v22, %v1146_v21 }
 0x4df   : > { %1511 = vrot.lane.b32.xlu1 %v1510_v24, %s1608_s26 }
 0x541   : > { %v1502_v29 = vpop.permute.xlu0 %1501 }
 0x542   : > { %v1504_v33 = vunpack.i.h.bf16 %v1502_v29  ;;  %v1503_v34 = vunpack.i.l.bf16 %v1502_v29 }
 0x544   : > { %v1174_v7 = vsel %vm457_vm0, %v1124_v46, %v1504_v33  ;;  %v1173_v38 = vsel %vm457_vm0, %v1122_v37, %v1503_v34 }
 0x549   : > { %v1507_v23 = vpop.permute.xlu1 %1506 }
 0x54a   : > { %v1509_v36 = vunpack.i.h.bf16 %v1507_v23  ;;  %v1508_v49 = vunpack.i.l.bf16 %v1507_v23 }
 0x54c   : > { %v1177_v41 = vsel %vm1175_vm3, %v1174_v7, %v1509_v36  ;;  %v1176_v42 = vsel %vm1175_vm3, %v1173_v38, %v1508_v49 }
 0x551   : > { %v1512_v4 = vpop.permute.xlu1 %1511 }
 0x552   : > { %v1514_v39 = vunpack.i.h.bf16 %v1512_v4  ;;  %v1513_v40 = vunpack.i.l.bf16 %v1512_v4 }
 0x554   : > { %v1180_v43 = vsel %vm1178_vm4, %v1177_v41, %v1514_v39  ;;  %v1179_v44 = vsel %vm1178_vm4, %v1176_v42, %v1513_v40 }
 0x555   : > { %v1385_v45 = vpack.c.bf16 %v1180_v43, %v1179_v44 }
 0x557   : > { %1386 = vst [vmem:[%s433_s6] sm:$0xff] %v1385_v45  }
 0x558 PF: > { %s13_s16 = sadd.s32 1, %s1603_s16   ;;  %s1869_s12 = smov %s1591_s13 }
 0x559   : > { %p10_p10 = scmp.ge.s32.totalorder %s13_s16, 4   ;;  %s1870_s13 = smov %s1670_s21 }
 0x55a   : > { %s1871_s14 = smov %s1599_s15  ;;  %s1872_s15 = smov %s1874_s17 }
 0x55b   :  { %12 = sbr.rel (!%p10_p10) target bundleno = 3 (0x3), region = 223 }

// kernel: transformer_forward.33
= control target key start
LH: loop header
LB: loop body
LE: loop exit
PB: predicated region body
PF: predicated region fallthrough
CT: control target
= control target key end

     0   :  { %s791_s15 = smov 0   ;;  %s890_s0 = inlined_call_operand.vmem [shape: bf16[32,384], index: 0, kind: input, shape index: {}]   ;;  %s891_s1 = inlined_call_operand.vmem [shape: bf16[384,128], index: 1, kind: input, shape index: {}]   ;;  %s892_s2 = inlined_call_operand.vmem [shape: f32[1,128], index: 2, kind: input, shape index: {}]   ;;  %s893_s3 = inlined_call_operand.vmem [shape: bf16[32,128], index: 3, kind: input, shape index: {}]   ;;  %s894_s4 = inlined_call_operand.vmem [shape: bf16[32,128], index: 4, kind: output, shape index: {}]  }
   0x1 LB: > { %s612_s16 = sadd.s32 4294967295, %s762_s15   ;;  %p616_p0 = scmp.ge.s32.totalorder %s762_s15, 1  ;;  %s762_s15 = sphi %s791_s15, %s14_s15  }
   0x2   : > { %p175_p1 = scmp.lt.s32.totalorder %s762_s15, 3 }
   0x4   : > { %p176_p2 = pnand %p616_p0, %p175_p1 }
   0x5   : > { %s617_s7 = sshll.u32 (!%p176_p2), %s612_s16, 1 }
   0x6   : > { %179 = sbr.rel (%p176_p2) target bundleno = 254 (0xfe), region = 36  ;;  %p208_p3 = scmp.lt.s32.totalorder (!%p176_p2), %s617_s7, 3 }
   0xb   : > { %v728_v0 = vld [vmem:[%s891_s1 + $0x78] sm:$0xff]   ;;  %v764_v1 = vmov 0.0   ;;  %v731_v4 = vld [vmem:[%s891_s1 + $0x70] sm:$0xff]   ;;  %vm765_vm0 = vmmov 0   ;;  %v734_v7 = vld [vmem:[%s891_s1 + $0x68] sm:$0xff]   ;;  %s896_s7 = smov (!%p208_p3, %s617_s7), 3 }
   0xc   : > { %697 = vmatprep.subr.bf16.mxu1 %v764_v1  ;;  %v729_v2 = vld [vmem:[%s891_s1 + $0x38] sm:$0xff]   ;;  %666 = vmatprep.subr.bf16.mxu0 %v728_v0  ;;  %v732_v5 = vld [vmem:[%s891_s1 + $0x30] sm:$0xff]   ;;  %v735_v8 = vld [vmem:[%s891_s1 + $0x28] sm:$0xff]   ;;  %s717_s27 = smul.u32 12, %s896_s7  ;;  %s620_s21 = sshll.u32 %s896_s7, 2 }
   0xd   : > { %v730_v3 = vld [vmem:[%s891_s1 + $0xb8] sm:$0xff]   ;;  %667 = vmatpush3.bf16.msra.mxu0 %v729_v2  ;;  %713 = vmatprep.mubr.msk.bf16.mxu1 %vm765_vm0, %v764_v1  ;;  %v733_v6 = vld [vmem:[%s891_s1 + $0xb0] sm:$0xff]   ;;  %v736_v9 = vld [vmem:[%s891_s1 + $0xa8] sm:$0xff]   ;;  %s218_s26 = scalar_lea.vmem %s893_s3, %s620_s21  ;;  %s224_s28 = scalar_lea.vmem %s894_s4, %s620_s21 }
   0xe   : > { %698 = vmatpush3.bf16.msra.mxu1 %v730_v3  ;;  %668 = vmatprep.subr.bf16.mxu0 %v731_v4  ;;  %v737_v10 = vld [vmem:[%s891_s1 + $0x60] sm:$0xff]   ;;  %v740_v13 = vld [vmem:[%s891_s1 + $0x58] sm:$0xff]   ;;  %v743_v16 = vld [vmem:[%s891_s1 + $0x50] sm:$0xff]   ;;  %s212_s11 = scalar_lea.vmem %s890_s0, %s717_s27 }
   0xf   : > { %699 = vmatprep.subr.bf16.mxu1 %v764_v1  ;;  %v738_v11 = vld [vmem:[%s891_s1 + $0x20] sm:$0xff]   ;;  %v741_v14 = vld [vmem:[%s891_s1 + $0x18] sm:$0xff]   ;;  %v744_v17 = vld [vmem:[%s891_s1 + $0x10] sm:$0xff]  }
  0x10   : > { %v739_v12 = vld [vmem:[%s891_s1 + $0xa0] sm:$0xff]   ;;  %v742_v15 = vld [vmem:[%s891_s1 + $0x98] sm:$0xff]   ;;  %v745_v18 = vld [vmem:[%s891_s1 + $0x90] sm:$0xff]  }
  0x11   : > { %669 = vmatpush3.bf16.msra.mxu0 %v732_v5  ;;  %v746_v19 = vld [vmem:[%s891_s1 + $0x48] sm:$0xff]   ;;  %v749_v22 = vld [vmem:[%s891_s1 + $0x40] sm:$0xff]  }
  0x12   : > { %700 = vmatpush3.bf16.msra.mxu1 %v733_v6  ;;  %670 = vmatprep.subr.bf16.mxu0 %v734_v7  ;;  %v747_v20 = vld [vmem:[%s891_s1 + $0x8] sm:$0xff]   ;;  %v754_v23 = vld [vmem:[%s212_s11 + $0x4] ss:$12 sps:$4 sm:$0xff]   ;;  %v623_v30 = vld [vmem:[%s892_s2] ss:$0 sm:$0xff] }
  0x13   : > { %701 = vmatprep.subr.bf16.mxu1 %v764_v1  ;;  %v748_v21 = vld [vmem:[%s891_s1 + $0x88] sm:$0xff]   ;;  %v750_v24 = vld [vmem:[%s891_s1] sm:$0xff]   ;;  %478 = vmatprep.mubr.bf16.mxu0 %v754_v23 }
  0x14   : > { %v751_v25 = vld [vmem:[%s891_s1 + $0x80] sm:$0xff]   ;;  %v755_v27 = vld [vmem:[%s212_s11 + $0x8] ss:$12 sps:$4 sm:$0xff]  }
  0x15   : > { %671 = vmatpush3.bf16.msra.mxu0 %v735_v8  ;;  %v752_v26 = vld [vmem:[%s212_s11] ss:$12 sps:$4 sm:$0xff]  }
  0x16   : > { %702 = vmatpush3.bf16.msra.mxu1 %v736_v9  ;;  %672 = vmatprep.subr.bf16.mxu0 %v737_v10  ;;  %v658_v37 = vld [vmem:[%s218_s26] sm:$0xff]  }
  0x17   : > { %703 = vmatprep.subr.bf16.mxu1 %v764_v1  ;;  %v659_v42 = vunpack.c.l.bf16 %v658_v37  ;;  %v660_v44 = vunpack.c.h.bf16 %v658_v37 }
  0x19   : > { %673 = vmatpush3.bf16.msra.mxu0 %v738_v11 }
  0x1a   : > { %704 = vmatpush3.bf16.msra.mxu1 %v739_v12  ;;  %674 = vmatprep.subr.bf16.mxu0 %v740_v13 }
  0x1b   : > { %705 = vmatprep.subr.bf16.mxu1 %v764_v1 }
  0x1d   : > { %675 = vmatpush3.bf16.msra.mxu0 %v741_v14 }
  0x1e   : > { %706 = vmatpush3.bf16.msra.mxu1 %v742_v15  ;;  %676 = vmatprep.subr.bf16.mxu0 %v743_v16 }
  0x1f   : > { %707 = vmatprep.subr.bf16.mxu1 %v764_v1 }
  0x21   : > { %677 = vmatpush3.bf16.msra.mxu0 %v744_v17 }
  0x22   : > { %708 = vmatpush3.bf16.msra.mxu1 %v745_v18  ;;  %678 = vmatprep.subr.bf16.mxu0 %v746_v19 }
  0x23   : > { %709 = vmatprep.subr.bf16.mxu1 %v764_v1 }
  0x25   : > { %679 = vmatpush3.bf16.msra.mxu0 %v747_v20 }
  0x26   : > { %710 = vmatpush3.bf16.msra.mxu1 %v748_v21  ;;  %680 = vmatprep.subr.bf16.mxu0 %v749_v22 }
  0x27   : > { %711 = vmatprep.subr.bf16.mxu1 %v764_v1 }
  0x29   : > { %681 = vmatpush3.bf16.msra.mxu0 %v750_v24 }
  0x2a   : > { %712 = vmatpush3.bf16.msra.mxu1 %v751_v25 }
  0x2c   : > { %479 = vmatmul.mubr.bf16.vlgmr.msra.gmra.mxu0 %v752_v26 }
  0x2d   : > { %714 = vmatmul.mubr.bf16.vlgmr.msra.gmra.mxu1 %v755_v27 }
  0xec   : > { %v682_v28 = vpop.f32.mrf.mxu0 }
  0xed   : > { %v521_v29 = vpop.f32.mrf.mxu1 }
  0xee   : > { %v683_v31 = vpop.f32.mrf.mxu0 }
  0xef   : > { %v684_v32 = vadd.f32 %v683_v31, %v682_v28  ;;  %v715_v33 = vpop.f32.mrf.mxu1 }
  0xf0   : > { %v685_v34 = vpop.f32.mrf.mxu0 }
  0xf1   : > { %v481_v35 = vadd.f32 %v684_v32, %v623_v30  ;;  %v524_v36 = vpop.f32.mrf.mxu1 }
  0xf2   : > { %v686_v38 = vpop.f32.mrf.mxu0 }
  0xf3   : > { %v687_v39 = vadd.f32 %v686_v38, %v685_v34  ;;  %v716_v40 = vpop.f32.mrf.mxu1  ;;  %v522_v41 = vadd.f32 %v521_v29, %v481_v35 }
  0xf5   : > { %v484_v43 = vadd.f32 %v687_v39, %v623_v30  ;;  %v532_v46 = vadd.f32 %v659_v42, %v522_v41 }
  0xf7   : > { %v525_v45 = vadd.f32 %v524_v36, %v484_v43 }
  0xf9   : > { %v533_v47 = vadd.f32 %v660_v44, %v525_v45 }
  0xfb   : > { %v664_v48 = vpack.c.bf16 %v533_v47, %v532_v46 }
  0xfd   : > { %665 = vst [vmem:[%s224_s28] sm:$0xff] %v664_v48  }
  0xfe PF: > { %s14_s15 = sadd.s32 1, %s762_s15  }
  0xff   : > { %p11_p4 = scmp.ge.s32.totalorder %s14_s15, 4  }
 0x101   :  { %13 = sbr.rel (!%p11_p4) target bundleno = 1 (0x1), region = 69 }

// kernel: transformer_forward.32
= control target key start
LH: loop header
LB: loop body
LE: loop exit
PB: predicated region body
PF: predicated region fallthrough
CT: control target
= control target key end

     0   :  { %s829_s18 = smov 0   ;;  %s950_s0 = inlined_call_operand.vmem [shape: bf16[32,128], index: 0, kind: input, shape index: {}]   ;;  %s951_s1 = inlined_call_operand.vmem [shape: f32[1,128], index: 1, kind: input, shape index: {}]   ;;  %s952_s2 = inlined_call_operand.vmem [shape: f32[1,128], index: 2, kind: input, shape index: {}]   ;;  %s953_s3 = inlined_call_operand.vmem [shape: bf16[128,384], index: 3, kind: input, shape index: {}]   ;;  %s954_s4 = inlined_call_operand.vmem [shape: f32[1,384], index: 4, kind: input, shape index: {}]   ;;  %s955_s5 = inlined_call_operand.vmem [shape: bf16[32,384], index: 5, kind: output, shape index: {}]  }
   0x1 LB: > { %s650_s19 = sadd.s32 4294967295, %s794_s18   ;;  %p654_p0 = scmp.ge.s32.totalorder %s794_s18, 1  ;;  %s794_s18 = sphi %s829_s18, %s15_s18  }
   0x2   : > { %p188_p1 = scmp.lt.s32.totalorder %s794_s18, 3 }
   0x4   : > { %p189_p2 = pnand %p654_p0, %p188_p1 }
   0x5   : > { %s655_s20 = sshll.u32 (!%p189_p2), %s650_s19, 1 }
   0x6   : > { %192 = sbr.rel (%p189_p2) target bundleno = 553 (0x229), region = 40  ;;  %p218_p3 = scmp.lt.s32.totalorder (!%p189_p2), %s655_s20, 3 }
   0xb   : > { %s957_s20 = smov (!%p218_p3, %s655_s20), 3  ;;  %v740_v3 = vld [vmem:[%s953_s3 + $0xac] ss:$12 sps:$4 sm:$0xff]   ;;  %v742_v4 = vld [vmem:[%s953_s3 + $0xa8] ss:$12 sps:$4 sm:$0xff]   ;;  %v796_v5 = vmov 0.0   ;;  %v311_v54 = vlaneseq }
   0xc   : > { %s656_s21 = sshll.u32 %s957_s20, 2  ;;  %708 = vmatprep.subr.bf16.mxu1 %v796_v5  ;;  %v743_v6 = vld [vmem:[%s953_s3 + $0xb0] ss:$12 sps:$4 sm:$0xff]   ;;  %454 = vmatprep.subr.bf16.mxu0 %v740_v3  ;;  %v744_v15 = vld [vmem:[%s953_s3 + $0x94] ss:$12 sps:$4 sm:$0xff]   ;;  %v797_v28 = vmov 0  }
   0xd   : > { %s221_s24 = scalar_lea.vmem %s950_s0, %s656_s21  ;;  %455 = vmatpush1.bf16.msra.mxu0 %v742_v4  ;;  %709 = vmatpush3.bf16.msra.mxu1 %v743_v6  ;;  %v746_v16 = vld [vmem:[%s953_s3 + $0x90] ss:$12 sps:$4 sm:$0xff]   ;;  %v747_v17 = vld [vmem:[%s953_s3 + $0x98] ss:$12 sps:$4 sm:$0xff]   ;;  %v751_v20 = vld [vmem:[%s953_s3 + $0x80] ss:$12 sps:$4 sm:$0xff]  }
   0xe   : > { %v696_v0 = vld [vmem:[%s221_s24] sm:$0xff]   ;;  %710 = vmatprep.subr.bf16.mxu1 %v796_v5  ;;  %456 = vmatprep.subr.bf16.mxu0 %v744_v15  ;;  %v748_v18 = vld [vmem:[%s953_s3 + $0x7c] ss:$12 sps:$4 sm:$0xff]   ;;  %v756_v24 = vld [vmem:[%s953_s3 + $0x4c] ss:$12 sps:$4 sm:$0xff]   ;;  %vm798_vm0 = vmmov 0  }
   0xf   : > { %v697_v1 = vunpack.c.l.bf16 %v696_v0  ;;  %v698_v2 = vunpack.c.h.bf16 %v696_v0  ;;  %v750_v19 = vld [vmem:[%s953_s3 + $0x78] ss:$12 sps:$4 sm:$0xff]   ;;  %v754_v22 = vld [vmem:[%s953_s3 + $0x60] ss:$12 sps:$4 sm:$0xff]   ;;  %v755_v23 = vld [vmem:[%s953_s3 + $0x68] ss:$12 sps:$4 sm:$0xff]   ;;  %486 = vmatprep.mubr.bf16.mxu0 %v797_v28  ;;  %724 = vmatprep.mubr.msk.bf16.mxu1 %vm798_vm0, %v796_v5 }
  0x10   : > { %v752_v21 = vld [vmem:[%s953_s3 + $0x64] ss:$12 sps:$4 sm:$0xff]   ;;  %v758_v25 = vld [vmem:[%s953_s3 + $0x48] ss:$12 sps:$4 sm:$0xff]   ;;  %v767_v33 = vld [vmem:[%s953_s3 + $0x20] ss:$12 sps:$4 sm:$0xff]  }
  0x11   : > { %235 = vadd.xlane.f32.xlu0 %v697_v1  ;;  %457 = vmatpush1.bf16.msra.mxu0 %v746_v16  ;;  %v759_v26 = vld [vmem:[%s953_s3 + $0x50] ss:$12 sps:$4 sm:$0xff]   ;;  %v760_v27 = vld [vmem:[%s953_s3 + $0x34] ss:$12 sps:$4 sm:$0xff]   ;;  %v763_v30 = vld [vmem:[%s953_s3 + $0x38] ss:$12 sps:$4 sm:$0xff]  }
  0x12   : > { %711 = vmatpush3.bf16.msra.mxu1 %v747_v17  ;;  %458 = vmatprep.subr.bf16.mxu0 %v748_v18  ;;  %v762_v29 = vld [vmem:[%s953_s3 + $0x30] ss:$12 sps:$4 sm:$0xff]   ;;  %v766_v32 = vld [vmem:[%s953_s3 + $0x18] ss:$12 sps:$4 sm:$0xff]   ;;  %v770_v35 = vld [vmem:[%s953_s3] ss:$12 sps:$4 sm:$0xff]  }
  0x13   : > { %712 = vmatprep.subr.bf16.mxu1 %v796_v5  ;;  %v764_v31 = vld [vmem:[%s953_s3 + $0x1c] ss:$12 sps:$4 sm:$0xff]   ;;  %v768_v34 = vld [vmem:[%s953_s3 + $0x4] ss:$12 sps:$4 sm:$0xff]   ;;  %v659_v45 = vld [vmem:[%s951_s1] ss:$0 sm:$0xff] }
  0x14   : > { %v771_v36 = vld [vmem:[%s953_s3 + $0x8] ss:$12 sps:$4 sm:$0xff]   ;;  %v660_v49 = vld [vmem:[%s952_s2] ss:$0 sm:$0xff]  ;;  %v312_v55 = vshrl.u32 %v311_v54, 7  ;;  %s728_s8 = smul.u32 12, %s957_s20 }
  0x15   : > { %237 = vadd.xlane.f32.xlu0 %v698_v2  ;;  %459 = vmatpush1.bf16.msra.mxu0 %v750_v19  ;;  %v309_v58 = vld [vmem:[%s954_s4] sm:$0x7] }
  0x16   : > { %713 = vmatpush3.bf16.msra.mxu1 %v751_v20  ;;  %460 = vmatprep.subr.bf16.mxu0 %v752_v21  ;;  %v313_v56 = vsub.s32 0, %v312_v55  ;;  %v321_v57 = vsub.s32 2, %v312_v55  ;;  %v317_v59 = vsub.s32 1, %v312_v55  ;;  %s228_s11 = scalar_lea.vmem %s955_s5, %s728_s8 }
  0x17   : > { %714 = vmatprep.subr.bf16.mxu1 %v796_v5 }
  0x18   : > { %v314_v60 = vrot.slane %v309_v58, %v313_v56  ;;  %v322_v61 = vrot.slane %v309_v58, %v321_v57  ;;  %v318_v0 = vrot.slane %v309_v58, %v317_v59 }
  0x19   : > { %461 = vmatpush1.bf16.msra.mxu0 %v754_v22 }
  0x1a   : > { %715 = vmatpush3.bf16.msra.mxu1 %v755_v23  ;;  %462 = vmatprep.subr.bf16.mxu0 %v756_v24 }
  0x1b   : > { %716 = vmatprep.subr.bf16.mxu1 %v796_v5 }
  0x1d   : > { %463 = vmatpush1.bf16.msra.mxu0 %v758_v25 }
  0x1e   : > { %717 = vmatpush3.bf16.msra.mxu1 %v759_v26  ;;  %464 = vmatprep.subr.bf16.mxu0 %v760_v27 }
  0x1f   : > { %718 = vmatprep.subr.bf16.mxu1 %v796_v5 }
  0x21   : > { %465 = vmatpush1.bf16.msra.mxu0 %v762_v29 }
  0x22   : > { %719 = vmatpush3.bf16.msra.mxu1 %v763_v30  ;;  %466 = vmatprep.subr.bf16.mxu0 %v764_v31 }
  0x23   : > { %720 = vmatprep.subr.bf16.mxu1 %v796_v5 }
  0x25   : > { %467 = vmatpush1.bf16.msra.mxu0 %v766_v32 }
  0x26   : > { %721 = vmatpush3.bf16.msra.mxu1 %v767_v33  ;;  %468 = vmatprep.subr.bf16.mxu0 %v768_v34 }
  0x27   : > { %722 = vmatprep.subr.bf16.mxu1 %v796_v5 }
  0x29   : > { %469 = vmatpush1.bf16.msra.mxu0 %v770_v35 }
  0x2a   : > { %723 = vmatpush3.bf16.msra.mxu1 %v771_v36 }
  0x9a   : > { %v236_v7 = vpop.xlane.xlu0 %235 }
  0x9b   : > { %v240_v8 = vmul.f32 0.0078125, %v236_v7 }
  0x9d   : > { %v854_v9 = vsub.f32 %v697_v1, %v240_v8 }
  0x9e   : > { %v238_v10 = vpop.xlane.xlu0 %237 }
  0x9f   : > { %v241_v11 = vmul.f32 0.0078125, %v238_v10  ;;  %v244_v12 = vmul.f32 %v854_v9, %v854_v9 }
  0xa1   : > { %v858_v13 = vsub.f32 %v698_v2, %v241_v11  ;;  %246 = vadd.xlane.f32.xlu1 %v244_v12 }
  0xa3   : > { %v245_v14 = vmul.f32 %v858_v13, %v858_v13 }
  0xa5   : > { %248 = vadd.xlane.f32.xlu1 %v245_v14 }
 0x12a   : > { %v247_v37 = vpop.xlane.xlu1 %246 }
 0x12b   : > { %v250_v38 = vmul.f32 0.0078125, %v247_v37 }
 0x12d   : > { %v252_v39 = vadd.f32 1e-06, %v250_v38 }
 0x12e   : > { %v249_v40 = vpop.xlane.xlu1 %248 }
 0x12f   : > { %772 = vrsqrt.f32 %v252_v39  ;;  %v251_v41 = vmul.f32 0.0078125, %v249_v40 }
 0x131   : > { %v253_v42 = vadd.f32 1e-06, %v251_v41 }
 0x133   : > { %774 = vrsqrt.f32 %v253_v42 }
 0x13c   : > { %v773_v43 = vpop.eup %772 }
 0x13d   : > { %v256_v44 = vmul.f32 %v773_v43, %v854_v9 }
 0x13f   : > { %v265_v48 = vmul.f32 %v659_v45, %v256_v44 }
 0x140   : > { %v775_v46 = vpop.eup %774 }
 0x141   : > { %v257_v47 = vmul.f32 %v775_v46, %v858_v13  ;;  %v274_v51 = vadd.f32 %v660_v49, %v265_v48 }
 0x143   : > { %v266_v50 = vmul.f32 %v659_v45, %v257_v47 }
 0x145   : > { %v275_v52 = vadd.f32 %v660_v49, %v266_v50 }
 0x147   : > { %v276_v53 = vpack.c.bf16 %v275_v52, %v274_v51 }
 0x149   : > { %487 = vmatmul.mubr.bf16.vlgmr.msra.gmra.mxu0 %v276_v53  ;;  %725 = vmatmul.mubr.bf16.vlgmr.msra.gmra.mxu1 %v276_v53 }
 0x209   : > { %v488_v62 = vpop.f32.mrf.mxu0  ;;  %v531_v63 = vpop.f32.mrf.mxu1 }
 0x20a   : > { %v489_v1 = vadd.f32 %v488_v62, %v314_v60  ;;  %v532_v2 = vadd.f32 %v531_v63, %v322_v61 }
 0x20b   : > { %v490_v3 = vpop.f32.mrf.mxu0  ;;  %v726_v4 = vpop.f32.mrf.mxu1 }
 0x20c   : > { %v544_v5 = vmul.f32 0.70710677, %v489_v1  ;;  %v546_v6 = vmul.f32 0.70710677, %v532_v2  ;;  %v491_v7 = vadd.f32 %v490_v3, %v318_v0  ;;  %v540_v22 = vmul.f32 0.5, %v532_v2 }
 0x20d   : > { %v492_v8 = vpop.f32.mrf.mxu0  ;;  %v534_v9 = vpop.f32.mrf.mxu1  ;;  %v538_v25 = vmul.f32 0.5, %v489_v1 }
 0x20e   : > { %776 = verf.f32 %v544_v5  ;;  %v493_v10 = vadd.f32 %v492_v8, %v314_v60  ;;  %v535_v11 = vadd.f32 %v534_v9, %v322_v61  ;;  %v545_v12 = vmul.f32 0.70710677, %v491_v7 }
 0x20f   : > { %778 = verf.f32 %v546_v6  ;;  %v494_v13 = vpop.f32.mrf.mxu0  ;;  %v727_v14 = vpop.f32.mrf.mxu1  ;;  %v539_v28 = vmul.f32 0.5, %v491_v7 }
 0x210   : > { %v547_v15 = vmul.f32 0.70710677, %v493_v10  ;;  %v549_v16 = vmul.f32 0.70710677, %v535_v11  ;;  %780 = verf.f32 %v545_v12  ;;  %v495_v17 = vadd.f32 %v494_v13, %v318_v0 }
 0x211   : > { %v543_v32 = vmul.f32 0.5, %v535_v11  ;;  %v541_v38 = vmul.f32 0.5, %v493_v10 }
 0x212   : > { %782 = verf.f32 %v547_v15  ;;  %v548_v18 = vmul.f32 0.70710677, %v495_v17  ;;  %v542_v41 = vmul.f32 0.5, %v495_v17 }
 0x213   : > { %784 = verf.f32 %v549_v16 }
 0x214   : > { %786 = verf.f32 %v548_v18 }
 0x21b   : > { %v777_v19 = vpop.eup %776 }
 0x21c   : > { %v779_v20 = vpop.eup %778  ;;  %v556_v21 = vadd.f32 1.0, %v777_v19 }
 0x21d   : > { %v558_v23 = vadd.f32 1.0, %v779_v20  ;;  %v781_v24 = vpop.eup %780 }
 0x21e   : > { %v557_v29 = vadd.f32 1.0, %v781_v24  ;;  %v562_v31 = vmul.f32 %v556_v21, %v538_v25 }
 0x21f   : > { %v783_v26 = vpop.eup %782  ;;  %v564_v27 = vmul.f32 %v558_v23, %v540_v22 }
 0x220   : > { %v785_v30 = vpop.eup %784  ;;  %v563_v34 = vmul.f32 %v557_v29, %v539_v28  ;;  %v559_v35 = vadd.f32 1.0, %v783_v26 }
 0x221   : > { %v692_v33 = vpack.c.bf16 %v564_v27, %v564_v27  ;;  %v561_v36 = vadd.f32 1.0, %v785_v30  ;;  %v787_v37 = vpop.eup %786 }
 0x222   : > { %v691_v39 = vpack.c.bf16 %v563_v34, %v562_v31  ;;  %v560_v42 = vadd.f32 1.0, %v787_v37  ;;  %v565_v43 = vmul.f32 %v559_v35, %v541_v38 }
 0x223   : > { %589 = vst [vmem:[%s228_s11 + $0x8] sm:$0xf] %v692_v33  ;;  %v567_v40 = vmul.f32 %v561_v36, %v543_v32 }
 0x224   : > { %588 = vst [vmem:[%s228_s11] sm:$0xff] %v691_v39  ;;  %v566_v45 = vmul.f32 %v560_v42, %v542_v41 }
 0x225   : > { %v694_v44 = vpack.c.bf16 %v567_v40, %v567_v40 }
 0x226   : > { %v693_v46 = vpack.c.bf16 %v566_v45, %v565_v43 }
 0x227   : > { %591 = vst [vmem:[%s228_s11 + $0x14] sm:$0xf] %v694_v44 }
 0x228   : > { %590 = vst [vmem:[%s228_s11 + $0xc] sm:$0xff] %v693_v46 }
 0x229 PF: > { %s15_s18 = sadd.s32 1, %s794_s18  }
 0x22a   : > { %p12_p4 = scmp.ge.s32.totalorder %s15_s18, 4  }
 0x22c   :  { %14 = sbr.rel (!%p12_p4) target bundleno = 1 (0x1), region = 70 }

// kernel: transformer_forward.52
= control target key start
LH: loop header
LB: loop body
LE: loop exit
PB: predicated region body
PF: predicated region fallthrough
CT: control target
= control target key end

     0   :  { %v63_v0 = vmov 0.0   ;;  %s95_s1 = inlined_call_operand.vmem [shape: f32[2,128], index: 1, kind: output, shape index: {}]   ;;  %s96_s0 = inlined_call_operand.vmem [shape: bf16[32,128], index: 0, kind: input, shape index: {}]  }
   0x1   :  { %12 = vst [vmem:[%s95_s1] sm:$0x3] %v63_v0  ;;  %v54_v1 = vld [vmem:[%s96_s0] sm:$0xff]   ;;  %v61_v2 = vld [vmem:[%s96_s0 + $0x8] sm:$0xff]  }
   0x2   :  { %v55_v3 = vunpack.c.l.bf16 %v54_v1  ;;  %v56_v4 = vunpack.c.h.bf16 %v54_v1  ;;  %v59_v5 = vunpack.c.l.bf16 %v61_v2  ;;  %v60_v6 = vunpack.c.h.bf16 %v61_v2 }
   0x4   :  { %v22_v7 = vadd.f32 %v56_v4, %v55_v3  ;;  %v34_v8 = vmul.f32 %v55_v3, %v55_v3  ;;  %v35_v9 = vmul.f32 %v56_v4, %v56_v4  ;;  %v36_v10 = vmul.f32 %v59_v5, %v59_v5 }
   0x5   :  { %v37_v12 = vmul.f32 %v60_v6, %v60_v6 }
   0x6   :  { %v23_v11 = vadd.f32 %v59_v5, %v22_v7  ;;  %v38_v13 = vadd.f32 %v35_v9, %v34_v8 }
   0x8   :  { %v24_v14 = vadd.f32 %v60_v6, %v23_v11  ;;  %v39_v15 = vadd.f32 %v38_v13, %v36_v10  ;;  %v21_v26 = vld [vmem:[%s95_s1] sm:$0x1]  ;;  %v33_v29 = vld [vmem:[%s95_s1 + $0x1] sm:$0x1] }
   0xa   :  { %v25_v16 = vrot.slane %v24_v14, 4  ;;  %v40_v17 = vadd.f32 %v39_v15, %v37_v12 }
   0xc   :  { %v26_v18 = vadd.f32 %v25_v16, %v24_v14  ;;  %v41_v19 = vrot.slane %v40_v17, 4 }
   0xe   :  { %v27_v20 = vrot.slane %v26_v18, 2  ;;  %v42_v21 = vadd.f32 %v41_v19, %v40_v17 }
  0x10   :  { %v28_v22 = vadd.f32 %v27_v20, %v26_v18  ;;  %v43_v23 = vrot.slane %v42_v21, 2 }
  0x12   :  { %v29_v24 = vrot.slane %v28_v22, 1  ;;  %v44_v25 = vadd.f32 %v43_v23, %v42_v21 }
  0x14   :  { %v30_v27 = vadd.f32 %v29_v24, %v28_v22  ;;  %v45_v28 = vrot.slane %v44_v25, 1 }
  0x16   :  { %v31_v30 = vadd.f32 %v30_v27, %v21_v26  ;;  %v46_v31 = vadd.f32 %v45_v28, %v44_v25 }
  0x18   :  { %32 = vst [vmem:[%s95_s1] sm:$0x1] %v31_v30  ;;  %v47_v32 = vadd.f32 %v46_v31, %v33_v29 }
  0x1a   :  { %48 = vst [vmem:[%s95_s1 + $0x1] sm:$0x1] %v47_v32 }

// kernel: transformer_forward.53
= control target key start
LH: loop header
LB: loop body
LE: loop exit
PB: predicated region body
PF: predicated region fallthrough
CT: control target
= control target key end

     0   :  { %8 = vsyncpa [#allocation3], 0  ;;  %s524_s0 = inlined_call_operand.vmem [shape: bf16[32,128], index: 0, kind: input, shape index: {}]   ;;  %s525_s1 = inlined_call_operand.vmem [shape: f32[1,128], index: 1, kind: input, shape index: {}]   ;;  %s526_s2 = inlined_call_operand.vmem [shape: f32[1,128], index: 2, kind: input, shape index: {}]   ;;  %s527_s3 = inlined_call_operand.hbm [shape: f32[32,128], index: 3, kind: output, shape index: {}]  }
   0x1   :  { %10 = vsyncpa [#allocation3 + $0x1], 0  ;;  %s417_s12 = smov 0   ;;  %s419_s13 = smov 0  }
   0x2   :  { %s421_s14 = smov 0   ;;  %s423_s15 = smov 0  }
   0x3 LB: > { %s438_s16 = sadd.s32 4294967295, %s392_s15   ;;  %s272_s17 = sadd.s32 4294967294, %s392_s15   ;;  %s392_s15 = sphi %s423_s15, %s533_s15   ;;  %s388_s14 = sphi %s421_s14, %s532_s14   ;;  %s384_s13 = sphi %s419_s13, %s531_s13   ;;  %s380_s12 = sphi %s417_s12, %s530_s12  }
   0x4   : > { %s442_s18 = sadd.s32 1, %s392_s15   ;;  %s91_s19 = sadd.s32 1, %s388_s14 }
   0x5   : > { %s88_s20 = ssub.s32 %s392_s15, %s442_s18  ;;  %p101_p0 = scmp.ne.s32.totalorder %s388_s14, %s384_s13 }
   0x6   : > { %p89_p1 = scmp.eq.s32.totalorder %s88_s20, 0  ;;  %p102_p2 = scmp.eq.s32.totalorder %s438_s16, 1 }
   0x7   : > { %p107_p3 = scmp.ne.s32.totalorder %s384_s13, %s380_s12  ;;  %p108_p4 = scmp.eq.s32.totalorder %s272_s17, 1 }
   0x8   : > { %s453_s21 = scalar_select %p89_p1, %s388_s14, %s91_s19  }
   0x9   : > { %p455_p5 = por %p102_p2, %p101_p0  ;;  %p459_p6 = por %p108_p4, %p107_p3 }
   0xa   : > { %p275_p7 = scmp.ge.s32.totalorder %s392_s15, 1  ;;  %p141_p8 = scmp.lt.s32.totalorder %s392_s15, 3 }
   0xc   : > { %p142_p9 = pnand %p275_p7, %p141_p8 }
   0xd   : > { %s162_s24 = sand.u32 (!%p142_p9), 1, %s384_s13   ;;  %s277_s25 = sshll.u32 (!%p142_p9), %s438_s16, 1 }
   0xe   : > { %145 = sbr.rel (%p142_p9) target bundleno = 43 (0x2b), region = 32  ;;  %p166_p10 = scmp.lt.s32.totalorder (!%p142_p9), %s277_s25, 3 }
   0xf   : > { %s276_s26 = sshll.u32 (!%p142_p9), %s162_s24, 4  ;;  %s286_s8 = sshll.u32 (!%p142_p9), %s438_s16, 8 }
  0x10   : > { %s164_s6 = scalar_lea.vmem (!%p142_p9), [#allocation2], %s276_s26  ;;  %s482_s19 = scalar_lea.hbm (!%p142_p9), %s527_s3, %s286_s8 }
  0x11   : > { %s210_s7 = sshll.u32 (!%p142_p9), %s164_s6, 4  ;;  %s484_s16 = scalar_lea.sflag (!%p142_p9), [#allocation3], %s162_s24  ;;  %s477_s7 = int_to_ptr.vmem [resolvable:$true] %s210_s7 }
  0x12   : > { %s332_s20 = scalar_lea.vmem (!%p142_p9), %s477_s7, 256 }
  0x13   : > { %s535_s25 = smov (!%p166_p10, %s277_s25), 3  ;;  %v279_v1 = vld [vmem:[%s525_s1] ss:$0 sm:$0xff]  ;;  %p333_p11 = scmp.ne.s32.totalorder %s477_s7, %s332_s20 }
  0x14   : > { %s278_s27 = sshll.u32 %s535_s25, 2  ;;  %v280_v4 = vld [vmem:[%s526_s2] ss:$0 sm:$0xff]  ;;  %s394_s25 = smov [#allocation2]  }
  0x15   : > { %s169_s30 = scalar_lea.vmem %s524_s0, %s278_s27  ;;  %p334_p12 = pnand %p333_p11, %p455_p5 }
  0x16   : > { %v288_v0 = vld [vmem:[%s169_s30] sm:$0xff]   ;;  %s336_s26 = sshll.u32 %s394_s25, 4  ;;  %s337_s26 = int_to_ptr.vmem [resolvable:$false] %s336_s26 }
  0x17   : > { %v289_v2 = vunpack.c.l.bf16 %v288_v0  ;;  %v290_v3 = vunpack.c.h.bf16 %v288_v0  ;;  %p335_p13 = pneg %p334_p12  ;;  %s338_s27 = scalar_lea.vmem %s337_s26, 512 }
  0x18   : > { %p339_p0 = scmp.lt.s32.totalorder %s477_s7, %s337_s26  ;;  %p340_p1 = scmp.lt.s32.totalorder %s338_s27, %s332_s20 }
  0x19   : > { %v183_v5 = vmul.f32 %v289_v2, %v279_v1  ;;  %v184_v6 = vmul.f32 %v290_v3, %v279_v1 }
  0x1a   : > { %p341_p2 = por %p340_p1, %p339_p0 }
  0x1b   : > { %v192_v7 = vadd.f32 %v280_v4, %v183_v5  ;;  %v193_v8 = vadd.f32 %v280_v4, %v184_v6 }
  0x1c   : > { %p342_p3 = pnand %p341_p2, %p335_p13 }
  0x1d   : > { %194 = vst [vmem:[%s164_s6] sm:$0xff] %v192_v7  ;;  %195 = vst [vmem:[%s164_s6 + $0x8] sm:$0xff] %v193_v8 }
  0x1e   : > { %345 = shalt.err (!%p342_p3)
}
  0x1f   : > { %s346_s24 = scalar_lea.hbm %s482_s19, 256  ;;  %s350_s30 = scalar_lea.hbm %s527_s3, 512 }
  0x20   : > { %p347_p4 = scmp.ne.s32.totalorder %s482_s19, %s346_s24  ;;  %p351_p9 = scmp.lt.s32.totalorder %s482_s19, %s527_s3 }
  0x21   : > { %p352_p10 = scmp.lt.s32.totalorder %s350_s30, %s346_s24 }
  0x22   : > { %p348_p7 = pnand %p347_p4, %p455_p5 }
  0x23   : > { %p353_p11 = por %p352_p10, %p351_p9 }
  0x24   : > { %p349_p8 = pneg %p348_p7 }
  0x26   : > { %p354_p12 = pnand %p353_p11, %p349_p8 }
  0x28   : > { %357 = shalt.err (!%p354_p12)
}
  0x29   : > { %s395_s6 = smov 128   ;;  %s396_s8 = smov 8  }
  0x2a   : > { %291 = dma.vmem_to_hbm [thread:$0]  (%p455_p5), %s477_s7, 256, %s482_s19, %s484_s16, %s395_s6, %s395_s6, %s396_s8  }
  0x2b PF: > { %p297_p13 = scmp.ge.s32.totalorder %s392_s15, 2  ;;  %s225_s9 = sand.u32 1, %s380_s12  }
  0x2c   : > { %s226_s10 = scalar_lea.sflag [#allocation3], %s225_s9 }
  0x2d   : > { %p294_p0 = pnand %p297_p13, %p459_p6 }
  0x2f   : > { %p295_p1 = pneg %p294_p0 }
  0x31   : > { %375 = dma.done.wait (%p295_p1), %s226_s10, 256  }
  0x32   : > { %377 = vsyncadd (%p295_p1), %s226_s10, 4294967040  ;;  %p13_p2 = scmp.ge.s32.totalorder %s442_s18, 4   ;;  %s530_s12 = smov %s384_s13 }
  0x33   : > { %s531_s13 = smov %s388_s14  ;;  %s532_s14 = smov %s453_s21 }
  0x34   : > { %s533_s15 = smov %s442_s18  ;;  %15 = sbr.rel (!%p13_p2) target bundleno = 3 (0x3), region = 67 }
  0x39   :  { %231 = vsyncpa [#allocation3], 1 }
  0x3a   :  { %233 = vsyncpa [#allocation3 + $0x1], 1 }

</bundles_post_ra>
